<compile_context>
chip_gen: v5e
topology: v5e:2x2
jax: 0.10.0
libtpu: 0.0.40
codegen_flags: <defaults>
</compile_context>

<pallas_src>
import jax
import jax.numpy as jnp
from jax.experimental import pallas as pl
from jax.experimental.pallas import tpu as pltpu

N_NODES = 55  # fixed by the module (att is 55x55, BN over 55*in_features)


# ----------------------------------------------------------------------------
# Kernel: one fused (TB, D) @ (D, D) GEMM + bias + tanh per layer, residual add.
# ----------------------------------------------------------------------------
def _gc_block_kernel(x_ref, k1_ref, k2_ref, s1_ref, s2_ref, o_ref):
    x = x_ref[...].astype(jnp.float32)                                  # (TB, D)
    y = jnp.tanh(
        jnp.dot(x, k1_ref[...], preferred_element_type=jnp.float32) + s1_ref[...]
    )                                                                   # (TB, D)
    y = jnp.tanh(
        jnp.dot(y, k2_ref[...], preferred_element_type=jnp.float32) + s2_ref[...]
    )                                                                   # (TB, D)
    o_ref[...] = (y + x).astype(o_ref.dtype)                            # residual


# ----------------------------------------------------------------------------
# Parameter folding: graph-conv + BN(eval) + bias  ->  one (D, D) operator + shift
# ----------------------------------------------------------------------------
def _fold_layer(w, att, bias, gamma, beta, mean, var, eps):
    f32 = jnp.float32
    w, att, bias = w.astype(f32), att.astype(f32), bias.astype(f32)
    gamma, beta = gamma.astype(f32), beta.astype(f32)
    mean, var = mean.astype(f32), var.astype(f32)

    scale = gamma / jnp.sqrt(var + eps)                      # (D,) = (55*F,)
    # y_flat[b, n*F+f] = sum_{m,g} x_flat[b, m*F+g] * att[n,m] * W[g,f]
    #                  = (x_flat @ kron(att^T, W))[b, n*F+f]
    K = jnp.kron(att.T, w)                                   # (D, D)
    K = K * scale[None, :]                                   # fold BN scale (columns)
    shift = beta - mean * scale + scale * jnp.tile(bias, N_NODES)   # fold gc bias
    return K, shift.reshape(1, -1)


def prepare_kernel_params(p, eps=1e-5):
    k1, s1 = _fold_layer(p["w1"], p["att1"], p["b1"],
                         p["gamma1"], p["beta1"], p["mean1"], p["var1"], eps)
    k2, s2 = _fold_layer(p["w2"], p["att2"], p["b2"],
                         p["gamma2"], p["beta2"], p["mean2"], p["var2"], eps)
    return k1, k2, s1, s2


def _round_up(a, m):
    return ((a + m - 1) // m) * m


# ----------------------------------------------------------------------------
# Wrapper
# ----------------------------------------------------------------------------
def gc_block_forward(x, params, *, block_b=128, eps=1e-5):
    """x: (B, 55, F). params: module-style parameter dict (see init_params)."""
    B, N, F = x.shape
    assert N == N_NODES
    D = N * F

    k1, k2, s1, s2 = prepare_kernel_params(params, eps)

    # Lane-dense I/O layout: (B, 55*F). Free trailing-dim reshape, no HBM copy.
    x_flat = x.reshape(B, D)

    # Batch tile: multiple of 8 (sublanes), aim for grid length >= 2 so the
    # "parallel" axis can shard across both TensorCores on v7x.
    TB = max(8, min(max(1, block_b), _round_up(-(-B // 2), 8)))
    Bp = _round_up(B, TB)
    x_in = jnp.pad(x_flat, ((0, Bp - B), (0, 0))) if Bp != B else x_flat

    const = lambda shape: pl.BlockSpec(shape, lambda b: (0, 0))

    out = pl.pallas_call(
        _gc_block_kernel,
        out_shape=jax.ShapeDtypeStruct((Bp, D), x.dtype),
        grid_spec=pltpu.PrefetchScalarGridSpec(
            num_scalar_prefetch=0,
            grid=(Bp // TB,),
            in_specs=[
                pl.BlockSpec((TB, D), lambda b: (b, 0)),   # x tile (lane-dense)
                const((D, D)),                             # fused operator, layer 1
                const((D, D)),                             # fused operator, layer 2
                const((1, D)),                             # fused shift, layer 1
                const((1, D)),                             # fused shift, layer 2
            ],
            out_specs=pl.BlockSpec((TB, D), lambda b: (b, 0)),
        ),
        compiler_params=pltpu.CompilerParams(
            dimension_semantics=("parallel",),
            vmem_limit_bytes=32 * 1024 * 1024,
        ),
    )(x_in, k1, k2, s1, s2)

    out = out[:B] if Bp != B else out
    return out.reshape(B, N, F)


# ----------------------------------------------------------------------------
# Module-style parameter init (mirrors GC_Block.__init__, eval mode with
# non-trivial running stats so the BN folding is actually exercised).
# ----------------------------------------------------------------------------
def init_params(key, in_features):
    F = in_features
    stdv = 1.0 / jnp.sqrt(jnp.float32(F))
    ks = jax.random.split(key, 14)
    unif = lambda k, shape: jax.random.uniform(k, shape, jnp.float32, -stdv, stdv)
    n_flat = N_NODES * F
    return {
        # gc1 / gc2 (GraphConvolution_att)
        "w1": unif(ks[0], (F, F)), "att1": unif(ks[1], (N_NODES, N_NODES)), "b1": unif(ks[2], (F,)),
        "w2": unif(ks[3], (F, F)), "att2": unif(ks[4], (N_NODES, N_NODES)), "b2": unif(ks[5], (F,)),
        # bn1 / bn2 (BatchNorm1d(55*F)) — eval-mode running stats
        "gamma1": 1.0 + 0.1 * jax.random.normal(ks[6], (n_flat,), jnp.float32),
        "beta1": 0.1 * jax.random.normal(ks[7], (n_flat,), jnp.float32),
        "mean1": 0.1 * jax.random.normal(ks[8], (n_flat,), jnp.float32),
        "var1": jax.random.uniform(ks[9], (n_flat,), jnp.float32, 0.5, 1.5),
        "gamma2": 1.0 + 0.1 * jax.random.normal(ks[10], (n_flat,), jnp.float32),
        "beta2": 0.1 * jax.random.normal(ks[11], (n_flat,), jnp.float32),
        "mean2": 0.1 * jax.random.normal(ks[12], (n_flat,), jnp.float32),
        "var2": jax.random.uniform(ks[13], (n_flat,), jnp.float32, 0.5, 1.5),
    }


# ----------------------------------------------------------------------------
# Pure-JAX reference mirroring the PyTorch module (eval mode).
# ----------------------------------------------------------------------------
def gc_block_reference(x, p, eps=1e-5):
    def gc(h, w, att, b):
        return jnp.einsum("nm,bmf->bnf", att, h @ w) + b

    def bn(h, g, bta, m, v):
        B = h.shape[0]
        hf = h.reshape(B, -1)
        hf = (hf - m) / jnp.sqrt(v + eps) * g + bta
        return hf.reshape(h.shape)

    y = jnp.tanh(bn(gc(x, p["w1"], p["att1"], p["b1"]),
                    p["gamma1"], p["beta1"], p["mean1"], p["var1"]))
    y = jnp.tanh(bn(gc(y, p["w2"], p["att2"], p["b2"]),
                    p["gamma2"], p["beta2"], p["mean2"], p["var2"]))
    return y + x


if __name__ == "__main__":
    B, F = 6, 16
    key = jax.random.PRNGKey(0)
    kx, kp = jax.random.split(key)

    x = jax.random.normal(kx, (B, N_NODES, F), jnp.float32)
    params = init_params(kp, F)

    out = jax.block_until_ready(gc_block_forward(x, params))
    ref = gc_block_reference(x, params)

    assert out.shape == (B, N_NODES, F)
    max_err = jnp.max(jnp.abs(out - ref))
    assert jnp.allclose(out, ref, atol=2e-4, rtol=2e-4), \
        f"mismatch vs reference, max|err|={max_err}"
    print("KERNEL_OK")
</pallas_src>

<mosaic_0001>
module attributes {stable_mosaic.version = 11 : i64} {
  func.func @_gc_block_kernel(%arg0: i32, %arg1: memref<8x880xf32, #tpu.memory_space<vmem>>, %arg2: memref<880x880xf32, #tpu.memory_space<vmem>>, %arg3: memref<880x880xf32, #tpu.memory_space<vmem>>, %arg4: memref<1x880xf32, #tpu.memory_space<vmem>>, %arg5: memref<1x880xf32, #tpu.memory_space<vmem>>, %arg6: memref<8x880xf32, #tpu.memory_space<vmem>>) attributes {dimension_semantics = [#tpu.dimension_semantics<parallel>], iteration_bounds = array<i64: 1>, scalar_prefetch = 0 : i64, scratch_operands = 0 : i64, tpu.core_type = #tpu.core_type<tc>, window_params = [{transform_indices = @transform_0, window_bounds = array<i64: 8, 880>}, {pipeline_mode = #tpu.pipeline_mode<synchronous>, transform_indices = @transform_1, window_bounds = array<i64: 880, 880>}, {pipeline_mode = #tpu.pipeline_mode<synchronous>, transform_indices = @transform_2, window_bounds = array<i64: 880, 880>}, {pipeline_mode = #tpu.pipeline_mode<synchronous>, transform_indices = @transform_3, window_bounds = array<i64: 1, 880>}, {pipeline_mode = #tpu.pipeline_mode<synchronous>, transform_indices = @transform_4, window_bounds = array<i64: 1, 880>}, {transform_indices = @transform_5, window_bounds = array<i64: 8, 880>}]} {
    %c0 = arith.constant 0 : index
    %c0_0 = arith.constant 0 : index
    %0 = vector.load %arg1[%c0, %c0_0] : memref<8x880xf32, #tpu.memory_space<vmem>>, vector<8x880xf32>
    %c0_1 = arith.constant 0 : index
    %c0_2 = arith.constant 0 : index
    %1 = vector.load %arg2[%c0_1, %c0_2] : memref<880x880xf32, #tpu.memory_space<vmem>>, vector<880x880xf32>
    %cst = arith.constant dense<0.000000e+00> : vector<8x880xf32>
    %2 = tpu.matmul %0, %1, %cst {dimension_numbers = #tpu.dot_dimension_numbers<[1], [0], [0], [1], [0, 0, 1, 1], [], []>} : vector<8x880xf32>, vector<880x880xf32>, vector<8x880xf32> -> vector<8x880xf32>
    %c0_3 = arith.constant 0 : index
    %c0_4 = arith.constant 0 : index
    %3 = vector.load %arg4[%c0_3, %c0_4] : memref<1x880xf32, #tpu.memory_space<vmem>>, vector<1x880xf32>
    %4 = vector.broadcast %3 : vector<1x880xf32> to vector<8x880xf32>
    %5 = arith.addf %2, %4 : vector<8x880xf32>
    %6 = math.tanh %5 : vector<8x880xf32>
    %c0_5 = arith.constant 0 : index
    %c0_6 = arith.constant 0 : index
    %7 = vector.load %arg3[%c0_5, %c0_6] : memref<880x880xf32, #tpu.memory_space<vmem>>, vector<880x880xf32>
    %cst_7 = arith.constant dense<0.000000e+00> : vector<8x880xf32>
    %8 = tpu.matmul %6, %7, %cst_7 {dimension_numbers = #tpu.dot_dimension_numbers<[1], [0], [0], [1], [0, 0, 1, 1], [], []>} : vector<8x880xf32>, vector<880x880xf32>, vector<8x880xf32> -> vector<8x880xf32>
    %c0_8 = arith.constant 0 : index
    %c0_9 = arith.constant 0 : index
    %9 = vector.load %arg5[%c0_8, %c0_9] : memref<1x880xf32, #tpu.memory_space<vmem>>, vector<1x880xf32>
    %10 = vector.broadcast %9 : vector<1x880xf32> to vector<8x880xf32>
    %11 = arith.addf %8, %10 : vector<8x880xf32>
    %12 = math.tanh %11 : vector<8x880xf32>
    %13 = arith.addf %12, %0 : vector<8x880xf32>
    %c0_10 = arith.constant 0 : index
    %c0_11 = arith.constant 0 : index
    %14 = vector.load %arg6[%c0_10, %c0_11] : memref<8x880xf32, #tpu.memory_space<vmem>>, vector<8x880xf32>
    tpu.vector_store %arg6[%c0_10, %c0_11], %13 {strides = array<i32>} : memref<8x880xf32, #tpu.memory_space<vmem>>, vector<8x880xf32>,
    return
  }
  func.func @transform_0(%arg0: i32) -> (i32, i32) {
    %c0_i32 = arith.constant 0 : i32
    %c0_i32_0 = arith.constant 0 : i32
    return %arg0, %c0_i32 : i32, i32
  }
  func.func @transform_1(%arg0: i32) -> (i32, i32) {
    %c0_i32 = arith.constant 0 : i32
    %c0_i32_0 = arith.constant 0 : i32
    %c0_i32_1 = arith.constant 0 : i32
    return %c0_i32, %c0_i32_0 : i32, i32
  }
  func.func @transform_2(%arg0: i32) -> (i32, i32) {
    %c0_i32 = arith.constant 0 : i32
    %c0_i32_0 = arith.constant 0 : i32
    %c0_i32_1 = arith.constant 0 : i32
    return %c0_i32, %c0_i32_0 : i32, i32
  }
  func.func @transform_3(%arg0: i32) -> (i32, i32) {
    %c0_i32 = arith.constant 0 : i32
    %c0_i32_0 = arith.constant 0 : i32
    %c0_i32_1 = arith.constant 0 : i32
    return %c0_i32, %c0_i32_0 : i32, i32
  }
  func.func @transform_4(%arg0: i32) -> (i32, i32) {
    %c0_i32 = arith.constant 0 : i32
    %c0_i32_0 = arith.constant 0 : i32
    %c0_i32_1 = arith.constant 0 : i32
    return %c0_i32, %c0_i32_0 : i32, i32
  }
  func.func @transform_5(%arg0: i32) -> (i32, i32) {
    %c0_i32 = arith.constant 0 : i32
    %c0_i32_0 = arith.constant 0 : i32
    return %arg0, %c0_i32 : i32, i32
  }
}

</mosaic_0001>

<bundles_post_ra>
// kernel: tpu_custom_call.1
= control target key start
LH: loop header
LB: loop body
LE: loop exit
PB: predicated region body
PF: predicated region fallthrough
CT: control target
= control target key end

     0   :  { %10 = vsyncpa [#allocation3], 0  ;;  %s4203_s0 = inlined_call_operand.hbm [shape: f32[8,880], index: 0, kind: input, shape index: {}]   ;;  %s4204_s1 = inlined_call_operand.hbm [shape: f32[880,880], index: 1, kind: input, shape index: {}]   ;;  %s4205_s2 = inlined_call_operand.hbm [shape: f32[880,880], index: 2, kind: input, shape index: {}]   ;;  %s4206_s3 = inlined_call_operand.hbm [shape: f32[1,880], index: 3, kind: input, shape index: {}]   ;;  %s4207_s4 = inlined_call_operand.hbm [shape: f32[1,880], index: 4, kind: input, shape index: {}]   ;;  %s4208_s5 = inlined_call_operand.hbm [shape: f32[8,880], index: 5, kind: output, shape index: {}]  }
   0x1   :  { %11 = vsyncpa [#allocation6], 0 }
   0x2   :  { %12 = vsyncpa [#allocation9], 0  ;;  %s29_s20 = sshll.u32 %s4204_s1, 4  ;;  %s30_s20 = int_to_ptr.hbm [resolvable:$true] %s29_s20 }
   0x3   :  { %13 = vsyncpa [#allocation4], 0  ;;  %s3911_s21 = smov [#allocation5]   ;;  %s56_s25 = sshll.u32 %s4206_s3, 4  ;;  %s57_s25 = int_to_ptr.hbm [resolvable:$true] %s56_s25 }
   0x4   :  { %s31_s22 = sshll.u32 %s3911_s21, 4  ;;  %s3912_s26 = smov 896   ;;  %s32_s22 = int_to_ptr.vmem [resolvable:$true] %s31_s22 }
   0x5   :  { %s3913_s27 = smov 56   ;;  %s3914_s28 = smov [#allocation8]  }
   0x6   :  { %37 = dma.hbm_to_vmem [thread:$0]  %s30_s20, 98560, %s32_s22, [#allocation6], %s3912_s26, %s3912_s26, %s3913_s27  }
   0x7   :  { %s58_s29 = sshll.u32 %s3914_s28, 4  ;;  %s19_s7 = sshll.u32 %s4203_s0, 4  ;;  %s59_s29 = int_to_ptr.vmem [resolvable:$true] %s58_s29  ;;  %s20_s7 = int_to_ptr.hbm [resolvable:$true] %s19_s7 }
   0x8   :  { %61 = dma.hbm_to_vmem [thread:$0]  %s57_s25, 112, %s59_s29, [#allocation9]  }
   0x9   :  { %s42_s9 = sshll.u32 %s4205_s2, 4  ;;  %s3915_s10 = smov [#allocation2]   ;;  %s43_s9 = int_to_ptr.hbm [resolvable:$true] %s42_s9 }
   0xa   :  { %s21_s11 = sshll.u32 %s3915_s10, 4  ;;  %s3916_s3 = smov [#allocation7]   ;;  %s22_s11 = int_to_ptr.vmem [resolvable:$true] %s21_s11 }
   0xb   :  { %24 = dma.hbm_to_vmem [thread:$0]  %s20_s7, 896, %s22_s11, [#allocation3]  }
   0xc   :  { %s44_s12 = sshll.u32 %s3916_s3, 4  ;;  %s67_s15 = sshll.u32 %s4207_s4, 4  ;;  %s45_s12 = int_to_ptr.vmem [resolvable:$true] %s44_s12  ;;  %s68_s15 = int_to_ptr.hbm [resolvable:$true] %s67_s15 }
   0xd   :  { %50 = dma.hbm_to_vmem [thread:$0]  %s43_s9, 98560, %s45_s12, [#allocation6], %s3912_s26, %s3912_s26, %s3913_s27  }
   0xe   :  { %s3917_s0 = smov [#allocation10]  }
   0xf   :  { %s69_s16 = sshll.u32 %s3917_s0, 4  ;;  %s70_s16 = int_to_ptr.vmem [resolvable:$true] %s69_s16 }
  0x10   :  { %72 = dma.hbm_to_vmem [thread:$0]  %s68_s15, 112, %s70_s16, [#allocation9]  }
  0x11   :  { %3903 = dma.done.wait [#allocation3], 896  }
  0x12   :  { %3904 = vsyncadd [#allocation3], 4294966400 }
  0x13   :  { %3905 = dma.done.wait [#allocation6], 197120  }
  0x14   :  { %3906 = vsyncadd [#allocation6], 4294770176 }
  0x15   :  { %3907 = dma.done.wait [#allocation9], 224  }
  0x16   :  { %3908 = vsyncadd [#allocation9], 4294967072  ;;  %v205_v0 = vld [vmem:[#allocation5 + $0x348] sm:$0xff]  ;;  %v198_v4 = vld [vmem:[#allocation5 + $0x310] sm:$0xff]  ;;  %vm886_vm0 = vcmask 916480   ;;  %s3918_s2 = smov [#allocation11]  }
  0x17   :  { %v317_v1 = vld [vmem:[#allocation5 + $0x6c8] sm:$0xff]  ;;  %890 = vmatpush.msra.mxu0 %v205_v0  ;;  %v310_v5 = vld [vmem:[#allocation5 + $0x690] sm:$0xff]  ;;  %v191_v8 = vld [vmem:[#allocation5 + $0x2d8] sm:$0xff]  ;;  %s3672_s4 = sshll.u32 %s3918_s2, 4  ;;  %s3674_s19 = sshll.u32 %s4208_s5, 4  ;;  %s3673_s4 = int_to_ptr.vmem [resolvable:$true] %s3672_s4  ;;  %s3675_s19 = int_to_ptr.hbm [resolvable:$true] %s3674_s19 }
  0x18   :  { %v429_v2 = vld [vmem:[#allocation5 + $0xa48] sm:$0xff]  ;;  %910 = vmatpush.msra.mxu1 %v317_v1  ;;  %v422_v6 = vld [vmem:[#allocation5 + $0xa10] sm:$0xff]  ;;  %v303_v9 = vld [vmem:[#allocation5 + $0x658] sm:$0xff] }
  0x19   :  { %v541_v3 = vld [vmem:[#allocation5 + $0xdc8] sm:$0xff]  ;;  %930 = vmatpush.msra.mxu2 %v429_v2  ;;  %v534_v7 = vld [vmem:[#allocation5 + $0xd90] sm:$0xff]  ;;  %891 = vmatpush.msra.mxu0 %v198_v4  ;;  %v415_v10 = vld [vmem:[#allocation5 + $0x9d8] sm:$0xff] }
  0x1a   :  { %950 = vmatpush.msra.mxu3 %v541_v3  ;;  %911 = vmatpush.msra.mxu1 %v310_v5  ;;  %v527_v11 = vld [vmem:[#allocation5 + $0xd58] sm:$0xff]  ;;  %v184_v12 = vld [vmem:[#allocation5 + $0x2a0] sm:$0xff]  ;;  %v177_v16 = vld [vmem:[#allocation5 + $0x268] sm:$0xff] }
  0x1b   :  { %931 = vmatpush.msra.mxu2 %v422_v6  ;;  %v296_v13 = vld [vmem:[#allocation5 + $0x620] sm:$0xff]  ;;  %892 = vmatpush.msra.mxu0 %v191_v8  ;;  %v289_v17 = vld [vmem:[#allocation5 + $0x5e8] sm:$0xff]  ;;  %v170_v20 = vld [vmem:[#allocation5 + $0x230] sm:$0xff] }
  0x1c   :  { %951 = vmatpush.msra.mxu3 %v534_v7  ;;  %912 = vmatpush.msra.mxu1 %v303_v9  ;;  %v408_v14 = vld [vmem:[#allocation5 + $0x9a0] sm:$0xff]  ;;  %v401_v18 = vld [vmem:[#allocation5 + $0x968] sm:$0xff]  ;;  %v282_v21 = vld [vmem:[#allocation5 + $0x5b0] sm:$0xff] }
  0x1d   :  { %v520_v15 = vld [vmem:[#allocation5 + $0xd20] sm:$0xff]  ;;  %932 = vmatpush.msra.mxu2 %v415_v10  ;;  %893 = vmatpush.msra.mxu0 %v184_v12  ;;  %v513_v19 = vld [vmem:[#allocation5 + $0xce8] sm:$0xff]  ;;  %v394_v22 = vld [vmem:[#allocation5 + $0x930] sm:$0xff] }
  0x1e   :  { %952 = vmatpush.msra.mxu3 %v527_v11  ;;  %913 = vmatpush.msra.mxu1 %v296_v13  ;;  %v506_v23 = vld [vmem:[#allocation5 + $0xcb0] sm:$0xff]  ;;  %v163_v24 = vld [vmem:[#allocation5 + $0x1f8] sm:$0xff]  ;;  %v156_v28 = vld [vmem:[#allocation5 + $0x1c0] sm:$0xff] }
  0x1f   :  { %933 = vmatpush.msra.mxu2 %v408_v14  ;;  %894 = vmatpush.msra.mxu0 %v177_v16  ;;  %v275_v25 = vld [vmem:[#allocation5 + $0x578] sm:$0xff]  ;;  %v268_v29 = vld [vmem:[#allocation5 + $0x540] sm:$0xff]  ;;  %v149_v32 = vld [vmem:[#allocation5 + $0x188] sm:$0xff] }
  0x20   :  { %953 = vmatpush.msra.mxu3 %v520_v15  ;;  %914 = vmatpush.msra.mxu1 %v289_v17  ;;  %v387_v26 = vld [vmem:[#allocation5 + $0x8f8] sm:$0xff]  ;;  %v380_v30 = vld [vmem:[#allocation5 + $0x8c0] sm:$0xff]  ;;  %v261_v33 = vld [vmem:[#allocation5 + $0x508] sm:$0xff] }
  0x21   :  { %934 = vmatpush.msra.mxu2 %v401_v18  ;;  %895 = vmatpush.msra.mxu0 %v170_v20  ;;  %v499_v27 = vld [vmem:[#allocation5 + $0xc78] sm:$0xff]  ;;  %v492_v31 = vld [vmem:[#allocation5 + $0xc40] sm:$0xff]  ;;  %v373_v34 = vld [vmem:[#allocation5 + $0x888] sm:$0xff] }
  0x22   :  { %954 = vmatpush.msra.mxu3 %v513_v19  ;;  %915 = vmatpush.msra.mxu1 %v282_v21  ;;  %v485_v35 = vld [vmem:[#allocation5 + $0xc08] sm:$0xff]  ;;  %v142_v36 = vld [vmem:[#allocation5 + $0x150] sm:$0xff]  ;;  %v135_v40 = vld [vmem:[#allocation5 + $0x118] sm:$0xff] }
  0x23   :  { %935 = vmatpush.msra.mxu2 %v394_v22  ;;  %896 = vmatpush.msra.mxu0 %v163_v24  ;;  %v254_v37 = vld [vmem:[#allocation5 + $0x4d0] sm:$0xff]  ;;  %v247_v41 = vld [vmem:[#allocation5 + $0x498] sm:$0xff]  ;;  %v128_v44 = vld [vmem:[#allocation5 + $0xe0] sm:$0xff] }
  0x24   :  { %955 = vmatpush.msra.mxu3 %v506_v23  ;;  %916 = vmatpush.msra.mxu1 %v275_v25  ;;  %v366_v38 = vld [vmem:[#allocation5 + $0x850] sm:$0xff]  ;;  %v359_v42 = vld [vmem:[#allocation5 + $0x818] sm:$0xff]  ;;  %v240_v45 = vld [vmem:[#allocation5 + $0x460] sm:$0xff] }
  0x25   :  { %936 = vmatpush.msra.mxu2 %v387_v26  ;;  %897 = vmatpush.msra.mxu0 %v156_v28  ;;  %v478_v39 = vld [vmem:[#allocation5 + $0xbd0] sm:$0xff]  ;;  %v471_v43 = vld [vmem:[#allocation5 + $0xb98] sm:$0xff]  ;;  %v352_v46 = vld [vmem:[#allocation5 + $0x7e0] sm:$0xff] }
  0x26   :  { %956 = vmatpush.msra.mxu3 %v499_v27  ;;  %917 = vmatpush.msra.mxu1 %v268_v29  ;;  %v464_v47 = vld [vmem:[#allocation5 + $0xb60] sm:$0xff]  ;;  %v121_v48 = vld [vmem:[#allocation5 + $0xa8] sm:$0xff]  ;;  %v114_v52 = vld [vmem:[#allocation5 + $0x70] sm:$0xff] }
  0x27   :  { %937 = vmatpush.msra.mxu2 %v380_v30  ;;  %898 = vmatpush.msra.mxu0 %v149_v32  ;;  %v233_v49 = vld [vmem:[#allocation5 + $0x428] sm:$0xff]  ;;  %v226_v53 = vld [vmem:[#allocation5 + $0x3f0] sm:$0xff]  ;;  %v107_v56 = vld [vmem:[#allocation5 + $0x38] sm:$0xff] }
  0x28   :  { %957 = vmatpush.msra.mxu3 %v492_v31  ;;  %918 = vmatpush.msra.mxu1 %v261_v33  ;;  %v345_v50 = vld [vmem:[#allocation5 + $0x7a8] sm:$0xff]  ;;  %v338_v54 = vld [vmem:[#allocation5 + $0x770] sm:$0xff]  ;;  %v219_v57 = vld [vmem:[#allocation5 + $0x3b8] sm:$0xff] }
  0x29   :  { %938 = vmatpush.msra.mxu2 %v373_v34  ;;  %899 = vmatpush.msra.mxu0 %v142_v36  ;;  %v457_v51 = vld [vmem:[#allocation5 + $0xb28] sm:$0xff]  ;;  %v450_v55 = vld [vmem:[#allocation5 + $0xaf0] sm:$0xff]  ;;  %v331_v58 = vld [vmem:[#allocation5 + $0x738] sm:$0xff] }
  0x2a   :  { %958 = vmatpush.msra.mxu3 %v485_v35  ;;  %919 = vmatpush.msra.mxu1 %v254_v37  ;;  %v443_v59 = vld [vmem:[#allocation5 + $0xab8] sm:$0xff]  ;;  %v100_v60 = vld [vmem:[#allocation5] sm:$0xff]  ;;  %v653_v0 = vld [vmem:[#allocation5 + $0x1148] sm:$0xff] }
  0x2b   :  { %939 = vmatpush.msra.mxu2 %v366_v38  ;;  %900 = vmatpush.msra.mxu0 %v135_v40  ;;  %v212_v61 = vld [vmem:[#allocation5 + $0x380] sm:$0xff]  ;;  %v765_v1 = vld [vmem:[#allocation5 + $0x14c8] sm:$0xff]  ;;  %v863_v2 = vld [vmem:[#allocation5 + $0x17d8] sm:$0xff] }
  0x2c   :  { %959 = vmatpush.msra.mxu3 %v478_v39  ;;  %920 = vmatpush.msra.mxu1 %v247_v41  ;;  %v324_v62 = vld [vmem:[#allocation5 + $0x700] sm:$0xff]  ;;  %v206_v3 = vld [vmem:[#allocation5 + $0x350] sm:$0xff]  ;;  %v199_v7 = vld [vmem:[#allocation5 + $0x318] sm:$0xff] }
  0x2d   :  { %940 = vmatpush.msra.mxu2 %v359_v42  ;;  %901 = vmatpush.msra.mxu0 %v128_v44  ;;  %v436_v63 = vld [vmem:[#allocation5 + $0xa80] sm:$0xff]  ;;  %v646_v4 = vld [vmem:[#allocation5 + $0x1110] sm:$0xff]  ;;  %v639_v8 = vld [vmem:[#allocation5 + $0x10d8] sm:$0xff] }
  0x2e   :  { %960 = vmatpush.msra.mxu3 %v471_v43  ;;  %921 = vmatpush.msra.mxu1 %v240_v45  ;;  %v758_v5 = vld [vmem:[#allocation5 + $0x1490] sm:$0xff]  ;;  %v856_v6 = vld [vmem:[#allocation5 + $0x17a0] sm:$0xff]  ;;  %v751_v9 = vld [vmem:[#allocation5 + $0x1458] sm:$0xff] }
  0x2f   :  { %941 = vmatpush.msra.mxu2 %v352_v46  ;;  %902 = vmatpush.msra.mxu0 %v121_v48  ;;  %v849_v10 = vld [vmem:[#allocation5 + $0x1768] sm:$0xff]  ;;  %v192_v11 = vld [vmem:[#allocation5 + $0x2e0] sm:$0xff]  ;;  %v842_v14 = vld [vmem:[#allocation5 + $0x1730] sm:$0xff] }
  0x30   :  { %961 = vmatpush.msra.mxu3 %v464_v47  ;;  %922 = vmatpush.msra.mxu1 %v233_v49  ;;  %v632_v12 = vld [vmem:[#allocation5 + $0x10a0] sm:$0xff]  ;;  %v185_v15 = vld [vmem:[#allocation5 + $0x2a8] sm:$0xff]  ;;  %v835_v18 = vld [vmem:[#allocation5 + $0x16f8] sm:$0xff] }
  0x31   :  { %942 = vmatpush.msra.mxu2 %v345_v50  ;;  %903 = vmatpush.msra.mxu0 %v114_v52  ;;  %v744_v13 = vld [vmem:[#allocation5 + $0x1420] sm:$0xff]  ;;  %v625_v16 = vld [vmem:[#allocation5 + $0x1068] sm:$0xff]  ;;  %v178_v19 = vld [vmem:[#allocation5 + $0x270] sm:$0xff] }
  0x32   :  { %962 = vmatpush.msra.mxu3 %v457_v51  ;;  %923 = vmatpush.msra.mxu1 %v226_v53  ;;  %v737_v17 = vld [vmem:[#allocation5 + $0x13e8] sm:$0xff]  ;;  %v618_v20 = vld [vmem:[#allocation5 + $0x1030] sm:$0xff]  ;;  %v828_v22 = vld [vmem:[#allocation5 + $0x16c0] sm:$0xff] }
  0x33   :  { %943 = vmatpush.msra.mxu2 %v338_v54  ;;  %904 = vmatpush.msra.mxu0 %v107_v56  ;;  %v730_v21 = vld [vmem:[#allocation5 + $0x13b0] sm:$0xff]  ;;  %v171_v23 = vld [vmem:[#allocation5 + $0x238] sm:$0xff]  ;;  %v821_v26 = vld [vmem:[#allocation5 + $0x1688] sm:$0xff] }
  0x34   :  { %963 = vmatpush.msra.mxu3 %v450_v55  ;;  %924 = vmatpush.msra.mxu1 %v219_v57  ;;  %v611_v24 = vld [vmem:[#allocation5 + $0xff8] sm:$0xff]  ;;  %v164_v27 = vld [vmem:[#allocation5 + $0x200] sm:$0xff]  ;;  %v814_v30 = vld [vmem:[#allocation5 + $0x1650] sm:$0xff] }
  0x35   :  { %944 = vmatpush.msra.mxu2 %v331_v58  ;;  %905 = vmatpush.msra.mxu0 %v100_v60  ;;  %v723_v25 = vld [vmem:[#allocation5 + $0x1378] sm:$0xff]  ;;  %v604_v28 = vld [vmem:[#allocation5 + $0xfc0] sm:$0xff]  ;;  %v157_v31 = vld [vmem:[#allocation5 + $0x1c8] sm:$0xff] }
  0x36   :  { %964 = vmatpush.msra.mxu3 %v443_v59  ;;  %925 = vmatpush.msra.mxu1 %v212_v61  ;;  %v716_v29 = vld [vmem:[#allocation5 + $0x1340] sm:$0xff]  ;;  %v597_v32 = vld [vmem:[#allocation5 + $0xf88] sm:$0xff]  ;;  %v807_v34 = vld [vmem:[#allocation5 + $0x1618] sm:$0xff] }
  0x37   :  { %945 = vmatpush.msra.mxu2 %v324_v62  ;;  %970 = vmatpush.msrb.mxu0 %v653_v0  ;;  %v709_v33 = vld [vmem:[#allocation5 + $0x1308] sm:$0xff]  ;;  %v150_v35 = vld [vmem:[#allocation5 + $0x190] sm:$0xff]  ;;  %v800_v38 = vld [vmem:[#allocation5 + $0x15e0] sm:$0xff] }
  0x38   :  { %965 = vmatpush.msra.mxu3 %v436_v63  ;;  %990 = vmatpush.msrb.mxu1 %v765_v1  ;;  %v590_v36 = vld [vmem:[#allocation5 + $0xf50] sm:$0xff]  ;;  %v143_v39 = vld [vmem:[#allocation5 + $0x158] sm:$0xff]  ;;  %v793_v42 = vld [vmem:[#allocation5 + $0x15a8] sm:$0xff] }
  0x39   :  { %1012 = vmatpush.msrb.mxu2 %v863_v2  ;;  %971 = vmatpush.msrb.mxu0 %v646_v4  ;;  %v702_v37 = vld [vmem:[#allocation5 + $0x12d0] sm:$0xff]  ;;  %v583_v40 = vld [vmem:[#allocation5 + $0xf18] sm:$0xff]  ;;  %v136_v43 = vld [vmem:[#allocation5 + $0x120] sm:$0xff] }
  0x3a   :  { %1030 = vmatpush.msrb.mxu3 %v206_v3  ;;  %991 = vmatpush.msrb.mxu1 %v758_v5  ;;  %v695_v41 = vld [vmem:[#allocation5 + $0x1298] sm:$0xff]  ;;  %v576_v44 = vld [vmem:[#allocation5 + $0xee0] sm:$0xff]  ;;  %v786_v46 = vld [vmem:[#allocation5 + $0x1570] sm:$0xff] }
  0x3b   :  { %1013 = vmatpush.msrb.mxu2 %v856_v6  ;;  %972 = vmatpush.msrb.mxu0 %v639_v8  ;;  %v688_v45 = vld [vmem:[#allocation5 + $0x1260] sm:$0xff]  ;;  %v129_v47 = vld [vmem:[#allocation5 + $0xe8] sm:$0xff]  ;;  %v779_v50 = vld [vmem:[#allocation5 + $0x1538] sm:$0xff] }
  0x3c   :  { %1031 = vmatpush.msrb.mxu3 %v199_v7  ;;  %992 = vmatpush.msrb.mxu1 %v751_v9  ;;  %v569_v48 = vld [vmem:[#allocation5 + $0xea8] sm:$0xff]  ;;  %v122_v51 = vld [vmem:[#allocation5 + $0xb0] sm:$0xff]  ;;  %v772_v54 = vld [vmem:[#allocation5 + $0x1500] sm:$0xff] }
  0x3d   :  { %1014 = vmatpush.msrb.mxu2 %v849_v10  ;;  %973 = vmatpush.msrb.mxu0 %v632_v12  ;;  %v681_v49 = vld [vmem:[#allocation5 + $0x1228] sm:$0xff]  ;;  %v562_v52 = vld [vmem:[#allocation5 + $0xe70] sm:$0xff]  ;;  %v115_v55 = vld [vmem:[#allocation5 + $0x78] sm:$0xff] }
  0x3e   :  { %1032 = vmatpush.msrb.mxu3 %v192_v11  ;;  %993 = vmatpush.msrb.mxu1 %v744_v13  ;;  %v674_v53 = vld [vmem:[#allocation5 + $0x11f0] sm:$0xff]  ;;  %v3964_v56 = vld [vmem:[#allocation2 + $0x10] sm:$0xff]  ;;  %v108_v60 = vld [vmem:[#allocation5 + $0x40] sm:$0xff] }
  0x3f   :  { %1015 = vmatpush.msrb.mxu2 %v842_v14  ;;  %974 = vmatpush.msrb.mxu0 %v625_v16  ;;  %v555_v57 = vld [vmem:[#allocation5 + $0xe38] sm:$0xff]  ;;  %v318_v58 = vld [vmem:[#allocation5 + $0x6d0] sm:$0xff]  ;;  %v548_v61 = vld [vmem:[#allocation5 + $0xe00] sm:$0xff] }
  0x40   :  { %1033 = vmatpush.msrb.mxu3 %v185_v15  ;;  %994 = vmatpush.msrb.mxu1 %v737_v17  ;;  %v667_v59 = vld [vmem:[#allocation5 + $0x11b8] sm:$0xff]  ;;  %v660_v63 = vld [vmem:[#allocation5 + $0x1180] sm:$0xff]  ;;  %v101_v0 = vld [vmem:[#allocation5 + $0x8] sm:$0xff] }
  0x41   :  { %1016 = vmatpush.msrb.mxu2 %v835_v18  ;;  %975 = vmatpush.msrb.mxu0 %v618_v20  ;;  %v311_v62 = vld [vmem:[#allocation5 + $0x698] sm:$0xff]  ;;  %v3967_v1 = vld [vmem:[#allocation2] sm:$0xff]  ;;  %v3969_v2 = vld [vmem:[#allocation2 + $0x8] sm:$0xff] }
  0x42   :  { %1034 = vmatpush.msrb.mxu3 %v178_v19  ;;  %995 = vmatpush.msrb.mxu1 %v730_v21  ;;  %v3971_v3 = vld [vmem:[#allocation2 + $0x18] sm:$0xff]  ;;  %v430_v5 = vld [vmem:[#allocation5 + $0xa50] sm:$0xff]  ;;  %v297_v8 = vld [vmem:[#allocation5 + $0x628] sm:$0xff] }
  0x43   :  { %1017 = vmatpush.msrb.mxu2 %v828_v22  ;;  %976 = vmatpush.msrb.mxu0 %v611_v24  ;;  %v304_v4 = vld [vmem:[#allocation5 + $0x660] sm:$0xff]  ;;  %v542_v6 = vld [vmem:[#allocation5 + $0xdd0] sm:$0xff]  ;;  %v423_v9 = vld [vmem:[#allocation5 + $0xa18] sm:$0xff] }
  0x44   :  { %1035 = vmatpush.msrb.mxu3 %v171_v23  ;;  %996 = vmatpush.msrb.mxu1 %v723_v25  ;;  %v654_v7 = vld [vmem:[#allocation5 + $0x1150] sm:$0xff]  ;;  %v535_v10 = vld [vmem:[#allocation5 + $0xd98] sm:$0xff]  ;;  %v416_v13 = vld [vmem:[#allocation5 + $0x9e0] sm:$0xff] }
  0x45   :  { %1018 = vmatpush.msrb.mxu2 %v821_v26  ;;  %977 = vmatpush.msrb.mxu0 %v604_v28  ;;  %v647_v11 = vld [vmem:[#allocation5 + $0x1118] sm:$0xff]  ;;  %v290_v12 = vld [vmem:[#allocation5 + $0x5f0] sm:$0xff]  ;;  %v528_v14 = vld [vmem:[#allocation5 + $0xd60] sm:$0xff] }
  0x46   :  { %1036 = vmatpush.msrb.mxu3 %v164_v27  ;;  %997 = vmatpush.msrb.mxu1 %v716_v29  ;;  %v640_v15 = vld [vmem:[#allocation5 + $0x10e0] sm:$0xff]  ;;  %v3976_v16 = vld [vmem:[#allocation2 + $0x30] sm:$0xff]  ;;  %v409_v17 = vld [vmem:[#allocation5 + $0x9a8] sm:$0xff] }
  0x47   :  { %1019 = vmatpush.msrb.mxu2 %v814_v30  ;;  %978 = vmatpush.msrb.mxu0 %v597_v32  ;;  %v283_v18 = vld [vmem:[#allocation5 + $0x5b8] sm:$0xff]  ;;  %v521_v19 = vld [vmem:[#allocation5 + $0xd28] sm:$0xff]  ;;  %v276_v22 = vld [vmem:[#allocation5 + $0x580] sm:$0xff] }
  0x48   :  { %1037 = vmatpush.msrb.mxu3 %v157_v31  ;;  %998 = vmatpush.msrb.mxu1 %v709_v33  ;;  %v633_v20 = vld [vmem:[#allocation5 + $0x10a8] sm:$0xff]  ;;  %v402_v23 = vld [vmem:[#allocation5 + $0x970] sm:$0xff]  ;;  %v395_v28 = vld [vmem:[#allocation5 + $0x938] sm:$0xff] }
  0x49   :  { %1020 = vmatpush.msrb.mxu2 %v807_v34  ;;  %979 = vmatpush.msrb.mxu0 %v590_v36  ;;  %v3978_v21 = vld [vmem:[#allocation2 + $0x20] sm:$0xff]  ;;  %v514_v24 = vld [vmem:[#allocation5 + $0xcf0] sm:$0xff]  ;;  %v507_v29 = vld [vmem:[#allocation5 + $0xcb8] sm:$0xff] }
  0x4a   :  { %1038 = vmatpush.msrb.mxu3 %v150_v35  ;;  %999 = vmatpush.msrb.mxu1 %v702_v37  ;;  %v626_v25 = vld [vmem:[#allocation5 + $0x1070] sm:$0xff]  ;;  %v269_v27 = vld [vmem:[#allocation5 + $0x548] sm:$0xff]  ;;  %v619_v30 = vld [vmem:[#allocation5 + $0x1038] sm:$0xff] }
  0x4b   :  { %1021 = vmatpush.msrb.mxu2 %v800_v38  ;;  %980 = vmatpush.msrb.mxu0 %v583_v40  ;;  %v3983_v26 = vld [vmem:[#allocation2 + $0x28] sm:$0xff]  ;;  %v388_v32 = vld [vmem:[#allocation5 + $0x900] sm:$0xff]  ;;  %v255_v35 = vld [vmem:[#allocation5 + $0x4d8] sm:$0xff] }
  0x4c   :  { %1039 = vmatpush.msrb.mxu3 %v143_v39  ;;  %1000 = vmatpush.msrb.mxu1 %v695_v41  ;;  %v262_v31 = vld [vmem:[#allocation5 + $0x510] sm:$0xff]  ;;  %v500_v33 = vld [vmem:[#allocation5 + $0xc80] sm:$0xff]  ;;  %v381_v36 = vld [vmem:[#allocation5 + $0x8c8] sm:$0xff] }
  0x4d   :  { %1022 = vmatpush.msrb.mxu2 %v793_v42  ;;  %981 = vmatpush.msrb.mxu0 %v576_v44  ;;  %v612_v34 = vld [vmem:[#allocation5 + $0x1000] sm:$0xff]  ;;  %v493_v37 = vld [vmem:[#allocation5 + $0xc48] sm:$0xff]  ;;  %v374_v40 = vld [vmem:[#allocation5 + $0x890] sm:$0xff] }
  0x4e   :  { %1040 = vmatpush.msrb.mxu3 %v136_v43  ;;  %1001 = vmatpush.msrb.mxu1 %v688_v45  ;;  %v605_v38 = vld [vmem:[#allocation5 + $0xfc8] sm:$0xff]  ;;  %v248_v39 = vld [vmem:[#allocation5 + $0x4a0] sm:$0xff]  ;;  %v486_v41 = vld [vmem:[#allocation5 + $0xc10] sm:$0xff] }
  0x4f   :  { %1023 = vmatpush.msrb.mxu2 %v786_v46  ;;  %982 = vmatpush.msrb.mxu0 %v569_v48  ;;  %v598_v42 = vld [vmem:[#allocation5 + $0xf90] sm:$0xff]  ;;  %v241_v43 = vld [vmem:[#allocation5 + $0x468] sm:$0xff]  ;;  %v367_v44 = vld [vmem:[#allocation5 + $0x858] sm:$0xff] }
  0x50   :  { %1041 = vmatpush.msrb.mxu3 %v129_v47  ;;  %1002 = vmatpush.msrb.mxu1 %v681_v49  ;;  %v479_v45 = vld [vmem:[#allocation5 + $0xbd8] sm:$0xff]  ;;  %v234_v47 = vld [vmem:[#allocation5 + $0x430] sm:$0xff]  ;;  %v360_v48 = vld [vmem:[#allocation5 + $0x820] sm:$0xff] }
  0x51   :  { %1024 = vmatpush.msrb.mxu2 %v779_v50  ;;  %983 = vmatpush.msrb.mxu0 %v562_v52  ;;  %v591_v46 = vld [vmem:[#allocation5 + $0xf58] sm:$0xff]  ;;  %v472_v49 = vld [vmem:[#allocation5 + $0xba0] sm:$0xff]  ;;  %v353_v52 = vld [vmem:[#allocation5 + $0x7e8] sm:$0xff] }
  0x52   :  { %1042 = vmatpush.msrb.mxu3 %v122_v51  ;;  %1003 = vmatpush.msrb.mxu1 %v674_v53  ;;  %v584_v50 = vld [vmem:[#allocation5 + $0xf20] sm:$0xff]  ;;  %v227_v51 = vld [vmem:[#allocation5 + $0x3f8] sm:$0xff]  ;;  %v465_v53 = vld [vmem:[#allocation5 + $0xb68] sm:$0xff] }
  0x53   :  { %1025 = vmatpush.msrb.mxu2 %v772_v54  ;;  %984 = vmatpush.msrb.mxu0 %v555_v57  ;;  %v577_v54 = vld [vmem:[#allocation5 + $0xee8] sm:$0xff]  ;;  %v346_v57 = vld [vmem:[#allocation5 + $0x7b0] sm:$0xff] }
  0x54   :  { %1043 = vmatpush.msrb.mxu3 %v115_v55  ;;  %946 = vmatmul.f32.vlgmr.msra.gmra.mxu2 %v3964_v56  ;;  %v220_v55 = vld [vmem:[#allocation5 + $0x3c0] sm:$0xff] }
  0x55   :  { %1050 = vmatpush.msra.mxu2 %v318_v58  ;;  %1004 = vmatpush.msrb.mxu1 %v667_v59  ;;  %v458_v58 = vld [vmem:[#allocation5 + $0xb30] sm:$0xff] }
  0x56   :  { %1044 = vmatpush.msrb.mxu3 %v108_v60  ;;  %985 = vmatpush.msrb.mxu0 %v548_v61  ;;  %v570_v59 = vld [vmem:[#allocation5 + $0xeb0] sm:$0xff]  ;;  %v213_v60 = vld [vmem:[#allocation5 + $0x388] sm:$0xff]  ;;  %v339_v61 = vld [vmem:[#allocation5 + $0x778] sm:$0xff] }
  0x57   :  { %1051 = vmatpush.msra.mxu2 %v311_v62  ;;  %1005 = vmatpush.msrb.mxu1 %v660_v63  ;;  %v451_v62 = vld [vmem:[#allocation5 + $0xaf8] sm:$0xff] }
  0x58   :  { %1045 = vmatpush.msrb.mxu3 %v101_v0  ;;  %906 = vmatmul.f32.vlgmr.msra.gmra.mxu0 %v3967_v1  ;;  %v563_v63 = vld [vmem:[#allocation5 + $0xe78] sm:$0xff]  ;;  %v766_v0 = vld [vmem:[#allocation5 + $0x14d0] sm:$0xff] }
  0x59   :  { %926 = vmatmul.f32.vlgmr.msra.gmra.mxu1 %v3969_v2  ;;  %966 = vmatmul.f32.vlgmr.msra.gmra.mxu3 %v3971_v3 }
  0x5a   :  { %1052 = vmatpush.msra.mxu2 %v304_v4  ;;  %1070 = vmatpush.msra.mxu0 %v430_v5  ;;  %v332_v4 = vld [vmem:[#allocation5 + $0x740] sm:$0xff] }
  0x5b   :  { %1090 = vmatpush.msra.mxu1 %v542_v6  ;;  %1110 = vmatpush.msra.mxu3 %v654_v7  ;;  %v444_v5 = vld [vmem:[#allocation5 + $0xac0] sm:$0xff]  ;;  %v759_v7 = vld [vmem:[#allocation5 + $0x1498] sm:$0xff] }
  0x5c   :  { %1053 = vmatpush.msra.mxu2 %v297_v8  ;;  %1071 = vmatpush.msra.mxu0 %v423_v9  ;;  %v556_v6 = vld [vmem:[#allocation5 + $0xe40] sm:$0xff]  ;;  %v325_v8 = vld [vmem:[#allocation5 + $0x708] sm:$0xff] }
  0x5d   :  { %1091 = vmatpush.msra.mxu1 %v535_v10  ;;  %1111 = vmatpush.msra.mxu3 %v647_v11  ;;  %v437_v9 = vld [vmem:[#allocation5 + $0xa88] sm:$0xff]  ;;  %v752_v11 = vld [vmem:[#allocation5 + $0x1460] sm:$0xff] }
  0x5e   :  { %1054 = vmatpush.msra.mxu2 %v290_v12  ;;  %1072 = vmatpush.msra.mxu0 %v416_v13  ;;  %v549_v10 = vld [vmem:[#allocation5 + $0xe08] sm:$0xff]  ;;  %v864_v12 = vld [vmem:[#allocation5 + $0x17e0] sm:$0xff]  ;;  %v207_v13 = vld [vmem:[#allocation5 + $0x358] sm:$0xff] }
  0x5f   :  { %1092 = vmatpush.msra.mxu1 %v528_v14  ;;  %1112 = vmatpush.msra.mxu3 %v640_v15  ;;  %v319_v14 = vld [vmem:[#allocation5 + $0x6d8] sm:$0xff]  ;;  %v857_v15 = vld [vmem:[#allocation5 + $0x17a8] sm:$0xff] }
  0x60   :  { %3686 = vmatmul.msk.f32.vlgmr.msrb.gmra.mxu2 %vm886_vm0, %v3976_v16  ;;  %1073 = vmatpush.msra.mxu0 %v409_v17  ;;  %v745_v17 = vld [vmem:[#allocation5 + $0x1428] sm:$0xff] }
  0x61   :  { %1055 = vmatpush.msra.mxu2 %v283_v18  ;;  %1093 = vmatpush.msra.mxu1 %v521_v19  ;;  %v200_v18 = vld [vmem:[#allocation5 + $0x320] sm:$0xff] }
  0x62   :  { %1113 = vmatpush.msra.mxu3 %v633_v20  ;;  %986 = vmatmul.f32.vlgmr.msrb.gmra.mxu0 %v3978_v21  ;;  %v312_v19 = vld [vmem:[#allocation5 + $0x6a0] sm:$0xff]  ;;  %v850_v20 = vld [vmem:[#allocation5 + $0x1770] sm:$0xff] }
  0x63   :  { %1056 = vmatpush.msra.mxu2 %v276_v22  ;;  %1074 = vmatpush.msra.mxu0 %v402_v23  ;;  %v738_v22 = vld [vmem:[#allocation5 + $0x13f0] sm:$0xff]  ;;  %v193_v23 = vld [vmem:[#allocation5 + $0x2e8] sm:$0xff] }
  0x64   :  { %1094 = vmatpush.msra.mxu1 %v514_v24  ;;  %1114 = vmatpush.msra.mxu3 %v626_v25  ;;  %v305_v24 = vld [vmem:[#allocation5 + $0x668] sm:$0xff]  ;;  %v843_v25 = vld [vmem:[#allocation5 + $0x1738] sm:$0xff] }
  0x65   :  { %1006 = vmatmul.f32.vlgmr.msrb.gmra.mxu1 %v3983_v26  ;;  %1057 = vmatpush.msra.mxu2 %v269_v27  ;;  %v731_v27 = vld [vmem:[#allocation5 + $0x13b8] sm:$0xff] }
  0x66   :  { %1075 = vmatpush.msra.mxu0 %v395_v28  ;;  %1095 = vmatpush.msra.mxu1 %v507_v29  ;;  %v186_v28 = vld [vmem:[#allocation5 + $0x2b0] sm:$0xff] }
  0x67   :  { %1115 = vmatpush.msra.mxu3 %v619_v30  ;;  %1058 = vmatpush.msra.mxu2 %v262_v31  ;;  %v298_v29 = vld [vmem:[#allocation5 + $0x630] sm:$0xff]  ;;  %v836_v30 = vld [vmem:[#allocation5 + $0x1700] sm:$0xff] }
  0x68   :  { %1076 = vmatpush.msra.mxu0 %v388_v32  ;;  %1096 = vmatpush.msra.mxu1 %v500_v33  ;;  %v724_v31 = vld [vmem:[#allocation5 + $0x1380] sm:$0xff]  ;;  %v179_v32 = vld [vmem:[#allocation5 + $0x278] sm:$0xff] }
  0x69   :  { %1116 = vmatpush.msra.mxu3 %v612_v34  ;;  %1059 = vmatpush.msra.mxu2 %v255_v35  ;;  %v291_v33 = vld [vmem:[#allocation5 + $0x5f8] sm:$0xff]  ;;  %v717_v34 = vld [vmem:[#allocation5 + $0x1348] sm:$0xff] }
  0x6a   :  { %1077 = vmatpush.msra.mxu0 %v381_v36  ;;  %1097 = vmatpush.msra.mxu1 %v493_v37  ;;  %v829_v35 = vld [vmem:[#allocation5 + $0x16c8] sm:$0xff]  ;;  %v172_v36 = vld [vmem:[#allocation5 + $0x240] sm:$0xff] }
  0x6b   :  { %1117 = vmatpush.msra.mxu3 %v605_v38  ;;  %1060 = vmatpush.msra.mxu2 %v248_v39  ;;  %v284_v37 = vld [vmem:[#allocation5 + $0x5c0] sm:$0xff]  ;;  %v710_v38 = vld [vmem:[#allocation5 + $0x1310] sm:$0xff] }
  0x6c   :  { %1078 = vmatpush.msra.mxu0 %v374_v40  ;;  %1098 = vmatpush.msra.mxu1 %v486_v41  ;;  %v822_v39 = vld [vmem:[#allocation5 + $0x1690] sm:$0xff]  ;;  %v165_v40 = vld [vmem:[#allocation5 + $0x208] sm:$0xff] }
  0x6d   :  { %1118 = vmatpush.msra.mxu3 %v598_v42  ;;  %1061 = vmatpush.msra.mxu2 %v241_v43  ;;  %v277_v41 = vld [vmem:[#allocation5 + $0x588] sm:$0xff]  ;;  %v703_v42 = vld [vmem:[#allocation5 + $0x12d8] sm:$0xff] }
  0x6e   :  { %1079 = vmatpush.msra.mxu0 %v367_v44  ;;  %1099 = vmatpush.msra.mxu1 %v479_v45  ;;  %v815_v43 = vld [vmem:[#allocation5 + $0x1658] sm:$0xff]  ;;  %v158_v44 = vld [vmem:[#allocation5 + $0x1d0] sm:$0xff] }
  0x6f   :  { %1119 = vmatpush.msra.mxu3 %v591_v46  ;;  %1062 = vmatpush.msra.mxu2 %v234_v47  ;;  %v270_v45 = vld [vmem:[#allocation5 + $0x550] sm:$0xff]  ;;  %v696_v46 = vld [vmem:[#allocation5 + $0x12a0] sm:$0xff] }
  0x70   :  { %1080 = vmatpush.msra.mxu0 %v360_v48  ;;  %1100 = vmatpush.msra.mxu1 %v472_v49  ;;  %v808_v47 = vld [vmem:[#allocation5 + $0x1620] sm:$0xff]  ;;  %v151_v48 = vld [vmem:[#allocation5 + $0x198] sm:$0xff] }
  0x71   :  { %1120 = vmatpush.msra.mxu3 %v584_v50  ;;  %1063 = vmatpush.msra.mxu2 %v227_v51  ;;  %v263_v49 = vld [vmem:[#allocation5 + $0x518] sm:$0xff]  ;;  %v689_v50 = vld [vmem:[#allocation5 + $0x1268] sm:$0xff] }
  0x72   :  { %1081 = vmatpush.msra.mxu0 %v353_v52  ;;  %1101 = vmatpush.msra.mxu1 %v465_v53  ;;  %v801_v51 = vld [vmem:[#allocation5 + $0x15e8] sm:$0xff]  ;;  %v144_v52 = vld [vmem:[#allocation5 + $0x160] sm:$0xff] }
  0x73   :  { %1121 = vmatpush.msra.mxu3 %v577_v54  ;;  %1064 = vmatpush.msra.mxu2 %v220_v55  ;;  %v256_v53 = vld [vmem:[#allocation5 + $0x4e0] sm:$0xff]  ;;  %v682_v54 = vld [vmem:[#allocation5 + $0x1230] sm:$0xff] }
  0x74   :  { %1082 = vmatpush.msra.mxu0 %v346_v57  ;;  %1102 = vmatpush.msra.mxu1 %v458_v58  ;;  %v794_v55 = vld [vmem:[#allocation5 + $0x15b0] sm:$0xff]  ;;  %v137_v57 = vld [vmem:[#allocation5 + $0x128] sm:$0xff] }
  0x75   :  { %1122 = vmatpush.msra.mxu3 %v570_v59  ;;  %1065 = vmatpush.msra.mxu2 %v213_v60  ;;  %v249_v58 = vld [vmem:[#allocation5 + $0x4a8] sm:$0xff]  ;;  %v675_v59 = vld [vmem:[#allocation5 + $0x11f8] sm:$0xff] }
  0x76   :  { %1083 = vmatpush.msra.mxu0 %v339_v61  ;;  %1103 = vmatpush.msra.mxu1 %v451_v62  ;;  %v787_v60 = vld [vmem:[#allocation5 + $0x1578] sm:$0xff]  ;;  %v130_v61 = vld [vmem:[#allocation5 + $0xf0] sm:$0xff] }
  0x77   :  { %1123 = vmatpush.msra.mxu3 %v563_v63  ;;  %1130 = vmatpush.msrb.mxu2 %v766_v0  ;;  %v242_v62 = vld [vmem:[#allocation5 + $0x470] sm:$0xff]  ;;  %v668_v63 = vld [vmem:[#allocation5 + $0x11c0] sm:$0xff] }
  0x78   :  { %1084 = vmatpush.msra.mxu0 %v332_v4  ;;  %1104 = vmatpush.msra.mxu1 %v444_v5  ;;  %v780_v0 = vld [vmem:[#allocation5 + $0x1540] sm:$0xff]  ;;  %v123_v4 = vld [vmem:[#allocation5 + $0xb8] sm:$0xff] }
  0x79   :  { %1124 = vmatpush.msra.mxu3 %v556_v6  ;;  %1131 = vmatpush.msrb.mxu2 %v759_v7  ;;  %v235_v5 = vld [vmem:[#allocation5 + $0x438] sm:$0xff]  ;;  %v661_v6 = vld [vmem:[#allocation5 + $0x1188] sm:$0xff] }
  0x7a   :  { %1085 = vmatpush.msra.mxu0 %v325_v8  ;;  %1105 = vmatpush.msra.mxu1 %v437_v9  ;;  %v773_v7 = vld [vmem:[#allocation5 + $0x1508] sm:$0xff]  ;;  %v116_v8 = vld [vmem:[#allocation5 + $0x80] sm:$0xff] }
  0x7b   :  { %1125 = vmatpush.msra.mxu3 %v549_v10  ;;  %1132 = vmatpush.msrb.mxu2 %v752_v11  ;;  %v228_v9 = vld [vmem:[#allocation5 + $0x400] sm:$0xff]  ;;  %v431_v10 = vld [vmem:[#allocation5 + $0xa58] sm:$0xff] }
  0x7c   :  { %1046 = vmatmul.f32.vlgmr.msrb.gmra.mxu3 %v3967_v1  ;;  %1152 = vmatpush.msrb.mxu0 %v864_v12  ;;  %v543_v11 = vld [vmem:[#allocation5 + $0xdd8] sm:$0xff]  ;;  %v109_v12 = vld [vmem:[#allocation5 + $0x48] sm:$0xff] }
  0x7d   :  { %1170 = vmatpush.msrb.mxu1 %v207_v13  ;;  %1190 = vmatpush.msrb.mxu3 %v319_v14  ;;  %v221_v13 = vld [vmem:[#allocation5 + $0x3c8] sm:$0xff]  ;;  %v424_v14 = vld [vmem:[#allocation5 + $0xa20] sm:$0xff] }
  0x7e   :  { %1066 = vmatmul.f32.vlgmr.msra.gmra.mxu2 %v3969_v2  ;;  %1153 = vmatpush.msrb.mxu0 %v857_v15  ;;  %v536_v15 = vld [vmem:[#allocation5 + $0xda0] sm:$0xff] }
  0x7f   :  { %1133 = vmatpush.msrb.mxu2 %v745_v17  ;;  %1171 = vmatpush.msrb.mxu1 %v200_v18  ;;  %v102_v17 = vld [vmem:[#allocation5 + $0x10] sm:$0xff] }
  0x80   :  { %1191 = vmatpush.msrb.mxu3 %v312_v19  ;;  %1154 = vmatpush.msrb.mxu0 %v850_v20  ;;  %v214_v18 = vld [vmem:[#allocation5 + $0x390] sm:$0xff]  ;;  %v417_v19 = vld [vmem:[#allocation5 + $0x9e8] sm:$0xff] }
  0x81   :  { %1134 = vmatpush.msrb.mxu2 %v738_v22  ;;  %1172 = vmatpush.msrb.mxu1 %v193_v23  ;;  %v529_v20 = vld [vmem:[#allocation5 + $0xd68] sm:$0xff]  ;;  %v655_v22 = vld [vmem:[#allocation5 + $0x1158] sm:$0xff] }
  0x82   :  { %1192 = vmatpush.msrb.mxu3 %v305_v24  ;;  %1155 = vmatpush.msrb.mxu0 %v843_v25  ;;  %v767_v23 = vld [vmem:[#allocation5 + $0x14d8] sm:$0xff]  ;;  %v410_v24 = vld [vmem:[#allocation5 + $0x9b0] sm:$0xff] }
  0x83   :  { %1135 = vmatpush.msrb.mxu2 %v731_v27  ;;  %1173 = vmatpush.msrb.mxu1 %v186_v28  ;;  %v522_v25 = vld [vmem:[#allocation5 + $0xd30] sm:$0xff]  ;;  %v648_v27 = vld [vmem:[#allocation5 + $0x1120] sm:$0xff] }
  0x84   :  { %1193 = vmatpush.msrb.mxu3 %v298_v29  ;;  %1156 = vmatpush.msrb.mxu0 %v836_v30  ;;  %v760_v28 = vld [vmem:[#allocation5 + $0x14a0] sm:$0xff]  ;;  %v403_v29 = vld [vmem:[#allocation5 + $0x978] sm:$0xff] }
  0x85   :  { %1126 = vmatmul.f32.vlgmr.msra.gmra.mxu3 %v3978_v21  ;;  %1136 = vmatpush.msrb.mxu2 %v724_v31  ;;  %v515_v30 = vld [vmem:[#allocation5 + $0xcf8] sm:$0xff]  ;;  %v641_v31 = vld [vmem:[#allocation5 + $0x10e8] sm:$0xff] }
  0x86   :  { %1174 = vmatpush.msrb.mxu1 %v179_v32  ;;  %1194 = vmatpush.msrb.mxu3 %v291_v33  ;;  %v753_v32 = vld [vmem:[#allocation5 + $0x1468] sm:$0xff]  ;;  %v396_v33 = vld [vmem:[#allocation5 + $0x940] sm:$0xff] }
  0x87   :  { %1086 = vmatmul.f32.vlgmr.msra.gmra.mxu0 %v3964_v56  ;;  %1137 = vmatpush.msrb.mxu2 %v717_v34  ;;  %v508_v34 = vld [vmem:[#allocation5 + $0xcc0] sm:$0xff] }
  0x88   :  { %1157 = vmatpush.msrb.mxu0 %v829_v35  ;;  %1175 = vmatpush.msrb.mxu1 %v172_v36  ;;  %v634_v35 = vld [vmem:[#allocation5 + $0x10b0] sm:$0xff] }
  0x89   :  { %1195 = vmatpush.msrb.mxu3 %v284_v37  ;;  %1106 = vmatmul.f32.vlgmr.msra.gmra.mxu1 %v3971_v3  ;;  %v746_v36 = vld [vmem:[#allocation5 + $0x1430] sm:$0xff]  ;;  %v389_v37 = vld [vmem:[#allocation5 + $0x908] sm:$0xff] }
  0x8a   :  { %1138 = vmatpush.msrb.mxu2 %v710_v38  ;;  %1158 = vmatpush.msrb.mxu0 %v822_v39  ;;  %v501_v38 = vld [vmem:[#allocation5 + $0xc88] sm:$0xff]  ;;  %v627_v39 = vld [vmem:[#allocation5 + $0x1078] sm:$0xff] }
  0x8b   :  { %1176 = vmatpush.msrb.mxu1 %v165_v40  ;;  %1196 = vmatpush.msrb.mxu3 %v277_v41  ;;  %v739_v40 = vld [vmem:[#allocation5 + $0x13f8] sm:$0xff]  ;;  %v382_v41 = vld [vmem:[#allocation5 + $0x8d0] sm:$0xff] }
  0x8c   :  { %1139 = vmatpush.msrb.mxu2 %v703_v42  ;;  %1159 = vmatpush.msrb.mxu0 %v815_v43  ;;  %v494_v42 = vld [vmem:[#allocation5 + $0xc50] sm:$0xff]  ;;  %v620_v43 = vld [vmem:[#allocation5 + $0x1040] sm:$0xff] }
  0x8d   :  { %1177 = vmatpush.msrb.mxu1 %v158_v44  ;;  %1197 = vmatpush.msrb.mxu3 %v270_v45  ;;  %v732_v44 = vld [vmem:[#allocation5 + $0x13c0] sm:$0xff]  ;;  %v375_v45 = vld [vmem:[#allocation5 + $0x898] sm:$0xff] }
  0x8e   :  { %1140 = vmatpush.msrb.mxu2 %v696_v46  ;;  %1160 = vmatpush.msrb.mxu0 %v808_v47  ;;  %v487_v46 = vld [vmem:[#allocation5 + $0xc18] sm:$0xff]  ;;  %v613_v47 = vld [vmem:[#allocation5 + $0x1008] sm:$0xff] }
  0x8f   :  { %1178 = vmatpush.msrb.mxu1 %v151_v48  ;;  %1198 = vmatpush.msrb.mxu3 %v263_v49  ;;  %v725_v48 = vld [vmem:[#allocation5 + $0x1388] sm:$0xff]  ;;  %v368_v49 = vld [vmem:[#allocation5 + $0x860] sm:$0xff] }
  0x90   :  { %1141 = vmatpush.msrb.mxu2 %v689_v50  ;;  %1161 = vmatpush.msrb.mxu0 %v801_v51  ;;  %v480_v50 = vld [vmem:[#allocation5 + $0xbe0] sm:$0xff]  ;;  %v606_v51 = vld [vmem:[#allocation5 + $0xfd0] sm:$0xff] }
  0x91   :  { %1179 = vmatpush.msrb.mxu1 %v144_v52  ;;  %1199 = vmatpush.msrb.mxu3 %v256_v53  ;;  %v718_v52 = vld [vmem:[#allocation5 + $0x1350] sm:$0xff]  ;;  %v361_v53 = vld [vmem:[#allocation5 + $0x828] sm:$0xff] }
  0x92   :  { %1142 = vmatpush.msrb.mxu2 %v682_v54  ;;  %1162 = vmatpush.msrb.mxu0 %v794_v55  ;;  %v473_v54 = vld [vmem:[#allocation5 + $0xba8] sm:$0xff]  ;;  %v599_v55 = vld [vmem:[#allocation5 + $0xf98] sm:$0xff] }
  0x93   :  { %1180 = vmatpush.msrb.mxu1 %v137_v57  ;;  %1200 = vmatpush.msrb.mxu3 %v249_v58  ;;  %v711_v57 = vld [vmem:[#allocation5 + $0x1318] sm:$0xff]  ;;  %v354_v58 = vld [vmem:[#allocation5 + $0x7f0] sm:$0xff] }
  0x94   :  { %1143 = vmatpush.msrb.mxu2 %v675_v59  ;;  %1163 = vmatpush.msrb.mxu0 %v787_v60  ;;  %v466_v59 = vld [vmem:[#allocation5 + $0xb70] sm:$0xff]  ;;  %v592_v60 = vld [vmem:[#allocation5 + $0xf60] sm:$0xff] }
  0x95   :  { %1181 = vmatpush.msrb.mxu1 %v130_v61  ;;  %1201 = vmatpush.msrb.mxu3 %v242_v62  ;;  %v704_v61 = vld [vmem:[#allocation5 + $0x12e0] sm:$0xff]  ;;  %v347_v62 = vld [vmem:[#allocation5 + $0x7b8] sm:$0xff] }
  0x96   :  { %1144 = vmatpush.msrb.mxu2 %v668_v63  ;;  %1164 = vmatpush.msrb.mxu0 %v780_v0  ;;  %v459_v63 = vld [vmem:[#allocation5 + $0xb38] sm:$0xff]  ;;  %v585_v0 = vld [vmem:[#allocation5 + $0xf28] sm:$0xff] }
  0x97   :  { %1182 = vmatpush.msrb.mxu1 %v123_v4  ;;  %1202 = vmatpush.msrb.mxu3 %v235_v5  ;;  %v697_v4 = vld [vmem:[#allocation5 + $0x12a8] sm:$0xff]  ;;  %v340_v5 = vld [vmem:[#allocation5 + $0x780] sm:$0xff] }
  0x98   :  { %1145 = vmatpush.msrb.mxu2 %v661_v6  ;;  %1165 = vmatpush.msrb.mxu0 %v773_v7  ;;  %v452_v6 = vld [vmem:[#allocation5 + $0xb00] sm:$0xff]  ;;  %v578_v7 = vld [vmem:[#allocation5 + $0xef0] sm:$0xff] }
  0x99   :  { %1183 = vmatpush.msrb.mxu1 %v116_v8  ;;  %1203 = vmatpush.msrb.mxu3 %v228_v9  ;;  %v690_v8 = vld [vmem:[#allocation5 + $0x1270] sm:$0xff]  ;;  %v333_v9 = vld [vmem:[#allocation5 + $0x748] sm:$0xff] }
  0x9a   :  { %1146 = vmatmul.f32.vlgmr.msrb.gmra.mxu2 %v3983_v26  ;;  %1210 = vmatpush.msra.mxu0 %v431_v10  ;;  %v445_v10 = vld [vmem:[#allocation5 + $0xac8] sm:$0xff] }
  0x9b   :  { %1230 = vmatpush.msra.mxu2 %v543_v11  ;;  %1184 = vmatpush.msrb.mxu1 %v109_v12  ;;  %v571_v11 = vld [vmem:[#allocation5 + $0xeb8] sm:$0xff] }
  0x9c   :  { %1204 = vmatpush.msrb.mxu3 %v221_v13  ;;  %1211 = vmatpush.msra.mxu0 %v424_v14  ;;  %v683_v12 = vld [vmem:[#allocation5 + $0x1238] sm:$0xff]  ;;  %v326_v13 = vld [vmem:[#allocation5 + $0x710] sm:$0xff] }
  0x9d   :  { %1231 = vmatpush.msra.mxu2 %v536_v15  ;;  %1185 = vmatpush.msrb.mxu1 %v102_v17  ;;  %v438_v14 = vld [vmem:[#allocation5 + $0xa90] sm:$0xff]  ;;  %v564_v15 = vld [vmem:[#allocation5 + $0xe80] sm:$0xff] }
  0x9e   :  { %1205 = vmatpush.msrb.mxu3 %v214_v18  ;;  %1212 = vmatpush.msra.mxu0 %v417_v19  ;;  %v676_v17 = vld [vmem:[#allocation5 + $0x1200] sm:$0xff]  ;;  %v865_v18 = vld [vmem:[#allocation5 + $0x17e8] sm:$0xff] }
  0x9f   :  { %1232 = vmatpush.msra.mxu2 %v529_v20  ;;  %1250 = vmatpush.msra.mxu1 %v655_v22  ;;  %v208_v19 = vld [vmem:[#allocation5 + $0x360] sm:$0xff]  ;;  %v557_v20 = vld [vmem:[#allocation5 + $0xe48] sm:$0xff] }
  0xa0   :  { %1270 = vmatpush.msra.mxu3 %v767_v23  ;;  %1213 = vmatpush.msra.mxu0 %v410_v24  ;;  %v669_v22 = vld [vmem:[#allocation5 + $0x11c8] sm:$0xff]  ;;  %v858_v23 = vld [vmem:[#allocation5 + $0x17b0] sm:$0xff] }
  0xa1   :  { %1233 = vmatpush.msra.mxu2 %v522_v25  ;;  %1251 = vmatpush.msra.mxu1 %v648_v27  ;;  %v201_v24 = vld [vmem:[#allocation5 + $0x328] sm:$0xff]  ;;  %v550_v25 = vld [vmem:[#allocation5 + $0xe10] sm:$0xff] }
  0xa2   :  { %1271 = vmatpush.msra.mxu3 %v760_v28  ;;  %3687 = vmatmul.msk.f32.vlgmr.msrb.gmra.mxu0 %vm886_vm0, %v3976_v16  ;;  %v662_v27 = vld [vmem:[#allocation5 + $0x1190] sm:$0xff]  ;;  %v851_v28 = vld [vmem:[#allocation5 + $0x1778] sm:$0xff] }
  0xa3   :  { %1214 = vmatpush.msra.mxu0 %v403_v29  ;;  %1234 = vmatpush.msra.mxu2 %v515_v30  ;;  %v194_v29 = vld [vmem:[#allocation5 + $0x2f0] sm:$0xff]  ;;  %v320_v30 = vld [vmem:[#allocation5 + $0x6e0] sm:$0xff] }
  0xa4   :  { %1252 = vmatpush.msra.mxu1 %v641_v31  ;;  %1272 = vmatpush.msra.mxu3 %v753_v32  ;;  %v432_v31 = vld [vmem:[#allocation5 + $0xa60] sm:$0xff] }
  0xa5   :  { %1215 = vmatpush.msra.mxu0 %v396_v33  ;;  %1235 = vmatpush.msra.mxu2 %v508_v34  ;;  %v844_v32 = vld [vmem:[#allocation5 + $0x1740] sm:$0xff]  ;;  %v187_v33 = vld [vmem:[#allocation5 + $0x2b8] sm:$0xff]  ;;  %v313_v34 = vld [vmem:[#allocation5 + $0x6a8] sm:$0xff] }
  0xa6   :  { %1253 = vmatpush.msra.mxu1 %v634_v35  ;;  %1273 = vmatpush.msra.mxu3 %v746_v36  ;;  %v425_v35 = vld [vmem:[#allocation5 + $0xa28] sm:$0xff] }
  0xa7   :  { %1216 = vmatpush.msra.mxu0 %v389_v37  ;;  %1236 = vmatpush.msra.mxu2 %v501_v38  ;;  %v837_v36 = vld [vmem:[#allocation5 + $0x1708] sm:$0xff]  ;;  %v180_v37 = vld [vmem:[#allocation5 + $0x280] sm:$0xff]  ;;  %v306_v38 = vld [vmem:[#allocation5 + $0x670] sm:$0xff] }
  0xa8   :  { %1254 = vmatpush.msra.mxu1 %v627_v39  ;;  %1274 = vmatpush.msra.mxu3 %v739_v40  ;;  %v418_v39 = vld [vmem:[#allocation5 + $0x9f0] sm:$0xff] }
  0xa9   :  { %1217 = vmatpush.msra.mxu0 %v382_v41  ;;  %1237 = vmatpush.msra.mxu2 %v494_v42  ;;  %v830_v40 = vld [vmem:[#allocation5 + $0x16d0] sm:$0xff]  ;;  %v411_v41 = vld [vmem:[#allocation5 + $0x9b8] sm:$0xff] }
  0xaa   :  { %1255 = vmatpush.msra.mxu1 %v620_v43  ;;  %1275 = vmatpush.msra.mxu3 %v732_v44  ;;  %v823_v42 = vld [vmem:[#allocation5 + $0x1698] sm:$0xff]  ;;  %v166_v43 = vld [vmem:[#allocation5 + $0x210] sm:$0xff]  ;;  %v292_v44 = vld [vmem:[#allocation5 + $0x600] sm:$0xff] }
  0xab   :  { %1218 = vmatpush.msra.mxu0 %v375_v45  ;;  %1238 = vmatpush.msra.mxu2 %v487_v46  ;;  %v404_v45 = vld [vmem:[#allocation5 + $0x980] sm:$0xff] }
  0xac   :  { %1256 = vmatpush.msra.mxu1 %v613_v47  ;;  %1276 = vmatpush.msra.mxu3 %v725_v48  ;;  %v816_v46 = vld [vmem:[#allocation5 + $0x1660] sm:$0xff]  ;;  %v285_v47 = vld [vmem:[#allocation5 + $0x5c8] sm:$0xff] }
  0xad   :  { %1219 = vmatpush.msra.mxu0 %v368_v49  ;;  %1239 = vmatpush.msra.mxu2 %v480_v50  ;;  %v397_v48 = vld [vmem:[#allocation5 + $0x948] sm:$0xff]  ;;  %v152_v50 = vld [vmem:[#allocation5 + $0x1a0] sm:$0xff] }
  0xae   :  { %1257 = vmatpush.msra.mxu1 %v606_v51  ;;  %1277 = vmatpush.msra.mxu3 %v718_v52  ;;  %v809_v49 = vld [vmem:[#allocation5 + $0x1628] sm:$0xff]  ;;  %v278_v51 = vld [vmem:[#allocation5 + $0x590] sm:$0xff] }
  0xaf   :  { %1220 = vmatpush.msra.mxu0 %v361_v53  ;;  %1240 = vmatpush.msra.mxu2 %v473_v54  ;;  %v390_v52 = vld [vmem:[#allocation5 + $0x910] sm:$0xff]  ;;  %v145_v53 = vld [vmem:[#allocation5 + $0x168] sm:$0xff]  ;;  %v383_v54 = vld [vmem:[#allocation5 + $0x8d8] sm:$0xff] }
  0xb0   :  { %1258 = vmatpush.msra.mxu1 %v599_v55  ;;  %1278 = vmatpush.msra.mxu3 %v711_v57  ;;  %v795_v55 = vld [vmem:[#allocation5 + $0x15b8] sm:$0xff]  ;;  %v138_v57 = vld [vmem:[#allocation5 + $0x130] sm:$0xff] }
  0xb1   :  { %1221 = vmatpush.msra.mxu0 %v354_v58  ;;  %1241 = vmatpush.msra.mxu2 %v466_v59  ;;  %v264_v58 = vld [vmem:[#allocation5 + $0x520] sm:$0xff] }
  0xb2   :  { %1259 = vmatpush.msra.mxu1 %v592_v60  ;;  %1279 = vmatpush.msra.mxu3 %v704_v61  ;;  %v376_v59 = vld [vmem:[#allocation5 + $0x8a0] sm:$0xff]  ;;  %v131_v61 = vld [vmem:[#allocation5 + $0xf8] sm:$0xff] }
  0xb3   :  { %1222 = vmatpush.msra.mxu0 %v347_v62  ;;  %1242 = vmatpush.msra.mxu2 %v459_v63  ;;  %v788_v60 = vld [vmem:[#allocation5 + $0x1580] sm:$0xff]  ;;  %v369_v62 = vld [vmem:[#allocation5 + $0x868] sm:$0xff] }
  0xb4   :  { %1260 = vmatpush.msra.mxu1 %v585_v0  ;;  %1280 = vmatpush.msra.mxu3 %v697_v4  ;;  %v781_v63 = vld [vmem:[#allocation5 + $0x1548] sm:$0xff]  ;;  %v124_v0 = vld [vmem:[#allocation5 + $0xc0] sm:$0xff]  ;;  %v250_v4 = vld [vmem:[#allocation5 + $0x4b0] sm:$0xff] }
  0xb5   :  { %1223 = vmatpush.msra.mxu0 %v340_v5  ;;  %1243 = vmatpush.msra.mxu2 %v452_v6  ;;  %v362_v5 = vld [vmem:[#allocation5 + $0x830] sm:$0xff] }
  0xb6   :  { %1261 = vmatpush.msra.mxu1 %v578_v7  ;;  %1281 = vmatpush.msra.mxu3 %v690_v8  ;;  %v774_v6 = vld [vmem:[#allocation5 + $0x1510] sm:$0xff]  ;;  %v117_v7 = vld [vmem:[#allocation5 + $0x88] sm:$0xff]  ;;  %v243_v8 = vld [vmem:[#allocation5 + $0x478] sm:$0xff] }
  0xb7   :  { %1224 = vmatpush.msra.mxu0 %v333_v9  ;;  %1244 = vmatpush.msra.mxu2 %v445_v10  ;;  %v355_v9 = vld [vmem:[#allocation5 + $0x7f8] sm:$0xff]  ;;  %v110_v10 = vld [vmem:[#allocation5 + $0x50] sm:$0xff] }
  0xb8   :  { %1262 = vmatpush.msra.mxu1 %v571_v11  ;;  %1282 = vmatpush.msra.mxu3 %v683_v12  ;;  %v544_v11 = vld [vmem:[#allocation5 + $0xde0] sm:$0xff] }
  0xb9   :  { %1225 = vmatpush.msra.mxu0 %v326_v13  ;;  %1245 = vmatpush.msra.mxu2 %v438_v14  ;;  %v236_v12 = vld [vmem:[#allocation5 + $0x440] sm:$0xff]  ;;  %v103_v14 = vld [vmem:[#allocation5 + $0x18] sm:$0xff] }
  0xba   :  { %1263 = vmatpush.msra.mxu1 %v564_v15  ;;  %1283 = vmatpush.msra.mxu3 %v676_v17  ;;  %v348_v13 = vld [vmem:[#allocation5 + $0x7c0] sm:$0xff]  ;;  %v537_v15 = vld [vmem:[#allocation5 + $0xda8] sm:$0xff] }
  0xbb   :  { %1292 = vmatpush.msrb.mxu0 %v865_v18  ;;  %1310 = vmatpush.msrb.mxu2 %v208_v19  ;;  %v229_v17 = vld [vmem:[#allocation5 + $0x408] sm:$0xff]  ;;  %v656_v19 = vld [vmem:[#allocation5 + $0x1160] sm:$0xff] }
  0xbc   :  { %1264 = vmatpush.msra.mxu1 %v557_v20  ;;  %1284 = vmatpush.msra.mxu3 %v669_v22  ;;  %v341_v18 = vld [vmem:[#allocation5 + $0x788] sm:$0xff]  ;;  %v530_v20 = vld [vmem:[#allocation5 + $0xd70] sm:$0xff] }
  0xbd   :  { %1293 = vmatpush.msrb.mxu0 %v858_v23  ;;  %1311 = vmatpush.msrb.mxu2 %v201_v24  ;;  %v222_v22 = vld [vmem:[#allocation5 + $0x3d0] sm:$0xff]  ;;  %v649_v24 = vld [vmem:[#allocation5 + $0x1128] sm:$0xff] }
  0xbe   :  { %1265 = vmatpush.msra.mxu1 %v550_v25  ;;  %1285 = vmatpush.msra.mxu3 %v662_v27  ;;  %v334_v23 = vld [vmem:[#allocation5 + $0x750] sm:$0xff]  ;;  %v523_v25 = vld [vmem:[#allocation5 + $0xd38] sm:$0xff] }
  0xbf   :  { %1186 = vmatmul.f32.vlgmr.msrb.gmra.mxu1 %v3967_v1  ;;  %1206 = vmatmul.f32.vlgmr.msrb.gmra.mxu3 %v3969_v2  ;;  %v173_v1 = vld [vmem:[#allocation5 + $0x248] sm:$0xff]  ;;  %v299_v2 = vld [vmem:[#allocation5 + $0x638] sm:$0xff] }
  0xc0   :  { %1294 = vmatpush.msrb.mxu0 %v851_v28  ;;  %1312 = vmatpush.msrb.mxu2 %v194_v29  ;;  %v215_v27 = vld [vmem:[#allocation5 + $0x398] sm:$0xff]  ;;  %v642_v28 = vld [vmem:[#allocation5 + $0x10f0] sm:$0xff]  ;;  %v516_v29 = vld [vmem:[#allocation5 + $0xd00] sm:$0xff] }
  0xc1   :  { %1330 = vmatpush.msrb.mxu1 %v320_v30  ;;  %1350 = vmatpush.msrb.mxu3 %v432_v31  ;;  %v768_v30 = vld [vmem:[#allocation5 + $0x14e0] sm:$0xff]  ;;  %v866_v31 = vld [vmem:[#allocation5 + $0x17f0] sm:$0xff] }
  0xc2   :  { %1295 = vmatpush.msrb.mxu0 %v844_v32  ;;  %1313 = vmatpush.msrb.mxu2 %v187_v33  ;;  %v635_v32 = vld [vmem:[#allocation5 + $0x10b8] sm:$0xff]  ;;  %v509_v33 = vld [vmem:[#allocation5 + $0xcc8] sm:$0xff] }
  0xc3   :  { %1331 = vmatpush.msrb.mxu1 %v313_v34  ;;  %1351 = vmatpush.msrb.mxu3 %v425_v35  ;;  %v761_v34 = vld [vmem:[#allocation5 + $0x14a8] sm:$0xff]  ;;  %v859_v35 = vld [vmem:[#allocation5 + $0x17b8] sm:$0xff] }
  0xc4   :  { %1246 = vmatmul.f32.vlgmr.msra.gmra.mxu2 %v3971_v3  ;;  %1296 = vmatpush.msrb.mxu0 %v837_v36  ;;  %v159_v3 = vld [vmem:[#allocation5 + $0x1d8] sm:$0xff]  ;;  %v628_v36 = vld [vmem:[#allocation5 + $0x1080] sm:$0xff] }
  0xc5   :  { %1314 = vmatpush.msrb.mxu2 %v180_v37  ;;  %1332 = vmatpush.msrb.mxu1 %v306_v38  ;;  %v502_v37 = vld [vmem:[#allocation5 + $0xc90] sm:$0xff] }
  0xc6   :  { %1352 = vmatpush.msrb.mxu3 %v418_v39  ;;  %1297 = vmatpush.msrb.mxu0 %v830_v40  ;;  %v754_v38 = vld [vmem:[#allocation5 + $0x1470] sm:$0xff]  ;;  %v852_v39 = vld [vmem:[#allocation5 + $0x1780] sm:$0xff]  ;;  %v621_v40 = vld [vmem:[#allocation5 + $0x1048] sm:$0xff] }
  0xc7   :  { %1315 = vmatpush.msrb.mxu2 %v173_v1  ;;  %1333 = vmatpush.msrb.mxu1 %v299_v2  ;;  %v495_v1 = vld [vmem:[#allocation5 + $0xc58] sm:$0xff] }
  0xc8   :  { %1353 = vmatpush.msrb.mxu3 %v411_v41  ;;  %1226 = vmatmul.f32.vlgmr.msra.gmra.mxu0 %v3964_v56  ;;  %v802_v56 = vld [vmem:[#allocation5 + $0x15f0] sm:$0xff]  ;;  %v747_v2 = vld [vmem:[#allocation5 + $0x1438] sm:$0xff]  ;;  %v845_v41 = vld [vmem:[#allocation5 + $0x1748] sm:$0xff] }
  0xc9   :  { %1286 = vmatmul.f32.vlgmr.msra.gmra.mxu3 %v3983_v26  ;;  %1298 = vmatpush.msrb.mxu0 %v823_v42  ;;  %v271_v26 = vld [vmem:[#allocation5 + $0x558] sm:$0xff]  ;;  %v614_v42 = vld [vmem:[#allocation5 + $0x1010] sm:$0xff] }
  0xca   :  { %1316 = vmatpush.msrb.mxu2 %v166_v43  ;;  %1334 = vmatpush.msrb.mxu1 %v292_v44  ;;  %v488_v43 = vld [vmem:[#allocation5 + $0xc20] sm:$0xff] }
  0xcb   :  { %1354 = vmatpush.msrb.mxu3 %v404_v45  ;;  %1299 = vmatpush.msrb.mxu0 %v816_v46  ;;  %v740_v44 = vld [vmem:[#allocation5 + $0x1400] sm:$0xff]  ;;  %v838_v45 = vld [vmem:[#allocation5 + $0x1710] sm:$0xff]  ;;  %v607_v46 = vld [vmem:[#allocation5 + $0xfd8] sm:$0xff] }
  0xcc   :  { %1317 = vmatpush.msrb.mxu2 %v159_v3  ;;  %1335 = vmatpush.msrb.mxu1 %v285_v47  ;;  %v481_v3 = vld [vmem:[#allocation5 + $0xbe8] sm:$0xff] }
  0xcd   :  { %1355 = vmatpush.msrb.mxu3 %v397_v48  ;;  %1266 = vmatmul.f32.vlgmr.msra.gmra.mxu1 %v3978_v21  ;;  %v257_v21 = vld [vmem:[#allocation5 + $0x4e8] sm:$0xff]  ;;  %v831_v48 = vld [vmem:[#allocation5 + $0x16d8] sm:$0xff] }
  0xce   :  { %1300 = vmatpush.msrb.mxu0 %v809_v49  ;;  %1318 = vmatpush.msrb.mxu2 %v152_v50  ;;  %v733_v47 = vld [vmem:[#allocation5 + $0x13c8] sm:$0xff]  ;;  %v600_v49 = vld [vmem:[#allocation5 + $0xfa0] sm:$0xff]  ;;  %v474_v50 = vld [vmem:[#allocation5 + $0xbb0] sm:$0xff] }
  0xcf   :  { %1336 = vmatpush.msrb.mxu1 %v278_v51  ;;  %1356 = vmatpush.msrb.mxu3 %v390_v52  ;;  %v726_v51 = vld [vmem:[#allocation5 + $0x1390] sm:$0xff]  ;;  %v824_v52 = vld [vmem:[#allocation5 + $0x16a0] sm:$0xff] }
  0xd0   :  { %1301 = vmatpush.msrb.mxu0 %v802_v56  ;;  %1319 = vmatpush.msrb.mxu2 %v145_v53  ;;  %v593_v56 = vld [vmem:[#allocation5 + $0xf68] sm:$0xff]  ;;  %v467_v53 = vld [vmem:[#allocation5 + $0xb78] sm:$0xff] }
  0xd1   :  { %1337 = vmatpush.msrb.mxu1 %v271_v26  ;;  %1357 = vmatpush.msrb.mxu3 %v383_v54  ;;  %v719_v26 = vld [vmem:[#allocation5 + $0x1358] sm:$0xff]  ;;  %v817_v54 = vld [vmem:[#allocation5 + $0x1668] sm:$0xff] }
  0xd2   :  { %1302 = vmatpush.msrb.mxu0 %v795_v55  ;;  %1320 = vmatpush.msrb.mxu2 %v138_v57  ;;  %v586_v55 = vld [vmem:[#allocation5 + $0xf30] sm:$0xff]  ;;  %v460_v57 = vld [vmem:[#allocation5 + $0xb40] sm:$0xff] }
  0xd3   :  { %1338 = vmatpush.msrb.mxu1 %v264_v58  ;;  %1358 = vmatpush.msrb.mxu3 %v376_v59  ;;  %v712_v58 = vld [vmem:[#allocation5 + $0x1320] sm:$0xff]  ;;  %v810_v59 = vld [vmem:[#allocation5 + $0x1630] sm:$0xff] }
  0xd4   :  { %1303 = vmatpush.msrb.mxu0 %v788_v60  ;;  %1321 = vmatpush.msrb.mxu2 %v131_v61  ;;  %v579_v60 = vld [vmem:[#allocation5 + $0xef8] sm:$0xff]  ;;  %v453_v61 = vld [vmem:[#allocation5 + $0xb08] sm:$0xff] }
  0xd5   :  { %1339 = vmatpush.msrb.mxu1 %v257_v21  ;;  %1359 = vmatpush.msrb.mxu3 %v369_v62  ;;  %v705_v21 = vld [vmem:[#allocation5 + $0x12e8] sm:$0xff]  ;;  %v803_v62 = vld [vmem:[#allocation5 + $0x15f8] sm:$0xff] }
  0xd6   :  { %1304 = vmatpush.msrb.mxu0 %v781_v63  ;;  %1322 = vmatpush.msrb.mxu2 %v124_v0  ;;  %v572_v63 = vld [vmem:[#allocation5 + $0xec0] sm:$0xff]  ;;  %v446_v0 = vld [vmem:[#allocation5 + $0xad0] sm:$0xff] }
  0xd7   :  { %1340 = vmatpush.msrb.mxu1 %v250_v4  ;;  %1360 = vmatpush.msrb.mxu3 %v362_v5  ;;  %v698_v4 = vld [vmem:[#allocation5 + $0x12b0] sm:$0xff]  ;;  %v796_v5 = vld [vmem:[#allocation5 + $0x15c0] sm:$0xff] }
  0xd8   :  { %1305 = vmatpush.msrb.mxu0 %v774_v6  ;;  %1323 = vmatpush.msrb.mxu2 %v117_v7  ;;  %v565_v6 = vld [vmem:[#allocation5 + $0xe88] sm:$0xff]  ;;  %v439_v7 = vld [vmem:[#allocation5 + $0xa98] sm:$0xff] }
  0xd9   :  { %1341 = vmatpush.msrb.mxu1 %v243_v8  ;;  %1361 = vmatpush.msrb.mxu3 %v355_v9  ;;  %v691_v8 = vld [vmem:[#allocation5 + $0x1278] sm:$0xff]  ;;  %v789_v9 = vld [vmem:[#allocation5 + $0x1588] sm:$0xff] }
  0xda   :  { %3688 = vmatmul.msk.f32.vlgmr.msrb.gmra.mxu0 %vm886_vm0, %v3976_v16  ;;  %1324 = vmatpush.msrb.mxu2 %v110_v10  ;;  %v327_v16 = vld [vmem:[#allocation5 + $0x718] sm:$0xff]  ;;  %v209_v10 = vld [vmem:[#allocation5 + $0x368] sm:$0xff] }
  0xdb   :  { %1370 = vmatpush.msra.mxu0 %v544_v11  ;;  %1342 = vmatpush.msrb.mxu1 %v236_v12  ;;  %v558_v11 = vld [vmem:[#allocation5 + $0xe50] sm:$0xff]  ;;  %v684_v12 = vld [vmem:[#allocation5 + $0x1240] sm:$0xff] }
  0xdc   :  { %1362 = vmatpush.msrb.mxu3 %v348_v13  ;;  %1325 = vmatpush.msrb.mxu2 %v103_v14  ;;  %v782_v13 = vld [vmem:[#allocation5 + $0x1550] sm:$0xff]  ;;  %v4002_v14 = vld [vmem:[#allocation2] sm:$0xff] }
  0xdd   :  { %1371 = vmatpush.msra.mxu0 %v537_v15  ;;  %1343 = vmatpush.msrb.mxu1 %v229_v17  ;;  %v202_v15 = vld [vmem:[#allocation5 + $0x330] sm:$0xff]  ;;  %v551_v17 = vld [vmem:[#allocation5 + $0xe18] sm:$0xff] }
  0xde   :  { %1363 = vmatpush.msrb.mxu3 %v341_v18  ;;  %1390 = vmatpush.msra.mxu2 %v656_v19  ;;  %v677_v18 = vld [vmem:[#allocation5 + $0x1208] sm:$0xff]  ;;  %v775_v19 = vld [vmem:[#allocation5 + $0x1518] sm:$0xff] }
  0xdf   :  { %1372 = vmatpush.msra.mxu0 %v530_v20  ;;  %1344 = vmatpush.msrb.mxu1 %v222_v22  ;;  %v195_v20 = vld [vmem:[#allocation5 + $0x2f8] sm:$0xff]  ;;  %v321_v22 = vld [vmem:[#allocation5 + $0x6e8] sm:$0xff] }
  0xe0   :  { %1364 = vmatpush.msrb.mxu3 %v334_v23  ;;  %1391 = vmatpush.msra.mxu2 %v649_v24  ;;  %v433_v23 = vld [vmem:[#allocation5 + $0xa68] sm:$0xff]  ;;  %v670_v24 = vld [vmem:[#allocation5 + $0x11d0] sm:$0xff] }
  0xe1   :  { %1373 = vmatpush.msra.mxu0 %v523_v25  ;;  %1345 = vmatpush.msrb.mxu1 %v215_v27  ;;  %v188_v25 = vld [vmem:[#allocation5 + $0x2c0] sm:$0xff]  ;;  %v4005_v27 = vld [vmem:[#allocation2 + $0x10] sm:$0xff] }
  0xe2   :  { %1365 = vmatpush.msrb.mxu3 %v327_v16  ;;  %1392 = vmatpush.msra.mxu2 %v642_v28  ;;  %v314_v16 = vld [vmem:[#allocation5 + $0x6b0] sm:$0xff] }
  0xe3   :  { %1374 = vmatpush.msra.mxu0 %v516_v29  ;;  %1410 = vmatpush.msra.mxu1 %v768_v30  ;;  %v426_v28 = vld [vmem:[#allocation5 + $0xa30] sm:$0xff]  ;;  %v663_v29 = vld [vmem:[#allocation5 + $0x1198] sm:$0xff]  ;;  %v181_v30 = vld [vmem:[#allocation5 + $0x288] sm:$0xff] }
  0xe4   :  { %1432 = vmatpush.msra.mxu3 %v866_v31  ;;  %1393 = vmatpush.msra.mxu2 %v635_v32  ;;  %v307_v31 = vld [vmem:[#allocation5 + $0x678] sm:$0xff] }
  0xe5   :  { %1375 = vmatpush.msra.mxu0 %v509_v33  ;;  %1411 = vmatpush.msra.mxu1 %v761_v34  ;;  %v419_v32 = vld [vmem:[#allocation5 + $0x9f8] sm:$0xff]  ;;  %v4008_v33 = vld [vmem:[#allocation2 + $0x20] sm:$0xff] }
  0xe6   :  { %1433 = vmatpush.msra.mxu3 %v859_v35  ;;  %1394 = vmatpush.msra.mxu2 %v628_v36  ;;  %v545_v34 = vld [vmem:[#allocation5 + $0xde8] sm:$0xff]  ;;  %v174_v35 = vld [vmem:[#allocation5 + $0x250] sm:$0xff] }
  0xe7   :  { %1376 = vmatpush.msra.mxu0 %v502_v37  ;;  %1412 = vmatpush.msra.mxu1 %v754_v38  ;;  %v4011_v36 = vld [vmem:[#allocation2 + $0x8] sm:$0xff]  ;;  %v300_v37 = vld [vmem:[#allocation5 + $0x640] sm:$0xff] }
  0xe8   :  { %1434 = vmatpush.msra.mxu3 %v852_v39  ;;  %1395 = vmatpush.msra.mxu2 %v621_v40  ;;  %v412_v38 = vld [vmem:[#allocation5 + $0x9c0] sm:$0xff]  ;;  %v538_v39 = vld [vmem:[#allocation5 + $0xdb0] sm:$0xff]  ;;  %v167_v40 = vld [vmem:[#allocation5 + $0x218] sm:$0xff] }
  0xe9   :  { %1377 = vmatpush.msra.mxu0 %v495_v1  ;;  %1413 = vmatpush.msra.mxu1 %v747_v2  ;;  %v293_v1 = vld [vmem:[#allocation5 + $0x608] sm:$0xff] }
  0xea   :  { %1435 = vmatpush.msra.mxu3 %v845_v41  ;;  %1396 = vmatpush.msra.mxu2 %v614_v42  ;;  %v405_v2 = vld [vmem:[#allocation5 + $0x988] sm:$0xff]  ;;  %v4014_v41 = vld [vmem:[#allocation2 + $0x18] sm:$0xff]  ;;  %v531_v42 = vld [vmem:[#allocation5 + $0xd78] sm:$0xff] }
  0xeb   :  { %1378 = vmatpush.msra.mxu0 %v488_v43  ;;  %1414 = vmatpush.msra.mxu1 %v740_v44  ;;  %v160_v43 = vld [vmem:[#allocation5 + $0x1e0] sm:$0xff]  ;;  %v4017_v44 = vld [vmem:[#allocation2 + $0x30] sm:$0xff] }
  0xec   :  { %1436 = vmatpush.msra.mxu3 %v838_v45  ;;  %1397 = vmatpush.msra.mxu2 %v607_v46  ;;  %v286_v45 = vld [vmem:[#allocation5 + $0x5d0] sm:$0xff] }
  0xed   :  { %1379 = vmatpush.msra.mxu0 %v481_v3  ;;  %1415 = vmatpush.msra.mxu1 %v733_v47  ;;  %v398_v46 = vld [vmem:[#allocation5 + $0x950] sm:$0xff]  ;;  %v524_v3 = vld [vmem:[#allocation5 + $0xd40] sm:$0xff]  ;;  %v153_v47 = vld [vmem:[#allocation5 + $0x1a8] sm:$0xff] }
  0xee   :  { %1437 = vmatpush.msra.mxu3 %v831_v48  ;;  %1398 = vmatpush.msra.mxu2 %v600_v49  ;;  %v279_v48 = vld [vmem:[#allocation5 + $0x598] sm:$0xff] }
  0xef   :  { %1380 = vmatpush.msra.mxu0 %v474_v50  ;;  %1416 = vmatpush.msra.mxu1 %v726_v51  ;;  %v391_v49 = vld [vmem:[#allocation5 + $0x918] sm:$0xff]  ;;  %v517_v50 = vld [vmem:[#allocation5 + $0xd08] sm:$0xff]  ;;  %v146_v51 = vld [vmem:[#allocation5 + $0x170] sm:$0xff] }
  0xf0   :  { %1438 = vmatpush.msra.mxu3 %v824_v52  ;;  %1399 = vmatpush.msra.mxu2 %v593_v56  ;;  %v272_v52 = vld [vmem:[#allocation5 + $0x560] sm:$0xff]  ;;  %v4021_v56 = vld [vmem:[#allocation2 + $0x28] sm:$0xff] }
  0xf1   :  { %1381 = vmatpush.msra.mxu0 %v467_v53  ;;  %1417 = vmatpush.msra.mxu1 %v719_v26  ;;  %v384_v53 = vld [vmem:[#allocation5 + $0x8e0] sm:$0xff]  ;;  %v510_v26 = vld [vmem:[#allocation5 + $0xcd0] sm:$0xff] }
  0xf2   :  { %1439 = vmatpush.msra.mxu3 %v817_v54  ;;  %1400 = vmatpush.msra.mxu2 %v586_v55  ;;  %v139_v54 = vld [vmem:[#allocation5 + $0x138] sm:$0xff]  ;;  %v265_v55 = vld [vmem:[#allocation5 + $0x528] sm:$0xff] }
  0xf3   :  { %1382 = vmatpush.msra.mxu0 %v460_v57  ;;  %1418 = vmatpush.msra.mxu1 %v712_v58  ;;  %v377_v57 = vld [vmem:[#allocation5 + $0x8a8] sm:$0xff]  ;;  %v503_v58 = vld [vmem:[#allocation5 + $0xc98] sm:$0xff] }
  0xf4   :  { %1440 = vmatpush.msra.mxu3 %v810_v59  ;;  %1401 = vmatpush.msra.mxu2 %v579_v60  ;;  %v132_v59 = vld [vmem:[#allocation5 + $0x100] sm:$0xff]  ;;  %v258_v60 = vld [vmem:[#allocation5 + $0x4f0] sm:$0xff] }
  0xf5   :  { %1383 = vmatpush.msra.mxu0 %v453_v61  ;;  %1419 = vmatpush.msra.mxu1 %v705_v21  ;;  %v370_v61 = vld [vmem:[#allocation5 + $0x870] sm:$0xff]  ;;  %v496_v21 = vld [vmem:[#allocation5 + $0xc60] sm:$0xff] }
  0xf6   :  { %1441 = vmatpush.msra.mxu3 %v803_v62  ;;  %1402 = vmatpush.msra.mxu2 %v572_v63  ;;  %v125_v62 = vld [vmem:[#allocation5 + $0xc8] sm:$0xff]  ;;  %v251_v63 = vld [vmem:[#allocation5 + $0x4b8] sm:$0xff] }
  0xf7   :  { %1384 = vmatpush.msra.mxu0 %v446_v0  ;;  %1420 = vmatpush.msra.mxu1 %v698_v4  ;;  %v363_v0 = vld [vmem:[#allocation5 + $0x838] sm:$0xff]  ;;  %v489_v4 = vld [vmem:[#allocation5 + $0xc28] sm:$0xff] }
  0xf8   :  { %1442 = vmatpush.msra.mxu3 %v796_v5  ;;  %1403 = vmatpush.msra.mxu2 %v565_v6  ;;  %v118_v5 = vld [vmem:[#allocation5 + $0x90] sm:$0xff]  ;;  %v244_v6 = vld [vmem:[#allocation5 + $0x480] sm:$0xff] }
  0xf9   :  { %1385 = vmatpush.msra.mxu0 %v439_v7  ;;  %1421 = vmatpush.msra.mxu1 %v691_v8  ;;  %v356_v7 = vld [vmem:[#allocation5 + $0x800] sm:$0xff]  ;;  %v482_v8 = vld [vmem:[#allocation5 + $0xbf0] sm:$0xff] }
  0xfa   :  { %1443 = vmatpush.msra.mxu3 %v789_v9  ;;  %1326 = vmatmul.f32.vlgmr.msrb.gmra.mxu2 %v4002_v14  ;;  %v111_v9 = vld [vmem:[#allocation5 + $0x58] sm:$0xff] }
  0xfb   :  { %1450 = vmatpush.msrb.mxu0 %v209_v10  ;;  %1404 = vmatpush.msra.mxu2 %v558_v11  ;;  %v237_v10 = vld [vmem:[#allocation5 + $0x448] sm:$0xff] }
  0xfc   :  { %1422 = vmatpush.msra.mxu1 %v684_v12  ;;  %1444 = vmatpush.msra.mxu3 %v782_v13  ;;  %v349_v11 = vld [vmem:[#allocation5 + $0x7c8] sm:$0xff]  ;;  %v475_v12 = vld [vmem:[#allocation5 + $0xbb8] sm:$0xff]  ;;  %v104_v13 = vld [vmem:[#allocation5 + $0x20] sm:$0xff] }
  0xfd   :  { %1451 = vmatpush.msrb.mxu0 %v202_v15  ;;  %1405 = vmatpush.msra.mxu2 %v551_v17  ;;  %v230_v15 = vld [vmem:[#allocation5 + $0x410] sm:$0xff] }
  0xfe   :  { %1423 = vmatpush.msra.mxu1 %v677_v18  ;;  %1445 = vmatpush.msra.mxu3 %v775_v19  ;;  %v342_v17 = vld [vmem:[#allocation5 + $0x790] sm:$0xff]  ;;  %v468_v18 = vld [vmem:[#allocation5 + $0xb80] sm:$0xff]  ;;  %v657_v19 = vld [vmem:[#allocation5 + $0x1168] sm:$0xff] }
  0xff   :  { %1366 = vmatmul.f32.vlgmr.msrb.gmra.mxu3 %v4005_v27  ;;  %1452 = vmatpush.msrb.mxu0 %v195_v20  ;;  %v223_v20 = vld [vmem:[#allocation5 + $0x3d8] sm:$0xff] }
 0x100   :  { %1470 = vmatpush.msrb.mxu2 %v321_v22  ;;  %1490 = vmatpush.msrb.mxu3 %v433_v23  ;;  %v335_v22 = vld [vmem:[#allocation5 + $0x758] sm:$0xff]  ;;  %v461_v23 = vld [vmem:[#allocation5 + $0xb48] sm:$0xff] }
 0x101   :  { %1424 = vmatpush.msra.mxu1 %v670_v24  ;;  %1453 = vmatpush.msrb.mxu0 %v188_v25  ;;  %v650_v24 = vld [vmem:[#allocation5 + $0x1130] sm:$0xff]  ;;  %v216_v25 = vld [vmem:[#allocation5 + $0x3a0] sm:$0xff] }
 0x102   :  { %1471 = vmatpush.msrb.mxu2 %v314_v16  ;;  %1491 = vmatpush.msrb.mxu3 %v426_v28  ;;  %v328_v16 = vld [vmem:[#allocation5 + $0x720] sm:$0xff]  ;;  %v454_v28 = vld [vmem:[#allocation5 + $0xb10] sm:$0xff] }
 0x103   :  { %1425 = vmatpush.msra.mxu1 %v663_v29  ;;  %1406 = vmatmul.f32.vlgmr.msra.gmra.mxu2 %v4008_v33  ;;  %v643_v29 = vld [vmem:[#allocation5 + $0x10f8] sm:$0xff] }
 0x104   :  { %1346 = vmatmul.f32.vlgmr.msrb.gmra.mxu1 %v4011_v36  ;;  %1454 = vmatpush.msrb.mxu0 %v181_v30  ;;  %v769_v30 = vld [vmem:[#allocation5 + $0x14e8] sm:$0xff] }
 0x105   :  { %1472 = vmatpush.msrb.mxu2 %v307_v31  ;;  %1492 = vmatpush.msrb.mxu3 %v419_v32  ;;  %v867_v31 = vld [vmem:[#allocation5 + $0x17f8] sm:$0xff] }
 0x106   :  { %1510 = vmatpush.msrb.mxu1 %v545_v34  ;;  %1455 = vmatpush.msrb.mxu0 %v174_v35  ;;  %v447_v32 = vld [vmem:[#allocation5 + $0xad8] sm:$0xff]  ;;  %v636_v34 = vld [vmem:[#allocation5 + $0x10c0] sm:$0xff]  ;;  %v762_v35 = vld [vmem:[#allocation5 + $0x14b0] sm:$0xff] }
 0x107   :  { %1473 = vmatpush.msrb.mxu2 %v300_v37  ;;  %1493 = vmatpush.msrb.mxu3 %v412_v38  ;;  %v860_v37 = vld [vmem:[#allocation5 + $0x17c0] sm:$0xff] }
 0x108   :  { %1511 = vmatpush.msrb.mxu1 %v538_v39  ;;  %1386 = vmatmul.f32.vlgmr.msra.gmra.mxu0 %v4014_v41  ;;  %v440_v38 = vld [vmem:[#allocation5 + $0xaa0] sm:$0xff]  ;;  %v629_v39 = vld [vmem:[#allocation5 + $0x1088] sm:$0xff] }
 0x109   :  { %3689 = vmatmul.msk.f32.vlgmr.msra.gmra.mxu3 %vm886_vm0, %v4017_v44  ;;  %1456 = vmatpush.msrb.mxu0 %v167_v40  ;;  %v755_v40 = vld [vmem:[#allocation5 + $0x1478] sm:$0xff] }
 0x10a   :  { %1474 = vmatpush.msrb.mxu2 %v293_v1  ;;  %1494 = vmatpush.msrb.mxu3 %v405_v2  ;;  %v853_v1 = vld [vmem:[#allocation5 + $0x1788] sm:$0xff]  ;;  %v210_v2 = vld [vmem:[#allocation5 + $0x370] sm:$0xff] }
 0x10b   :  { %1512 = vmatpush.msrb.mxu1 %v531_v42  ;;  %1457 = vmatpush.msrb.mxu0 %v160_v43  ;;  %v622_v42 = vld [vmem:[#allocation5 + $0x1050] sm:$0xff]  ;;  %v748_v43 = vld [vmem:[#allocation5 + $0x1440] sm:$0xff] }
 0x10c   :  { %1475 = vmatpush.msrb.mxu2 %v286_v45  ;;  %1495 = vmatpush.msrb.mxu3 %v398_v46  ;;  %v846_v45 = vld [vmem:[#allocation5 + $0x1750] sm:$0xff]  ;;  %v203_v46 = vld [vmem:[#allocation5 + $0x338] sm:$0xff] }
 0x10d   :  { %1513 = vmatpush.msrb.mxu1 %v524_v3  ;;  %1458 = vmatpush.msrb.mxu0 %v153_v47  ;;  %v615_v3 = vld [vmem:[#allocation5 + $0x1018] sm:$0xff]  ;;  %v741_v47 = vld [vmem:[#allocation5 + $0x1408] sm:$0xff] }
 0x10e   :  { %1426 = vmatmul.f32.vlgmr.msra.gmra.mxu1 %v4021_v56  ;;  %1476 = vmatpush.msrb.mxu2 %v279_v48  ;;  %v839_v48 = vld [vmem:[#allocation5 + $0x1718] sm:$0xff] }
 0x10f   :  { %1496 = vmatpush.msrb.mxu3 %v391_v49  ;;  %1514 = vmatpush.msrb.mxu1 %v517_v50  ;;  %v196_v49 = vld [vmem:[#allocation5 + $0x300] sm:$0xff] }
 0x110   :  { %1459 = vmatpush.msrb.mxu0 %v146_v51  ;;  %1477 = vmatpush.msrb.mxu2 %v272_v52  ;;  %v608_v50 = vld [vmem:[#allocation5 + $0xfe0] sm:$0xff]  ;;  %v734_v51 = vld [vmem:[#allocation5 + $0x13d0] sm:$0xff] }
 0x111   :  { %1497 = vmatpush.msrb.mxu3 %v384_v53  ;;  %1515 = vmatpush.msrb.mxu1 %v510_v26  ;;  %v832_v52 = vld [vmem:[#allocation5 + $0x16e0] sm:$0xff]  ;;  %v189_v53 = vld [vmem:[#allocation5 + $0x2c8] sm:$0xff] }
 0x112   :  { %1460 = vmatpush.msrb.mxu0 %v139_v54  ;;  %1478 = vmatpush.msrb.mxu2 %v265_v55  ;;  %v601_v26 = vld [vmem:[#allocation5 + $0xfa8] sm:$0xff]  ;;  %v727_v54 = vld [vmem:[#allocation5 + $0x1398] sm:$0xff] }
 0x113   :  { %1498 = vmatpush.msrb.mxu3 %v377_v57  ;;  %1516 = vmatpush.msrb.mxu1 %v503_v58  ;;  %v825_v55 = vld [vmem:[#allocation5 + $0x16a8] sm:$0xff]  ;;  %v182_v57 = vld [vmem:[#allocation5 + $0x290] sm:$0xff] }
 0x114   :  { %1461 = vmatpush.msrb.mxu0 %v132_v59  ;;  %1479 = vmatpush.msrb.mxu2 %v258_v60  ;;  %v594_v58 = vld [vmem:[#allocation5 + $0xf70] sm:$0xff]  ;;  %v720_v59 = vld [vmem:[#allocation5 + $0x1360] sm:$0xff] }
 0x115   :  { %1499 = vmatpush.msrb.mxu3 %v370_v61  ;;  %1517 = vmatpush.msrb.mxu1 %v496_v21  ;;  %v818_v60 = vld [vmem:[#allocation5 + $0x1670] sm:$0xff]  ;;  %v175_v61 = vld [vmem:[#allocation5 + $0x258] sm:$0xff] }
 0x116   :  { %1462 = vmatpush.msrb.mxu0 %v125_v62  ;;  %1480 = vmatpush.msrb.mxu2 %v251_v63  ;;  %v587_v21 = vld [vmem:[#allocation5 + $0xf38] sm:$0xff]  ;;  %v713_v62 = vld [vmem:[#allocation5 + $0x1328] sm:$0xff] }
 0x117   :  { %1500 = vmatpush.msrb.mxu3 %v363_v0  ;;  %1518 = vmatpush.msrb.mxu1 %v489_v4  ;;  %v811_v63 = vld [vmem:[#allocation5 + $0x1638] sm:$0xff]  ;;  %v168_v0 = vld [vmem:[#allocation5 + $0x220] sm:$0xff] }
 0x118   :  { %1463 = vmatpush.msrb.mxu0 %v118_v5  ;;  %1481 = vmatpush.msrb.mxu2 %v244_v6  ;;  %v580_v4 = vld [vmem:[#allocation5 + $0xf00] sm:$0xff]  ;;  %v706_v5 = vld [vmem:[#allocation5 + $0x12f0] sm:$0xff] }
 0x119   :  { %1501 = vmatpush.msrb.mxu3 %v356_v7  ;;  %1519 = vmatpush.msrb.mxu1 %v482_v8  ;;  %v804_v6 = vld [vmem:[#allocation5 + $0x1600] sm:$0xff]  ;;  %v161_v7 = vld [vmem:[#allocation5 + $0x1e8] sm:$0xff] }
 0x11a   :  { %1464 = vmatpush.msrb.mxu0 %v111_v9  ;;  %1482 = vmatpush.msrb.mxu2 %v237_v10  ;;  %v573_v8 = vld [vmem:[#allocation5 + $0xec8] sm:$0xff]  ;;  %v699_v9 = vld [vmem:[#allocation5 + $0x12b8] sm:$0xff] }
 0x11b   :  { %1502 = vmatpush.msrb.mxu3 %v349_v11  ;;  %1520 = vmatpush.msrb.mxu1 %v475_v12  ;;  %v797_v10 = vld [vmem:[#allocation5 + $0x15c8] sm:$0xff]  ;;  %v154_v11 = vld [vmem:[#allocation5 + $0x1b0] sm:$0xff] }
 0x11c   :  { %1465 = vmatpush.msrb.mxu0 %v104_v13  ;;  %1483 = vmatpush.msrb.mxu2 %v230_v15  ;;  %v566_v12 = vld [vmem:[#allocation5 + $0xe90] sm:$0xff]  ;;  %v692_v13 = vld [vmem:[#allocation5 + $0x1280] sm:$0xff] }
 0x11d   :  { %1503 = vmatpush.msrb.mxu3 %v342_v17  ;;  %1521 = vmatpush.msrb.mxu1 %v468_v18  ;;  %v790_v15 = vld [vmem:[#allocation5 + $0x1590] sm:$0xff]  ;;  %v147_v17 = vld [vmem:[#allocation5 + $0x178] sm:$0xff] }
 0x11e   :  { %1530 = vmatpush.msra.mxu0 %v657_v19  ;;  %1484 = vmatpush.msrb.mxu2 %v223_v20  ;;  %v559_v18 = vld [vmem:[#allocation5 + $0xe58] sm:$0xff]  ;;  %v685_v19 = vld [vmem:[#allocation5 + $0x1248] sm:$0xff] }
 0x11f   :  { %1504 = vmatpush.msrb.mxu3 %v335_v22  ;;  %1522 = vmatpush.msrb.mxu1 %v461_v23  ;;  %v783_v20 = vld [vmem:[#allocation5 + $0x1558] sm:$0xff]  ;;  %v140_v22 = vld [vmem:[#allocation5 + $0x140] sm:$0xff] }
 0x120   :  { %1531 = vmatpush.msra.mxu0 %v650_v24  ;;  %1485 = vmatpush.msrb.mxu2 %v216_v25  ;;  %v552_v23 = vld [vmem:[#allocation5 + $0xe20] sm:$0xff]  ;;  %v678_v24 = vld [vmem:[#allocation5 + $0x1210] sm:$0xff] }
 0x121   :  { %1505 = vmatpush.msrb.mxu3 %v328_v16  ;;  %1523 = vmatpush.msrb.mxu1 %v454_v28  ;;  %v776_v25 = vld [vmem:[#allocation5 + $0x1520] sm:$0xff]  ;;  %v133_v16 = vld [vmem:[#allocation5 + $0x108] sm:$0xff]  ;;  %v322_v28 = vld [vmem:[#allocation5 + $0x6f0] sm:$0xff] }
 0x122   :  { %1532 = vmatpush.msra.mxu0 %v643_v29  ;;  %1550 = vmatpush.msra.mxu2 %v769_v30  ;;  %v434_v29 = vld [vmem:[#allocation5 + $0xa70] sm:$0xff]  ;;  %v671_v30 = vld [vmem:[#allocation5 + $0x11d8] sm:$0xff] }
 0x123   :  { %1572 = vmatpush.msra.mxu3 %v867_v31  ;;  %1524 = vmatpush.msrb.mxu1 %v447_v32  ;;  %v126_v31 = vld [vmem:[#allocation5 + $0xd0] sm:$0xff]  ;;  %v315_v32 = vld [vmem:[#allocation5 + $0x6b8] sm:$0xff] }
 0x124   :  { %1533 = vmatpush.msra.mxu0 %v636_v34  ;;  %1551 = vmatpush.msra.mxu2 %v762_v35  ;;  %v427_v34 = vld [vmem:[#allocation5 + $0xa38] sm:$0xff]  ;;  %v664_v35 = vld [vmem:[#allocation5 + $0x11a0] sm:$0xff] }
 0x125   :  { %1573 = vmatpush.msra.mxu3 %v860_v37  ;;  %1525 = vmatpush.msrb.mxu1 %v440_v38  ;;  %v119_v37 = vld [vmem:[#allocation5 + $0x98] sm:$0xff]  ;;  %v308_v38 = vld [vmem:[#allocation5 + $0x680] sm:$0xff] }
 0x126   :  { %1534 = vmatpush.msra.mxu0 %v629_v39  ;;  %1552 = vmatpush.msra.mxu2 %v755_v40  ;;  %v420_v39 = vld [vmem:[#allocation5 + $0xa00] sm:$0xff]  ;;  %v546_v40 = vld [vmem:[#allocation5 + $0xdf0] sm:$0xff] }
 0x127   :  { %1574 = vmatpush.msra.mxu3 %v853_v1  ;;  %1590 = vmatpush.msra.mxu1 %v210_v2  ;;  %v112_v1 = vld [vmem:[#allocation5 + $0x60] sm:$0xff]  ;;  %v301_v2 = vld [vmem:[#allocation5 + $0x648] sm:$0xff] }
 0x128   :  { %1535 = vmatpush.msra.mxu0 %v622_v42  ;;  %1553 = vmatpush.msra.mxu2 %v748_v43  ;;  %v413_v42 = vld [vmem:[#allocation5 + $0x9c8] sm:$0xff]  ;;  %v539_v43 = vld [vmem:[#allocation5 + $0xdb8] sm:$0xff] }
 0x129   :  { %1575 = vmatpush.msra.mxu3 %v846_v45  ;;  %1591 = vmatpush.msra.mxu1 %v203_v46  ;;  %v105_v45 = vld [vmem:[#allocation5 + $0x28] sm:$0xff]  ;;  %v294_v46 = vld [vmem:[#allocation5 + $0x610] sm:$0xff] }
 0x12a   :  { %1536 = vmatpush.msra.mxu0 %v615_v3  ;;  %1554 = vmatpush.msra.mxu2 %v741_v47  ;;  %v406_v3 = vld [vmem:[#allocation5 + $0x990] sm:$0xff]  ;;  %v532_v47 = vld [vmem:[#allocation5 + $0xd80] sm:$0xff] }
 0x12b   :  { %1576 = vmatpush.msra.mxu3 %v839_v48  ;;  %1592 = vmatpush.msra.mxu1 %v196_v49  ;;  %v658_v48 = vld [vmem:[#allocation5 + $0x1170] sm:$0xff]  ;;  %v399_v49 = vld [vmem:[#allocation5 + $0x958] sm:$0xff] }
 0x12c   :  { %1537 = vmatpush.msra.mxu0 %v608_v50  ;;  %1555 = vmatpush.msra.mxu2 %v734_v51  ;;  %v287_v50 = vld [vmem:[#allocation5 + $0x5d8] sm:$0xff]  ;;  %v525_v51 = vld [vmem:[#allocation5 + $0xd48] sm:$0xff] }
 0x12d   :  { %1577 = vmatpush.msra.mxu3 %v832_v52  ;;  %1593 = vmatpush.msra.mxu1 %v189_v53  ;;  %v651_v52 = vld [vmem:[#allocation5 + $0x1138] sm:$0xff]  ;;  %v392_v53 = vld [vmem:[#allocation5 + $0x920] sm:$0xff] }
 0x12e   :  { %1538 = vmatpush.msra.mxu0 %v601_v26  ;;  %1556 = vmatpush.msra.mxu2 %v727_v54  ;;  %v280_v26 = vld [vmem:[#allocation5 + $0x5a0] sm:$0xff]  ;;  %v518_v54 = vld [vmem:[#allocation5 + $0xd10] sm:$0xff] }
 0x12f   :  { %1578 = vmatpush.msra.mxu3 %v825_v55  ;;  %1594 = vmatpush.msra.mxu1 %v182_v57  ;;  %v644_v55 = vld [vmem:[#allocation5 + $0x1100] sm:$0xff]  ;;  %v385_v57 = vld [vmem:[#allocation5 + $0x8e8] sm:$0xff] }
 0x130   :  { %1539 = vmatpush.msra.mxu0 %v594_v58  ;;  %1557 = vmatpush.msra.mxu2 %v720_v59  ;;  %v273_v58 = vld [vmem:[#allocation5 + $0x568] sm:$0xff]  ;;  %v511_v59 = vld [vmem:[#allocation5 + $0xcd8] sm:$0xff] }
 0x131   :  { %1579 = vmatpush.msra.mxu3 %v818_v60  ;;  %1595 = vmatpush.msra.mxu1 %v175_v61  ;;  %v637_v60 = vld [vmem:[#allocation5 + $0x10c8] sm:$0xff]  ;;  %v378_v61 = vld [vmem:[#allocation5 + $0x8b0] sm:$0xff] }
 0x132   :  { %1540 = vmatpush.msra.mxu0 %v587_v21  ;;  %1558 = vmatpush.msra.mxu2 %v713_v62  ;;  %v266_v21 = vld [vmem:[#allocation5 + $0x530] sm:$0xff]  ;;  %v504_v62 = vld [vmem:[#allocation5 + $0xca0] sm:$0xff] }
 0x133   :  { %1580 = vmatpush.msra.mxu3 %v811_v63  ;;  %1596 = vmatpush.msra.mxu1 %v168_v0  ;;  %v630_v63 = vld [vmem:[#allocation5 + $0x1090] sm:$0xff]  ;;  %v371_v0 = vld [vmem:[#allocation5 + $0x878] sm:$0xff] }
 0x134   :  { %1541 = vmatpush.msra.mxu0 %v580_v4  ;;  %1559 = vmatpush.msra.mxu2 %v706_v5  ;;  %v259_v4 = vld [vmem:[#allocation5 + $0x4f8] sm:$0xff]  ;;  %v497_v5 = vld [vmem:[#allocation5 + $0xc68] sm:$0xff] }
 0x135   :  { %1581 = vmatpush.msra.mxu3 %v804_v6  ;;  %1597 = vmatpush.msra.mxu1 %v161_v7  ;;  %v623_v6 = vld [vmem:[#allocation5 + $0x1058] sm:$0xff]  ;;  %v364_v7 = vld [vmem:[#allocation5 + $0x840] sm:$0xff] }
 0x136   :  { %1542 = vmatpush.msra.mxu0 %v573_v8  ;;  %1560 = vmatpush.msra.mxu2 %v699_v9  ;;  %v252_v8 = vld [vmem:[#allocation5 + $0x4c0] sm:$0xff]  ;;  %v490_v9 = vld [vmem:[#allocation5 + $0xc30] sm:$0xff] }
 0x137   :  { %1582 = vmatpush.msra.mxu3 %v797_v10  ;;  %1598 = vmatpush.msra.mxu1 %v154_v11  ;;  %v616_v10 = vld [vmem:[#allocation5 + $0x1020] sm:$0xff]  ;;  %v357_v11 = vld [vmem:[#allocation5 + $0x808] sm:$0xff] }
 0x138   :  { %1543 = vmatpush.msra.mxu0 %v566_v12  ;;  %1561 = vmatpush.msra.mxu2 %v692_v13  ;;  %v245_v12 = vld [vmem:[#allocation5 + $0x488] sm:$0xff]  ;;  %v483_v13 = vld [vmem:[#allocation5 + $0xbf8] sm:$0xff] }
 0x139   :  { %1583 = vmatpush.msra.mxu3 %v790_v15  ;;  %1599 = vmatpush.msra.mxu1 %v147_v17  ;;  %v609_v15 = vld [vmem:[#allocation5 + $0xfe8] sm:$0xff]  ;;  %v350_v17 = vld [vmem:[#allocation5 + $0x7d0] sm:$0xff] }
 0x13a   :  { %1544 = vmatpush.msra.mxu0 %v559_v18  ;;  %1562 = vmatpush.msra.mxu2 %v685_v19  ;;  %v238_v18 = vld [vmem:[#allocation5 + $0x450] sm:$0xff]  ;;  %v476_v19 = vld [vmem:[#allocation5 + $0xbc0] sm:$0xff] }
 0x13b   :  { %1584 = vmatpush.msra.mxu3 %v783_v20  ;;  %1600 = vmatpush.msra.mxu1 %v140_v22  ;;  %v602_v20 = vld [vmem:[#allocation5 + $0xfb0] sm:$0xff]  ;;  %v343_v22 = vld [vmem:[#allocation5 + $0x798] sm:$0xff] }
 0x13c   :  { %1486 = vmatmul.f32.vlgmr.msrb.gmra.mxu2 %v4011_v36  ;;  %1545 = vmatpush.msra.mxu0 %v552_v23  ;;  %v231_v23 = vld [vmem:[#allocation5 + $0x418] sm:$0xff] }
 0x13d   :  { %1563 = vmatpush.msra.mxu2 %v678_v24  ;;  %1585 = vmatpush.msra.mxu3 %v776_v25  ;;  %v469_v24 = vld [vmem:[#allocation5 + $0xb88] sm:$0xff]  ;;  %v595_v25 = vld [vmem:[#allocation5 + $0xf78] sm:$0xff] }
 0x13e   :  { %1601 = vmatpush.msra.mxu1 %v133_v16  ;;  %1466 = vmatmul.f32.vlgmr.msrb.gmra.mxu0 %v4002_v14  ;;  %v336_v16 = vld [vmem:[#allocation5 + $0x760] sm:$0xff] }
 0x13f   :  { %1506 = vmatmul.f32.vlgmr.msrb.gmra.mxu3 %v4005_v27  ;;  %1610 = vmatpush.msrb.mxu0 %v322_v28  ;;  %v224_v28 = vld [vmem:[#allocation5 + $0x3e0] sm:$0xff] }
 0x140   :  { %1630 = vmatpush.msrb.mxu3 %v434_v29  ;;  %1564 = vmatpush.msra.mxu2 %v671_v30  ;;  %v462_v29 = vld [vmem:[#allocation5 + $0xb50] sm:$0xff]  ;;  %v588_v30 = vld [vmem:[#allocation5 + $0xf40] sm:$0xff] }
 0x141   :  { %1602 = vmatpush.msra.mxu1 %v126_v31  ;;  %1611 = vmatpush.msrb.mxu0 %v315_v32  ;;  %v329_v31 = vld [vmem:[#allocation5 + $0x728] sm:$0xff] }
 0x142   :  { %1631 = vmatpush.msrb.mxu3 %v427_v34  ;;  %1565 = vmatpush.msra.mxu2 %v664_v35  ;;  %v217_v32 = vld [vmem:[#allocation5 + $0x3a8] sm:$0xff]  ;;  %v455_v34 = vld [vmem:[#allocation5 + $0xb18] sm:$0xff] }
 0x143   :  { %1603 = vmatpush.msra.mxu1 %v119_v37  ;;  %1612 = vmatpush.msrb.mxu0 %v308_v38  ;;  %v581_v35 = vld [vmem:[#allocation5 + $0xf08] sm:$0xff]  ;;  %v770_v37 = vld [vmem:[#allocation5 + $0x14f0] sm:$0xff]  ;;  %v868_v38 = vld [vmem:[#allocation5 + $0x1800] sm:$0xff] }
 0x144   :  { %1632 = vmatpush.msrb.mxu3 %v420_v39  ;;  %1650 = vmatpush.msrb.mxu2 %v546_v40  ;;  %v448_v39 = vld [vmem:[#allocation5 + $0xae0] sm:$0xff]  ;;  %v574_v40 = vld [vmem:[#allocation5 + $0xed0] sm:$0xff] }
 0x145   :  { %1604 = vmatpush.msra.mxu1 %v112_v1  ;;  %1566 = vmatmul.f32.vlgmr.msra.gmra.mxu2 %v4021_v56  ;;  %v763_v1 = vld [vmem:[#allocation5 + $0x14b8] sm:$0xff] }
 0x146   :  { %1613 = vmatpush.msrb.mxu0 %v301_v2  ;;  %1633 = vmatpush.msrb.mxu3 %v413_v42  ;;  %v861_v2 = vld [vmem:[#allocation5 + $0x17c8] sm:$0xff] }
 0x147   :  { %1651 = vmatpush.msrb.mxu2 %v539_v43  ;;  %1605 = vmatpush.msra.mxu1 %v105_v45  ;;  %v441_v42 = vld [vmem:[#allocation5 + $0xaa8] sm:$0xff]  ;;  %v567_v43 = vld [vmem:[#allocation5 + $0xe98] sm:$0xff]  ;;  %v756_v45 = vld [vmem:[#allocation5 + $0x1480] sm:$0xff] }
 0x148   :  { %1526 = vmatmul.f32.vlgmr.msrb.gmra.mxu1 %v4014_v41  ;;  %3690 = vmatmul.msk.f32.vlgmr.msra.gmra.mxu3 %vm886_vm0, %v4017_v44 }
 0x149   :  { %1614 = vmatpush.msrb.mxu0 %v294_v46  ;;  %1634 = vmatpush.msrb.mxu3 %v406_v3  ;;  %v854_v46 = vld [vmem:[#allocation5 + $0x1790] sm:$0xff]  ;;  %v211_v3 = vld [vmem:[#allocation5 + $0x378] sm:$0xff] }
 0x14a   :  { %1652 = vmatpush.msrb.mxu2 %v532_v47  ;;  %1670 = vmatpush.msrb.mxu1 %v658_v48  ;;  %v560_v47 = vld [vmem:[#allocation5 + $0xe60] sm:$0xff]  ;;  %v749_v48 = vld [vmem:[#allocation5 + $0x1448] sm:$0xff] }
 0x14b   :  { %1546 = vmatmul.f32.vlgmr.msra.gmra.mxu0 %v4008_v33  ;;  %1635 = vmatpush.msrb.mxu3 %v399_v49  ;;  %v847_v49 = vld [vmem:[#allocation5 + $0x1758] sm:$0xff] }
 0x14c   :  { %1615 = vmatpush.msrb.mxu0 %v287_v50  ;;  %1653 = vmatpush.msrb.mxu2 %v525_v51  ;;  %v204_v50 = vld [vmem:[#allocation5 + $0x340] sm:$0xff]  ;;  %v553_v51 = vld [vmem:[#allocation5 + $0xe28] sm:$0xff] }
 0x14d   :  { %1671 = vmatpush.msrb.mxu1 %v651_v52  ;;  %1636 = vmatpush.msrb.mxu3 %v392_v53  ;;  %v742_v52 = vld [vmem:[#allocation5 + $0x1410] sm:$0xff]  ;;  %v840_v53 = vld [vmem:[#allocation5 + $0x1720] sm:$0xff] }
 0x14e   :  { %1616 = vmatpush.msrb.mxu0 %v280_v26  ;;  %1654 = vmatpush.msrb.mxu2 %v518_v54  ;;  %v197_v26 = vld [vmem:[#allocation5 + $0x308] sm:$0xff]  ;;  %v323_v54 = vld [vmem:[#allocation5 + $0x6f8] sm:$0xff] }
 0x14f   :  { %1672 = vmatpush.msrb.mxu1 %v644_v55  ;;  %1637 = vmatpush.msrb.mxu3 %v385_v57  ;;  %v735_v55 = vld [vmem:[#allocation5 + $0x13d8] sm:$0xff]  ;;  %v833_v57 = vld [vmem:[#allocation5 + $0x16e8] sm:$0xff] }
 0x150   :  { %1617 = vmatpush.msrb.mxu0 %v273_v58  ;;  %1655 = vmatpush.msrb.mxu2 %v511_v59  ;;  %v190_v58 = vld [vmem:[#allocation5 + $0x2d0] sm:$0xff]  ;;  %v316_v59 = vld [vmem:[#allocation5 + $0x6c0] sm:$0xff] }
 0x151   :  { %1673 = vmatpush.msrb.mxu1 %v637_v60  ;;  %1638 = vmatpush.msrb.mxu3 %v378_v61  ;;  %v728_v60 = vld [vmem:[#allocation5 + $0x13a0] sm:$0xff]  ;;  %v826_v61 = vld [vmem:[#allocation5 + $0x16b0] sm:$0xff] }
 0x152   :  { %1618 = vmatpush.msrb.mxu0 %v266_v21  ;;  %1656 = vmatpush.msrb.mxu2 %v504_v62  ;;  %v183_v21 = vld [vmem:[#allocation5 + $0x298] sm:$0xff]  ;;  %v309_v62 = vld [vmem:[#allocation5 + $0x688] sm:$0xff] }
 0x153   :  { %1674 = vmatpush.msrb.mxu1 %v630_v63  ;;  %1639 = vmatpush.msrb.mxu3 %v371_v0  ;;  %v721_v63 = vld [vmem:[#allocation5 + $0x1368] sm:$0xff]  ;;  %v819_v0 = vld [vmem:[#allocation5 + $0x1678] sm:$0xff] }
 0x154   :  { %1619 = vmatpush.msrb.mxu0 %v259_v4  ;;  %1657 = vmatpush.msrb.mxu2 %v497_v5  ;;  %v176_v4 = vld [vmem:[#allocation5 + $0x260] sm:$0xff]  ;;  %v302_v5 = vld [vmem:[#allocation5 + $0x650] sm:$0xff] }
 0x155   :  { %1675 = vmatpush.msrb.mxu1 %v623_v6  ;;  %1640 = vmatpush.msrb.mxu3 %v364_v7  ;;  %v812_v6 = vld [vmem:[#allocation5 + $0x1640] sm:$0xff]  ;;  %v169_v7 = vld [vmem:[#allocation5 + $0x228] sm:$0xff] }
 0x156   :  { %1620 = vmatpush.msrb.mxu0 %v252_v8  ;;  %1658 = vmatpush.msrb.mxu2 %v490_v9  ;;  %v295_v8 = vld [vmem:[#allocation5 + $0x618] sm:$0xff] }
 0x157   :  { %1676 = vmatpush.msrb.mxu1 %v616_v10  ;;  %1641 = vmatpush.msrb.mxu3 %v357_v11  ;;  %v707_v9 = vld [vmem:[#allocation5 + $0x12f8] sm:$0xff]  ;;  %v805_v10 = vld [vmem:[#allocation5 + $0x1608] sm:$0xff]  ;;  %v162_v11 = vld [vmem:[#allocation5 + $0x1f0] sm:$0xff] }
 0x158   :  { %1621 = vmatpush.msrb.mxu0 %v245_v12  ;;  %1659 = vmatpush.msrb.mxu2 %v483_v13  ;;  %v288_v12 = vld [vmem:[#allocation5 + $0x5e0] sm:$0xff] }
 0x159   :  { %1677 = vmatpush.msrb.mxu1 %v609_v15  ;;  %1642 = vmatpush.msrb.mxu3 %v350_v17  ;;  %v700_v13 = vld [vmem:[#allocation5 + $0x12c0] sm:$0xff]  ;;  %v798_v15 = vld [vmem:[#allocation5 + $0x15d0] sm:$0xff]  ;;  %v155_v17 = vld [vmem:[#allocation5 + $0x1b8] sm:$0xff] }
 0x15a   :  { %1622 = vmatpush.msrb.mxu0 %v238_v18  ;;  %1660 = vmatpush.msrb.mxu2 %v476_v19  ;;  %v281_v18 = vld [vmem:[#allocation5 + $0x5a8] sm:$0xff] }
 0x15b   :  { %1678 = vmatpush.msrb.mxu1 %v602_v20  ;;  %1643 = vmatpush.msrb.mxu3 %v343_v22  ;;  %v693_v19 = vld [vmem:[#allocation5 + $0x1288] sm:$0xff]  ;;  %v791_v20 = vld [vmem:[#allocation5 + $0x1598] sm:$0xff]  ;;  %v148_v22 = vld [vmem:[#allocation5 + $0x180] sm:$0xff] }
 0x15c   :  { %1623 = vmatpush.msrb.mxu0 %v231_v23  ;;  %1661 = vmatpush.msrb.mxu2 %v469_v24  ;;  %v274_v23 = vld [vmem:[#allocation5 + $0x570] sm:$0xff]  ;;  %v784_v24 = vld [vmem:[#allocation5 + $0x1560] sm:$0xff] }
 0x15d   :  { %1679 = vmatpush.msrb.mxu1 %v595_v25  ;;  %1644 = vmatpush.msrb.mxu3 %v336_v16  ;;  %v686_v25 = vld [vmem:[#allocation5 + $0x1250] sm:$0xff]  ;;  %v141_v16 = vld [vmem:[#allocation5 + $0x148] sm:$0xff] }
 0x15e   :  { %1624 = vmatpush.msrb.mxu0 %v224_v28  ;;  %1662 = vmatpush.msrb.mxu2 %v462_v29  ;;  %v267_v28 = vld [vmem:[#allocation5 + $0x538] sm:$0xff]  ;;  %v777_v29 = vld [vmem:[#allocation5 + $0x1528] sm:$0xff] }
 0x15f   :  { %1680 = vmatpush.msrb.mxu1 %v588_v30  ;;  %1645 = vmatpush.msrb.mxu3 %v329_v31  ;;  %v134_v30 = vld [vmem:[#allocation5 + $0x110] sm:$0xff]  ;;  %v260_v31 = vld [vmem:[#allocation5 + $0x500] sm:$0xff] }
 0x160   :  { %1625 = vmatpush.msrb.mxu0 %v217_v32  ;;  %1663 = vmatpush.msrb.mxu2 %v455_v34  ;;  %v672_v32 = vld [vmem:[#allocation5 + $0x11e0] sm:$0xff]  ;;  %v127_v34 = vld [vmem:[#allocation5 + $0xd8] sm:$0xff] }
 0x161   :  { %1681 = vmatpush.msrb.mxu1 %v581_v35  ;;  %1712 = vmatpush.msra.mxu3 %v868_v38  ;;  %v253_v35 = vld [vmem:[#allocation5 + $0x4c8] sm:$0xff]  ;;  %v120_v38 = vld [vmem:[#allocation5 + $0xa0] sm:$0xff] }
 0x162   :  { %1690 = vmatpush.msra.mxu0 %v770_v37  ;;  %1664 = vmatpush.msrb.mxu2 %v448_v39  ;;  %v428_v37 = vld [vmem:[#allocation5 + $0xa40] sm:$0xff]  ;;  %v246_v39 = vld [vmem:[#allocation5 + $0x490] sm:$0xff] }
 0x163   :  { %1682 = vmatpush.msrb.mxu1 %v574_v40  ;;  %1713 = vmatpush.msra.mxu3 %v861_v2  ;;  %v421_v40 = vld [vmem:[#allocation5 + $0xa08] sm:$0xff] }
 0x164   :  { %1691 = vmatpush.msra.mxu0 %v763_v1  ;;  %1665 = vmatpush.msrb.mxu2 %v441_v42  ;;  %v547_v1 = vld [vmem:[#allocation5 + $0xdf8] sm:$0xff]  ;;  %v113_v2 = vld [vmem:[#allocation5 + $0x68] sm:$0xff] }
 0x165   :  { %1683 = vmatpush.msrb.mxu1 %v567_v43  ;;  %1714 = vmatpush.msra.mxu3 %v854_v46  ;;  %v239_v42 = vld [vmem:[#allocation5 + $0x458] sm:$0xff]  ;;  %v540_v43 = vld [vmem:[#allocation5 + $0xdc0] sm:$0xff] }
 0x166   :  { %1692 = vmatpush.msra.mxu0 %v756_v45  ;;  %1730 = vmatpush.msra.mxu2 %v211_v3  ;;  %v106_v45 = vld [vmem:[#allocation5 + $0x30] sm:$0xff]  ;;  %v232_v46 = vld [vmem:[#allocation5 + $0x420] sm:$0xff]  ;;  %v407_v3 = vld [vmem:[#allocation5 + $0x998] sm:$0xff] }
 0x167   :  { %1684 = vmatpush.msrb.mxu1 %v560_v47  ;;  %1715 = vmatpush.msra.mxu3 %v847_v49  ;;  %v659_v47 = vld [vmem:[#allocation5 + $0x1178] sm:$0xff]  ;;  %v400_v49 = vld [vmem:[#allocation5 + $0x960] sm:$0xff] }
 0x168   :  { %1693 = vmatpush.msra.mxu0 %v749_v48  ;;  %1731 = vmatpush.msra.mxu2 %v204_v50  ;;  %v225_v48 = vld [vmem:[#allocation5 + $0x3e8] sm:$0xff]  ;;  %v526_v50 = vld [vmem:[#allocation5 + $0xd50] sm:$0xff] }
 0x169   :  { %1685 = vmatpush.msrb.mxu1 %v553_v51  ;;  %1716 = vmatpush.msra.mxu3 %v840_v53  ;;  %v4040_v51 = vpop.f32.mrf.mxu0  ;;  %v393_v53 = vld [vmem:[#allocation5 + $0x928] sm:$0xff] }
 0x16a   :  { %1694 = vmatpush.msra.mxu0 %v742_v52  ;;  %1606 = vmatmul.f32.vlgmr.msra.gmra.mxu1 %v4002_v14  ;;  %v714_v14 = vld [vmem:[#allocation5 + $0x1330] sm:$0xff] }
 0x16b   :  { %1732 = vmatpush.msra.mxu2 %v197_v26  ;;  %1750 = vmatpush.msra.mxu1 %v323_v54  ;;  %v218_v52 = vld [vmem:[#allocation5 + $0x3b0] sm:$0xff]  ;;  %v519_v26 = vld [vmem:[#allocation5 + $0xd18] sm:$0xff]  ;;  %v4042_v54 = vpop.f32.mrf.mxu2 }
 0x16c   :  { %1695 = vmatpush.msra.mxu0 %v735_v55  ;;  %1717 = vmatpush.msra.mxu3 %v833_v57  ;;  %v645_v55 = vld [vmem:[#allocation5 + $0x1108] sm:$0xff]  ;;  %v771_v57 = vld [vmem:[#allocation5 + $0x14f8] sm:$0xff] }
 0x16d   :  { %1733 = vmatpush.msra.mxu2 %v190_v58  ;;  %1751 = vmatpush.msra.mxu1 %v316_v59  ;;  %v386_v58 = vld [vmem:[#allocation5 + $0x8f0] sm:$0xff]  ;;  %v512_v59 = vld [vmem:[#allocation5 + $0xce0] sm:$0xff] }
 0x16e   :  { %1696 = vmatpush.msra.mxu0 %v728_v60  ;;  %1718 = vmatpush.msra.mxu3 %v826_v61  ;;  %v4044_v60 = vpop.f32.mrf.mxu3  ;;  %v638_v61 = vld [vmem:[#allocation5 + $0x10d0] sm:$0xff] }
 0x16f   :  { %1734 = vmatpush.msra.mxu2 %v183_v21  ;;  %1752 = vmatpush.msra.mxu1 %v309_v62  ;;  %v764_v21 = vld [vmem:[#allocation5 + $0x14c0] sm:$0xff]  ;;  %v379_v62 = vld [vmem:[#allocation5 + $0x8b8] sm:$0xff] }
 0x170   :  { %1697 = vmatpush.msra.mxu0 %v721_v63  ;;  %1719 = vmatpush.msra.mxu3 %v819_v0  ;;  %v505_v63 = vld [vmem:[#allocation5 + $0xca8] sm:$0xff]  ;;  %v631_v0 = vld [vmem:[#allocation5 + $0x1098] sm:$0xff] }
 0x171   :  { %1735 = vmatpush.msra.mxu2 %v176_v4  ;;  %1753 = vmatpush.msra.mxu1 %v302_v5  ;;  %v757_v4 = vld [vmem:[#allocation5 + $0x1488] sm:$0xff]  ;;  %v372_v5 = vld [vmem:[#allocation5 + $0x880] sm:$0xff] }
 0x172   :  { %1698 = vmatpush.msra.mxu0 %v714_v14  ;;  %1720 = vmatpush.msra.mxu3 %v812_v6  ;;  %v498_v14 = vld [vmem:[#allocation5 + $0xc70] sm:$0xff]  ;;  %v4046_v6 = vpop.f32.mrf.mxu1 }
 0x173   :  { %1736 = vmatpush.msra.mxu2 %v169_v7  ;;  %1754 = vmatpush.msra.mxu1 %v295_v8  ;;  %v624_v7 = vld [vmem:[#allocation5 + $0x1060] sm:$0xff]  ;;  %v750_v8 = vld [vmem:[#allocation5 + $0x1450] sm:$0xff] }
 0x174   :  { %1699 = vmatpush.msra.mxu0 %v707_v9  ;;  %1721 = vmatpush.msra.mxu3 %v805_v10  ;;  %v365_v9 = vld [vmem:[#allocation5 + $0x848] sm:$0xff]  ;;  %v491_v10 = vld [vmem:[#allocation5 + $0xc38] sm:$0xff] }
 0x175   :  { %1737 = vmatpush.msra.mxu2 %v162_v11  ;;  %1755 = vmatpush.msra.mxu1 %v288_v12  ;;  %v4048_v11 = vpop.f32.mrf.mxu0  ;;  %v617_v12 = vld [vmem:[#allocation5 + $0x1028] sm:$0xff] }
 0x176   :  { %1646 = vmatmul.f32.vlgmr.msrb.gmra.mxu3 %v4005_v27  ;;  %1700 = vmatpush.msra.mxu0 %v700_v13  ;;  %v679_v27 = vld [vmem:[#allocation5 + $0x1218] sm:$0xff] }
 0x177   :  { %1722 = vmatpush.msra.mxu3 %v798_v15  ;;  %1738 = vmatpush.msra.mxu2 %v155_v17  ;;  %v743_v13 = vld [vmem:[#allocation5 + $0x1418] sm:$0xff]  ;;  %v358_v15 = vld [vmem:[#allocation5 + $0x810] sm:$0xff]  ;;  %v484_v17 = vld [vmem:[#allocation5 + $0xc00] sm:$0xff] }
 0x178   :  { %1756 = vmatpush.msra.mxu1 %v281_v18  ;;  %1666 = vmatmul.f32.vlgmr.msrb.gmra.mxu2 %v4014_v41  ;;  %v435_v41 = vld [vmem:[#allocation5 + $0xa78] sm:$0xff]  ;;  %v4050_v18 = vpop.f32.mrf.mxu2 }
 0x179   :  { %1701 = vmatpush.msra.mxu0 %v693_v19  ;;  %1723 = vmatpush.msra.mxu3 %v791_v20  ;;  %v4052_v19 = vpop.f32.mrf.mxu3  ;;  %v610_v20 = vld [vmem:[#allocation5 + $0xff0] sm:$0xff] }
 0x17a   :  { %1739 = vmatpush.msra.mxu2 %v148_v22  ;;  %1757 = vmatpush.msra.mxu1 %v274_v23  ;;  %v736_v22 = vld [vmem:[#allocation5 + $0x13e0] sm:$0xff]  ;;  %v351_v23 = vld [vmem:[#allocation5 + $0x7d8] sm:$0xff] }
 0x17b   :  { %1626 = vmatmul.f32.vlgmr.msrb.gmra.mxu0 %v4011_v36  ;;  %1724 = vmatpush.msra.mxu3 %v784_v24  ;;  %v665_v36 = vld [vmem:[#allocation5 + $0x11a8] sm:$0xff] }
 0x17c   :  { %1702 = vmatpush.msra.mxu0 %v686_v25  ;;  %1740 = vmatpush.msra.mxu2 %v141_v16  ;;  %v477_v24 = vld [vmem:[#allocation5 + $0xbc8] sm:$0xff]  ;;  %v603_v25 = vld [vmem:[#allocation5 + $0xfb8] sm:$0xff] }
 0x17d   :  { %1758 = vmatpush.msra.mxu1 %v267_v28  ;;  %1725 = vmatpush.msra.mxu3 %v777_v29  ;;  %v729_v16 = vld [vmem:[#allocation5 + $0x13a8] sm:$0xff]  ;;  %v344_v28 = vld [vmem:[#allocation5 + $0x7a0] sm:$0xff]  ;;  %v470_v29 = vld [vmem:[#allocation5 + $0xb90] sm:$0xff] }
 0x17e   :  { %1703 = vmatpush.msra.mxu0 %v679_v27  ;;  %1741 = vmatpush.msra.mxu2 %v134_v30  ;;  %v596_v27 = vld [vmem:[#allocation5 + $0xf80] sm:$0xff]  ;;  %v722_v30 = vld [vmem:[#allocation5 + $0x1370] sm:$0xff] }
 0x17f   :  { %1759 = vmatpush.msra.mxu1 %v260_v31  ;;  %3691 = vmatmul.msk.f32.vlgmr.msra.gmra.mxu3 %vm886_vm0, %v4017_v44  ;;  %v414_v44 = vld [vmem:[#allocation5 + $0x9d0] sm:$0xff]  ;;  %v337_v31 = vld [vmem:[#allocation5 + $0x768] sm:$0xff] }
 0x180   :  { %1770 = vmatpush.msrb.mxu3 %v435_v41  ;;  %1704 = vmatpush.msra.mxu0 %v672_v32  ;;  %v463_v41 = vld [vmem:[#allocation5 + $0xb58] sm:$0xff]  ;;  %v4054_v32 = vpop.f32.mrf.mxu1 }
 0x181   :  { %1742 = vmatpush.msra.mxu2 %v127_v34  ;;  %1760 = vmatpush.msra.mxu1 %v253_v35  ;;  %v4056_v34 = vpop.f32.mrf.mxu0  ;;  %v589_v35 = vld [vmem:[#allocation5 + $0xf48] sm:$0xff] }
 0x182   :  { %1686 = vmatmul.f32.vlgmr.msrb.gmra.mxu1 %v4008_v33  ;;  %1771 = vmatpush.msrb.mxu3 %v428_v37  ;;  %v533_v33 = vld [vmem:[#allocation5 + $0xd88] sm:$0xff]  ;;  %v715_v37 = vld [vmem:[#allocation5 + $0x1338] sm:$0xff] }
 0x183   :  { %1705 = vmatpush.msra.mxu0 %v665_v36  ;;  %1743 = vmatpush.msra.mxu2 %v120_v38  ;;  %v330_v36 = vld [vmem:[#allocation5 + $0x730] sm:$0xff]  ;;  %v456_v38 = vld [vmem:[#allocation5 + $0xb20] sm:$0xff] }
 0x184   :  { %1761 = vmatpush.msra.mxu1 %v246_v39  ;;  %1706 = vmatmul.f32.vlgmr.msra.gmra.mxu0 %v4021_v56  ;;  %v652_v56 = vld [vmem:[#allocation5 + $0x1140] sm:$0xff]  ;;  %v4058_v39 = vpop.f32.mrf.mxu2 }
 0x185   :  { %1772 = vmatpush.msrb.mxu3 %v421_v40  ;;  %1790 = vmatpush.msrb.mxu0 %v547_v1  ;;  %v582_v40 = vld [vmem:[#allocation5 + $0xf10] sm:$0xff]  ;;  %v708_v1 = vld [vmem:[#allocation5 + $0x1300] sm:$0xff] }
 0x186   :  { %1744 = vmatpush.msra.mxu2 %v113_v2  ;;  %1762 = vmatpush.msra.mxu1 %v239_v42  ;;  %v4060_v2 = vld [vmem:[#allocation8] sm:$0x7f]  ;;  %v869_v42 = vld [vmem:[#allocation5 + $0x1808] sm:$0xff] }
 0x187   :  { %1773 = vmatpush.msrb.mxu3 %v414_v44  ;;  %1791 = vmatpush.msrb.mxu0 %v540_v43  ;;  %v449_v44 = vld [vmem:[#allocation5 + $0xae8] sm:$0xff]  ;;  %v4062_v43 = vpop.f32.mrf.mxu3 }
 0x188   :  { %1745 = vmatpush.msra.mxu2 %v106_v45  ;;  %1763 = vmatpush.msra.mxu1 %v232_v46  ;;  %v575_v45 = vld [vmem:[#allocation5 + $0xed8] sm:$0xff]  ;;  %v701_v46 = vld [vmem:[#allocation5 + $0x12c8] sm:$0xff] }
 0x189   :  { %1774 = vmatpush.msrb.mxu3 %v407_v3  ;;  %1792 = vmatpush.msrb.mxu0 %v533_v33  ;;  %v862_v3 = vld [vmem:[#allocation5 + $0x17d0] sm:$0xff] }
 0x18a   :  { %1810 = vmatpush.msrb.mxu2 %v659_v47  ;;  %1764 = vmatpush.msra.mxu1 %v225_v48  ;;  %v442_v33 = vld [vmem:[#allocation5 + $0xab0] sm:$0xff]  ;;  %v872_v47 = vperm.slane %v4060_v2, 0  ;;  %v568_v48 = vld [vmem:[#allocation5 + $0xea0] sm:$0xff] }
 0x18b   :  { %1775 = vmatpush.msrb.mxu3 %v400_v49  ;;  %1793 = vmatpush.msrb.mxu0 %v526_v50  ;;  %v694_v49 = vld [vmem:[#allocation5 + $0x1290] sm:$0xff]  ;;  %v855_v50 = vld [vmem:[#allocation5 + $0x1798] sm:$0xff] }
 0x18c   :  { %1811 = vmatpush.msrb.mxu2 %v652_v56  ;;  %1765 = vmatpush.msra.mxu1 %v218_v52  ;;  %v1982_v56 = vld [vmem:[#allocation7 + $0x348] sm:$0xff]  ;;  %v4065_v52 = vpop.f32.mrf.mxu1 }
 0x18d   :  { %1776 = vmatpush.msrb.mxu3 %v393_v53  ;;  %1794 = vmatpush.msrb.mxu0 %v519_v26  ;;  %v4067_v53 = vpop.f32.mrf.mxu0  ;;  %v561_v26 = vld [vmem:[#allocation5 + $0xe68] sm:$0xff] }
 0x18e   :  { %1812 = vmatpush.msrb.mxu2 %v645_v55  ;;  %1830 = vmatpush.msrb.mxu1 %v771_v57  ;;  %v687_v55 = vld [vmem:[#allocation5 + $0x1258] sm:$0xff]  ;;  %v848_v57 = vld [vmem:[#allocation5 + $0x1760] sm:$0xff] }
 0x18f   :  { %1777 = vmatpush.msrb.mxu3 %v386_v58  ;;  %1795 = vmatpush.msrb.mxu0 %v512_v59  ;;  %v1975_v58 = vld [vmem:[#allocation7 + $0x310] sm:$0xff]  ;;  %v908_v59 = vadd.f32 %v4040_v51, %v872_v47  ;;  %v673_v51 = vld [vmem:[#allocation5 + $0x11e8] sm:$0xff] }
 0x190   :  { %1813 = vmatpush.msrb.mxu2 %v638_v61  ;;  %1831 = vmatpush.msrb.mxu1 %v764_v21  ;;  %v4070_v61 = vpop.f32.mrf.mxu2  ;;  %v554_v21 = vld [vmem:[#allocation5 + $0xe30] sm:$0xff] }
 0x191   :  { %1778 = vmatpush.msrb.mxu3 %v379_v62  ;;  %1796 = vmatpush.msrb.mxu0 %v505_v63  ;;  %v680_v62 = vld [vmem:[#allocation5 + $0x1220] sm:$0xff]  ;;  %v841_v63 = vld [vmem:[#allocation5 + $0x1728] sm:$0xff] }
 0x192   :  { %1814 = vmatpush.msrb.mxu2 %v631_v0  ;;  %1832 = vmatpush.msrb.mxu1 %v757_v4  ;;  %v4072_v0 = vpop.f32.mrf.mxu3  ;;  %v1968_v4 = vld [vmem:[#allocation7 + $0x2d8] sm:$0xff] }
 0x193   :  { %1779 = vmatpush.msrb.mxu3 %v372_v5  ;;  %1797 = vmatpush.msrb.mxu0 %v498_v14  ;;  %v2094_v5 = vld [vmem:[#allocation7 + $0x6c8] sm:$0xff]  ;;  %v873_v14 = vperm.slane %v4060_v2, 1 }
 0x194   :  { %1815 = vmatpush.msrb.mxu2 %v624_v7  ;;  %1833 = vmatpush.msrb.mxu1 %v750_v8  ;;  %v834_v7 = vld [vmem:[#allocation5 + $0x16f0] sm:$0xff]  ;;  %v928_v8 = vadd.f32 %v4046_v6, %v908_v59  ;;  %v2080_v6 = vld [vmem:[#allocation7 + $0x658] sm:$0xff] }
 0x195   :  { %1780 = vmatpush.msrb.mxu3 %v365_v9  ;;  %1798 = vmatpush.msrb.mxu0 %v491_v10  ;;  %v3743_v9 = vld [vmem:[#allocation2] sm:$0xff]  ;;  %v1961_v10 = vld [vmem:[#allocation7 + $0x2a0] sm:$0xff] }
 0x196   :  { %1816 = vmatpush.msrb.mxu2 %v617_v12  ;;  %1834 = vmatpush.msrb.mxu1 %v743_v13  ;;  %v2087_v12 = vld [vmem:[#allocation7 + $0x690] sm:$0xff]  ;;  %v666_v13 = vld [vmem:[#allocation5 + $0x11b0] sm:$0xff] }
 0x197   :  { %1781 = vmatpush.msrb.mxu3 %v358_v15  ;;  %1799 = vmatpush.msrb.mxu0 %v484_v17  ;;  %v827_v15 = vld [vmem:[#allocation5 + $0x16b8] sm:$0xff]  ;;  %v1187_v17 = vpop.f32.mrf.mxu1  ;;  %v2045_v59 = vld [vmem:[#allocation7 + $0x540] sm:$0xff] }
 0x198   :  { %1817 = vmatpush.msrb.mxu2 %v610_v20  ;;  %1835 = vmatpush.msrb.mxu1 %v736_v22  ;;  %v4076_v20 = vpop.f32.mrf.mxu0  ;;  %v1954_v22 = vld [vmem:[#allocation7 + $0x268] sm:$0xff] }
 0x199   :  { %1782 = vmatpush.msrb.mxu3 %v351_v23  ;;  %1800 = vmatpush.msrb.mxu0 %v477_v24  ;;  %v1048_v23 = vadd.f32 %v4052_v19, %v873_v14  ;;  %v874_v24 = vperm.slane %v4060_v2, 2  ;;  %v813_v19 = vld [vmem:[#allocation5 + $0x1648] sm:$0xff]  ;;  %v2038_v14 = vld [vmem:[#allocation7 + $0x508] sm:$0xff] }
 0x19a   :  { %1818 = vmatpush.msrb.mxu2 %v603_v25  ;;  %1836 = vmatpush.msrb.mxu1 %v729_v16  ;;  %v2206_v25 = vld [vmem:[#allocation7 + $0xa48] sm:$0xff]  ;;  %v948_v16 = vadd.f32 %v4042_v54, %v928_v8  ;;  %v1905_v8 = vld [vmem:[#allocation7 + $0xe0] sm:$0xff] }
 0x19b   :  { %1783 = vmatpush.msrb.mxu3 %v344_v28  ;;  %1801 = vmatpush.msrb.mxu0 %v470_v29  ;;  %v4081_v28 = vpop.f32.mrf.mxu2  ;;  %v820_v29 = vld [vmem:[#allocation5 + $0x1680] sm:$0xff]  ;;  %v2066_v54 = vld [vmem:[#allocation7 + $0x5e8] sm:$0xff] }
 0x19c   :  { %1819 = vmatpush.msrb.mxu2 %v596_v27  ;;  %1837 = vmatpush.msrb.mxu1 %v722_v30  ;;  %v1947_v27 = vld [vmem:[#allocation7 + $0x230] sm:$0xff]  ;;  %v3744_v30 = vld [vmem:[#allocation2 + $0x8] sm:$0xff] }
 0x19d   :  { %1784 = vmatpush.msrb.mxu3 %v337_v31  ;;  %1802 = vmatpush.msrb.mxu0 %v463_v41  ;;  %v2073_v31 = vld [vmem:[#allocation7 + $0x620] sm:$0xff]  ;;  %v2199_v41 = vld [vmem:[#allocation7 + $0xa10] sm:$0xff] }
 0x19e   :  { %1820 = vmatpush.msrb.mxu2 %v589_v35  ;;  %1838 = vmatpush.msrb.mxu1 %v715_v37  ;;  %v1940_v35 = vld [vmem:[#allocation7 + $0x1f8] sm:$0xff]  ;;  %v1068_v37 = vadd.f32 %v4058_v39, %v1048_v23  ;;  %v1926_v39 = vld [vmem:[#allocation7 + $0x188] sm:$0xff] }
 0x19f   :  { %1785 = vmatpush.msrb.mxu3 %v330_v36  ;;  %1803 = vmatpush.msrb.mxu0 %v456_v38  ;;  %v1188_v36 = vadd.f32 %v1187_v17, %v874_v24  ;;  %v2192_v38 = vld [vmem:[#allocation7 + $0x9d8] sm:$0xff]  ;;  %v1898_v23 = vld [vmem:[#allocation7 + $0xa8] sm:$0xff] }
 0x1a0   :  { %1821 = vmatpush.msrb.mxu2 %v582_v40  ;;  %1839 = vmatpush.msrb.mxu1 %v708_v1  ;;  %v968_v40 = vadd.f32 %v4044_v60, %v948_v16  ;;  %v4085_v1 = vpop.f32.mrf.mxu3  ;;  %v799_v60 = vld [vmem:[#allocation5 + $0x15d8] sm:$0xff] }
 0x1a1   :  { %1852 = vmatpush.msra.mxu3 %v869_v42  ;;  %1804 = vmatpush.msrb.mxu0 %v449_v44  ;;  %v806_v42 = vld [vmem:[#allocation5 + $0x1610] sm:$0xff]  ;;  %v1208_v47 = vadd.f32 %v4072_v0, %v1188_v36  ;;  %v876_v36 = vperm.slane %v4060_v2, 4 }
 0x1a2   :  { %1822 = vmatpush.msrb.mxu2 %v575_v45  ;;  %1840 = vmatpush.msrb.mxu1 %v701_v46  ;;  %v1933_v44 = vld [vmem:[#allocation7 + $0x1c0] sm:$0xff]  ;;  %v2059_v45 = vld [vmem:[#allocation7 + $0x5b0] sm:$0xff] }
 0x1a3   :  { %1853 = vmatpush.msra.mxu3 %v862_v3  ;;  %1805 = vmatpush.msrb.mxu0 %v442_v33  ;;  %v2185_v46 = vld [vmem:[#allocation7 + $0x9a0] sm:$0xff]  ;;  %v4087_v3 = vpop.f32.mrf.mxu0  ;;  %v1088_v33 = vadd.f32 %v4056_v34, %v1068_v37  ;;  %v2171_v34 = vld [vmem:[#allocation7 + $0x930] sm:$0xff]  ;;  %v2010_v37 = vld [vmem:[#allocation7 + $0x428] sm:$0xff] }
 0x1a4   :  { %1823 = vmatpush.msrb.mxu2 %v568_v48  ;;  %1841 = vmatpush.msrb.mxu1 %v694_v49  ;;  %v2052_v48 = vld [vmem:[#allocation7 + $0x578] sm:$0xff]  ;;  %v988_v49 = vadd.f32 %v4048_v11, %v968_v40  ;;  %v2297_v40 = vld [vmem:[#allocation7 + $0xd20] sm:$0xff] }
 0x1a5   :  { %1854 = vmatpush.msra.mxu3 %v855_v50  ;;  %2666 = vmatpush.msra.mxu0 %v1982_v56  ;;  %v1267_v50 = vpop.f32.mrf.mxu1  ;;  %v1327_v56 = vpop.f32.mrf.mxu2  ;;  %v785_v11 = vld [vmem:[#allocation5 + $0x1568] sm:$0xff] }
 0x1a6   :  { %1824 = vmatpush.msrb.mxu2 %v561_v26  ;;  %1842 = vmatpush.msrb.mxu1 %v687_v55  ;;  %v2178_v26 = vld [vmem:[#allocation7 + $0x968] sm:$0xff]  ;;  %v1919_v55 = vld [vmem:[#allocation7 + $0x150] sm:$0xff]  ;;  %v1008_v0 = vadd.f32 %v4054_v32, %v988_v49 }
 0x1a7   :  { %1855 = vmatpush.msra.mxu3 %v848_v57  ;;  %2667 = vmatpush.msra.mxu0 %v1975_v58  ;;  %v3745_v57 = vld [vmem:[#allocation2 + $0x10] sm:$0xff]  ;;  %v792_v58 = vld [vmem:[#allocation5 + $0x15a0] sm:$0xff] }
 0x1a8   :  { %1825 = vmatpush.msrb.mxu2 %v554_v21  ;;  %1843 = vmatpush.msrb.mxu1 %v680_v62  ;;  %v1108_v21 = vadd.f32 %v4065_v52, %v1088_v33  ;;  %v1228_v62 = vadd.f32 %v4076_v20, %v1208_v47  ;;  %v778_v52 = vld [vmem:[#allocation5 + $0x1530] sm:$0xff] }
 0x1a9   :  { %1746 = vmatmul.f32.vlgmr.msra.gmra.mxu2 %v3743_v9  ;;  %1856 = vmatpush.msra.mxu3 %v841_v63  ;;  %v1912_v63 = vld [vmem:[#allocation7 + $0x118] sm:$0xff]  ;;  %v2129_v33 = vld [vmem:[#allocation7 + $0x7e0] sm:$0xff] }
 0x1aa   :  { %2668 = vmatpush.msra.mxu0 %v1968_v4  ;;  %2686 = vmatpush.msra.mxu2 %v2094_v5  ;;  %v875_v4 = vperm.slane %v4060_v2, 3  ;;  %v4096_v5 = vpop.f32.mrf.mxu3  ;;  %v1128_v32 = vadd.f32 %v4062_v43, %v1108_v21  ;;  %v3747_v43 = vld [vmem:[#allocation2 + $0x18] sm:$0xff]  ;;  %v2276_v21 = vld [vmem:[#allocation7 + $0xc78] sm:$0xff] }
 0x1ab   :  { %1844 = vmatpush.msrb.mxu1 %v673_v51  ;;  %1857 = vmatpush.msra.mxu3 %v834_v7  ;;  %v2164_v51 = vld [vmem:[#allocation7 + $0x8f8] sm:$0xff]  ;;  %v4098_v9 = vpop.f32.mrf.mxu0 }
 0x1ac   :  { %2669 = vmatpush.msra.mxu0 %v1961_v10  ;;  %2687 = vmatpush.msra.mxu2 %v2087_v12  ;;  %v3746_v7 = vld [vmem:[#allocation2 + $0x20] sm:$0xff]  ;;  %v2031_v10 = vld [vmem:[#allocation7 + $0x4d0] sm:$0xff]  ;;  %v2157_v12 = vld [vmem:[#allocation7 + $0x8c0] sm:$0xff]  ;;  %v1328_v17 = vadd.f32 %v1327_v56, %v875_v4  ;;  %v1148_v24 = vadd.f32 %v4070_v61, %v1128_v32 }
 0x1ad   :  { %1845 = vmatpush.msrb.mxu1 %v666_v13  ;;  %1858 = vmatpush.msra.mxu3 %v827_v15  ;;  %v1248_v13 = vadd.f32 %v4081_v28, %v1228_v62  ;;  %v1028_v15 = vadd.f32 %v4050_v18, %v1008_v0  ;;  %v1347_v20 = vpop.f32.mrf.mxu1  ;;  %v4104_v16 = vpop.f32.mrf.mxu2  ;;  %v3748_v28 = vld [vmem:[#allocation2 + $0x30] sm:$0xff]  ;;  %v2311_v18 = vld [vmem:[#allocation7 + $0xd90] sm:$0xff]  ;;  %v1996_v56 = vld [vmem:[#allocation7 + $0x3b8] sm:$0xff] }
 0x1ae   :  { %1766 = vmatmul.f32.vlgmr.msra.gmra.mxu1 %v3744_v30  ;;  %2670 = vmatpush.msra.mxu0 %v1954_v22  ;;  %v2318_v22 = vld [vmem:[#allocation7 + $0xdc8] sm:$0xff]  ;;  %v2017_v30 = vld [vmem:[#allocation7 + $0x460] sm:$0xff]  ;;  %v1348_v61 = vadd.f32 %v1347_v20, %v1328_v17  ;;  %v2535_v32 = vld [vmem:[#allocation7 + $0x1490] sm:$0xff] }
 0x1af   :  { %2688 = vmatpush.msra.mxu2 %v2080_v6  ;;  %2706 = vmatpush.msra.mxu1 %v2206_v25  ;;  %v2024_v6 = vld [vmem:[#allocation7 + $0x498] sm:$0xff]  ;;  %v2150_v25 = vld [vmem:[#allocation7 + $0x888] sm:$0xff]  ;;  %3708 = vtanh.f32 %v1028_v15  ;;  %v2255_v15 = vld [vmem:[#allocation7 + $0xbd0] sm:$0xff] }
 0x1b0   :  { %1859 = vmatpush.msra.mxu3 %v820_v29  ;;  %2671 = vmatpush.msra.mxu0 %v1947_v27  ;;  %v1891_v29 = vld [vmem:[#allocation7 + $0x70] sm:$0xff]  ;;  %v1268_v27 = vadd.f32 %v1267_v50, %v1248_v13 }
 0x1b1   :  { %2689 = vmatpush.msra.mxu2 %v2073_v31  ;;  %2707 = vmatpush.msra.mxu1 %v2199_v41  ;;  %v2143_v31 = vld [vmem:[#allocation7 + $0x850] sm:$0xff]  ;;  %v2304_v41 = vld [vmem:[#allocation7 + $0xd58] sm:$0xff] }
 0x1b2   :  { %1860 = vmatpush.msra.mxu3 %v813_v19  ;;  %2672 = vmatpush.msra.mxu0 %v1940_v35  ;;  %v1168_v19 = vadd.f32 %v4067_v53, %v1148_v24  ;;  %v1884_v35 = vld [vmem:[#allocation7 + $0x38] sm:$0xff]  ;;  %v2003_v53 = vld [vmem:[#allocation7 + $0x3f0] sm:$0xff] }
 0x1b3   :  { %2690 = vmatpush.msra.mxu2 %v2066_v54  ;;  %2708 = vmatpush.msra.mxu1 %v2192_v38  ;;  %v4109_v54 = vpop.f32.mrf.mxu3  ;;  %v2136_v38 = vld [vmem:[#allocation7 + $0x818] sm:$0xff]  ;;  %v2395_v20 = vld [vmem:[#allocation7 + $0x1030] sm:$0xff] }
 0x1b4   :  { %1861 = vmatpush.msra.mxu3 %v806_v42  ;;  %2673 = vmatpush.msra.mxu0 %v1933_v44  ;;  %v1288_v44 = vadd.f32 %v4085_v1, %v1268_v27  ;;  %3710 = vtanh.f32 %v1168_v19  ;;  %v2248_v24 = vld [vmem:[#allocation7 + $0xb98] sm:$0xff]  ;;  %v2227_v19 = vld [vmem:[#allocation7 + $0xaf0] sm:$0xff] }
 0x1b5   :  { %2691 = vmatpush.msra.mxu2 %v2059_v45  ;;  %2709 = vmatpush.msra.mxu1 %v2185_v46  ;;  %v3749_v45 = vld [vmem:[#allocation2 + $0x28] sm:$0xff]  ;;  %v4114_v50 = vpop.eup %3708  ;;  %v1427_v1 = vpop.f32.mrf.mxu1 }
 0x1b6   :  { %1786 = vmatmul.f32.vlgmr.msrb.gmra.mxu3 %v3745_v57  ;;  %2674 = vmatpush.msra.mxu0 %v1926_v39  ;;  %v1877_v46 = vld [vmem:[#allocation7] sm:$0xff]  ;;  %v1368_v39 = vadd.f32 %v4096_v5, %v1348_v61  ;;  %v1308_v47 = vadd.f32 %v4087_v3, %v1288_v44  ;;  %v2283_v57 = vld [vmem:[#allocation7 + $0xcb0] sm:$0xff]  ;;  %v2374_v61 = vld [vmem:[#allocation7 + $0xf88] sm:$0xff] }
 0x1b7   :  { %1862 = vmatpush.msra.mxu3 %v799_v60  ;;  %2692 = vmatpush.msra.mxu2 %v2052_v48  ;;  %v2290_v60 = vld [vmem:[#allocation7 + $0xce8] sm:$0xff]  ;;  %v2269_v5 = vld [vmem:[#allocation7 + $0xc40] sm:$0xff] }
 0x1b8   :  { %2710 = vmatpush.msra.mxu1 %v2178_v26  ;;  %2675 = vmatpush.msra.mxu0 %v1919_v55  ;;  %v2430_v48 = vld [vmem:[#allocation7 + $0x1148] sm:$0xff]  ;;  %v1388_v3 = vadd.f32 %v4098_v9, %v1368_v39  ;;  %3712 = vtanh.f32 %v1308_v47  ;;  %v2213_v44 = vld [vmem:[#allocation7 + $0xa80] sm:$0xff] }
 0x1b9   :  { %1863 = vmatpush.msra.mxu3 %v792_v58  ;;  %2693 = vmatpush.msra.mxu2 %v2045_v59  ;;  %v2122_v26 = vld [vmem:[#allocation7 + $0x7a8] sm:$0xff]  ;;  %v2423_v58 = vld [vmem:[#allocation7 + $0x1110] sm:$0xff]  ;;  %v1989_v59 = vld [vmem:[#allocation7 + $0x380] sm:$0xff] }
 0x1ba   :  { %2711 = vmatpush.msra.mxu1 %v2171_v34  ;;  %1826 = vmatmul.f32.vlgmr.msrb.gmra.mxu2 %v3746_v7  ;;  %v2115_v34 = vld [vmem:[#allocation7 + $0x770] sm:$0xff]  ;;  %v4118_v4 = vpop.eup %3710  ;;  %v2409_v7 = vld [vmem:[#allocation7 + $0x10a0] sm:$0xff]  ;;  %v2262_v9 = vld [vmem:[#allocation7 + $0xc08] sm:$0xff] }
 0x1bb   :  { %1864 = vmatpush.msra.mxu3 %v785_v11  ;;  %2676 = vmatpush.msra.mxu0 %v1912_v63  ;;  %v1467_v42 = vpop.f32.mrf.mxu0  ;;  %v2416_v11 = vld [vmem:[#allocation7 + $0x10d8] sm:$0xff]  ;;  %v2486_v39 = vld [vmem:[#allocation7 + $0x1308] sm:$0xff] }
 0x1bc   :  { %2694 = vmatpush.msra.mxu2 %v2038_v14  ;;  %2712 = vmatpush.msra.mxu1 %v2164_v51  ;;  %v1468_v49 = vadd.f32 %v1467_v42, %v876_v36  ;;  %v2108_v63 = vld [vmem:[#allocation7 + $0x738] sm:$0xff]  ;;  %v2542_v14 = vld [vmem:[#allocation7 + $0x14c8] sm:$0xff]  ;;  %v1408_v51 = vadd.f32 %v4104_v16, %v1388_v3  ;;  %v2521_v16 = vld [vmem:[#allocation7 + $0x1420] sm:$0xff] }
 0x1bd   :  { %1865 = vmatpush.msra.mxu3 %v778_v52  ;;  %2677 = vmatpush.msra.mxu0 %v1905_v8  ;;  %v2101_v52 = vld [vmem:[#allocation7 + $0x700] sm:$0xff]  ;;  %v2346_v47 = vld [vmem:[#allocation7 + $0xea8] sm:$0xff]  ;;  %v1955_v3 = vld [vmem:[#allocation7 + $0x270] sm:$0xff] }
 0x1be   :  { %2695 = vmatpush.msra.mxu2 %v2031_v10  ;;  %2713 = vmatpush.msra.mxu1 %v2157_v12  ;;  %v2402_v10 = vld [vmem:[#allocation7 + $0x1068] sm:$0xff]  ;;  %v4122_v13 = vpop.eup %3712  ;;  %v1428_v17 = vadd.f32 %v1427_v1, %v1408_v51  ;;  %v2493_v42 = vld [vmem:[#allocation7 + $0x1340] sm:$0xff] }
 0x1bf   :  { %1806 = vmatmul.f32.vlgmr.msrb.gmra.mxu0 %v3747_v43  ;;  %3692 = vmatmul.msk.f32.vlgmr.msra.gmra.mxu3 %vm886_vm0, %v3748_v28  ;;  %v1487_v55 = vpop.f32.mrf.mxu2  ;;  %v2241_v43 = vld [vmem:[#allocation7 + $0xb60] sm:$0xff]  ;;  %v1934_v51 = vld [vmem:[#allocation7 + $0x1c8] sm:$0xff] }
 0x1c0   :  { %2726 = vmatpush.msrb.mxu3 %v2318_v22  ;;  %2678 = vmatpush.msra.mxu0 %v1898_v23  ;;  %v1488_v62 = vadd.f32 %v1487_v55, %v1468_v49  ;;  %v2528_v22 = vld [vmem:[#allocation7 + $0x1458] sm:$0xff]  ;;  %v1448_v28 = vadd.f32 %v4109_v54, %v1428_v17  ;;  %v2339_v49 = vld [vmem:[#allocation7 + $0xe70] sm:$0xff]  ;;  %v1969_v1 = vld [vmem:[#allocation7 + $0x2e0] sm:$0xff]  ;;  %v877_v17 = vperm.slane %v4060_v2, 5 }
 0x1c1   :  { %2696 = vmatpush.msra.mxu2 %v2024_v6  ;;  %2714 = vmatpush.msra.mxu1 %v2150_v25  ;;  %v2388_v25 = vld [vmem:[#allocation7 + $0xff8] sm:$0xff]  ;;  %v1962_v55 = vld [vmem:[#allocation7 + $0x2a8] sm:$0xff]  ;;  %v2039_v2 = vld [vmem:[#allocation7 + $0x510] sm:$0xff] }
 0x1c2   :  { %2727 = vmatpush.msrb.mxu3 %v2311_v18  ;;  %2679 = vmatpush.msra.mxu0 %v1891_v29  ;;  %v1507_v0 = vpop.f32.mrf.mxu3  ;;  %v2381_v18 = vld [vmem:[#allocation7 + $0xfc0] sm:$0xff]  ;;  %v2514_v29 = vld [vmem:[#allocation7 + $0x13e8] sm:$0xff]  ;;  %3714 = vtanh.f32 %v1448_v28  ;;  %v2220_v54 = vld [vmem:[#allocation7 + $0xab8] sm:$0xff] }
 0x1c3   :  { %2697 = vmatpush.msra.mxu2 %v2017_v30  ;;  %2715 = vmatpush.msra.mxu1 %v2143_v31  ;;  %v1508_v8 = vadd.f32 %v1507_v0, %v1488_v62  ;;  %v2234_v30 = vld [vmem:[#allocation7 + $0xb28] sm:$0xff]  ;;  %v1948_v62 = vld [vmem:[#allocation7 + $0x238] sm:$0xff]  ;;  %v1941_v0 = vld [vmem:[#allocation7 + $0x200] sm:$0xff] }
 0x1c4   :  { %1846 = vmatmul.f32.vlgmr.msrb.gmra.mxu1 %v3749_v45  ;;  %2728 = vmatpush.msrb.mxu3 %v2304_v41  ;;  %v2507_v41 = vld [vmem:[#allocation7 + $0x13b0] sm:$0xff]  ;;  %v2353_v45 = vld [vmem:[#allocation7 + $0xee0] sm:$0xff] }
 0x1c5   :  { %2680 = vmatpush.msra.mxu0 %v1884_v35  ;;  %2698 = vmatpush.msra.mxu2 %v2010_v37  ;;  %v1527_v12 = vpop.f32.mrf.mxu1  ;;  %v2367_v35 = vld [vmem:[#allocation7 + $0xf50] sm:$0xff]  ;;  %v2500_v37 = vld [vmem:[#allocation7 + $0x1378] sm:$0xff] }
 0x1c6   :  { %2716 = vmatpush.msra.mxu1 %v2136_v38  ;;  %2729 = vmatpush.msrb.mxu3 %v2297_v40  ;;  %v1528_v23 = vadd.f32 %v1527_v12, %v1508_v8  ;;  %v2360_v40 = vld [vmem:[#allocation7 + $0xf18] sm:$0xff]  ;;  %v1927_v8 = vld [vmem:[#allocation7 + $0x190] sm:$0xff] }
 0x1c7   :  { %2681 = vmatpush.msra.mxu0 %v1877_v46  ;;  %2699 = vmatpush.msra.mxu2 %v2003_v53  ;;  %v1983_v53 = vld [vmem:[#allocation7 + $0x350] sm:$0xff]  ;;  %v1920_v12 = vld [vmem:[#allocation7 + $0x158] sm:$0xff] }
 0x1c8   :  { %2717 = vmatpush.msra.mxu1 %v2129_v33  ;;  %2682 = vmatmul.f32.vlgmr.msra.gmra.mxu0 %v4114_v50  ;;  %v1547_v6 = vpop.f32.mrf.mxu0  ;;  %v1567_v31 = vpop.f32.mrf.mxu2  ;;  %v1899_v28 = vld [vmem:[#allocation7 + $0xb0] sm:$0xff] }
 0x1c9   :  { %2730 = vmatpush.msrb.mxu3 %v2290_v60  ;;  %2746 = vmatpush.msrb.mxu0 %v2430_v48  ;;  %v1548_v27 = vadd.f32 %v1547_v6, %v1528_v23  ;;  %v4126_v33 = vpop.eup %3714  ;;  %v1976_v60 = vld [vmem:[#allocation7 + $0x318] sm:$0xff]  ;;  %v2479_v48 = vld [vmem:[#allocation7 + $0x12d0] sm:$0xff]  ;;  %v1906_v6 = vld [vmem:[#allocation7 + $0xe8] sm:$0xff] }
 0x1ca   :  { %2700 = vmatpush.msra.mxu2 %v1996_v56  ;;  %2718 = vmatpush.msra.mxu1 %v2122_v26  ;;  %v2472_v56 = vld [vmem:[#allocation7 + $0x1298] sm:$0xff] }
 0x1cb   :  { %2731 = vmatpush.msrb.mxu3 %v2283_v57  ;;  %2747 = vmatpush.msrb.mxu0 %v2423_v58  ;;  %v1568_v36 = vadd.f32 %v1567_v31, %v1548_v27  ;;  %v1587_v38 = vpop.f32.mrf.mxu3  ;;  %v2332_v26 = vld [vmem:[#allocation7 + $0xe38] sm:$0xff]  ;;  %v2465_v57 = vld [vmem:[#allocation7 + $0x1260] sm:$0xff] }
 0x1cc   :  { %2701 = vmatpush.msra.mxu2 %v1989_v59  ;;  %2719 = vmatpush.msra.mxu1 %v2115_v34  ;;  %v2325_v58 = vld [vmem:[#allocation7 + $0xe00] sm:$0xff]  ;;  %v2095_v59 = vld [vmem:[#allocation7 + $0x6d0] sm:$0xff]  ;;  %v2458_v34 = vld [vmem:[#allocation7 + $0x1228] sm:$0xff] }
 0x1cd   :  { %2702 = vmatmul.f32.vlgmr.msra.gmra.mxu2 %v4118_v4  ;;  %2732 = vmatpush.msrb.mxu3 %v2276_v21  ;;  %v1588_v46 = vadd.f32 %v1587_v38, %v1568_v36  ;;  %v1892_v27 = vld [vmem:[#allocation7 + $0x78] sm:$0xff]  ;;  %v2277_v36 = vld [vmem:[#allocation7 + $0xc80] sm:$0xff] }
 0x1ce   :  { %2748 = vmatpush.msrb.mxu0 %v2416_v11  ;;  %2720 = vmatpush.msra.mxu1 %v2108_v63  ;;  %v2088_v11 = vld [vmem:[#allocation7 + $0x698] sm:$0xff]  ;;  %v2451_v63 = vld [vmem:[#allocation7 + $0x11f0] sm:$0xff]  ;;  %v2025_v38 = vld [vmem:[#allocation7 + $0x4a0] sm:$0xff] }
 0x1cf   :  { %2733 = vmatpush.msrb.mxu3 %v2269_v5  ;;  %2766 = vmatpush.msrb.mxu2 %v2542_v14  ;;  %3716 = vtanh.f32 %v1588_v46  ;;  %v2081_v5 = vld [vmem:[#allocation7 + $0x660] sm:$0xff]  ;;  %v2444_v14 = vld [vmem:[#allocation7 + $0x11b8] sm:$0xff]  ;;  %v2619_v46 = vld [vmem:[#allocation7 + $0x1730] sm:$0xff] }
 0x1d0   :  { %2749 = vmatpush.msrb.mxu0 %v2409_v7  ;;  %2721 = vmatpush.msra.mxu1 %v2101_v52  ;;  %v2074_v7 = vld [vmem:[#allocation7 + $0x628] sm:$0xff]  ;;  %v2437_v52 = vld [vmem:[#allocation7 + $0x1180] sm:$0xff] }
 0x1d1   :  { %2722 = vmatmul.f32.vlgmr.msra.gmra.mxu1 %v4122_v13  ;;  %2734 = vmatpush.msrb.mxu3 %v2262_v9  ;;  %v2319_v9 = vld [vmem:[#allocation7 + $0xdd0] sm:$0xff] }
 0x1d2   :  { %2750 = vmatpush.msrb.mxu0 %v2402_v10  ;;  %2767 = vmatpush.msrb.mxu2 %v2535_v32  ;;  %v2067_v10 = vld [vmem:[#allocation7 + $0x5f0] sm:$0xff]  ;;  %v2312_v32 = vld [vmem:[#allocation7 + $0xd98] sm:$0xff] }
 0x1d3   :  { %2735 = vmatpush.msrb.mxu3 %v2255_v15  ;;  %v2060_v15 = vld [vmem:[#allocation7 + $0x5b8] sm:$0xff] }
 0x1d4   :  { %2751 = vmatpush.msrb.mxu0 %v2395_v20  ;;  %2768 = vmatpush.msrb.mxu2 %v2528_v22  ;;  %v1913_v20 = vld [vmem:[#allocation7 + $0x120] sm:$0xff] }
 0x1d5   :  { %2736 = vmatpush.msrb.mxu3 %v2248_v24  ;;  %v4129_v21 = vpop.eup %3716  ;;  %v2305_v22 = vld [vmem:[#allocation7 + $0xd60] sm:$0xff] }
 0x1d6   :  { %2752 = vmatpush.msrb.mxu0 %v2388_v25  ;;  %2769 = vmatpush.msrb.mxu2 %v2521_v16  ;;  %v2053_v24 = vld [vmem:[#allocation7 + $0x580] sm:$0xff]  ;;  %v2298_v25 = vld [vmem:[#allocation7 + $0xd28] sm:$0xff] }
 0x1d7   :  { %2737 = vmatpush.msrb.mxu3 %v2241_v43  ;;  %v2046_v16 = vld [vmem:[#allocation7 + $0x548] sm:$0xff] }
 0x1d8   :  { %2753 = vmatpush.msrb.mxu0 %v2381_v18  ;;  %2770 = vmatpush.msrb.mxu2 %v2514_v29  ;;  %v2291_v18 = vld [vmem:[#allocation7 + $0xcf0] sm:$0xff]  ;;  %v2640_v29 = vld [vmem:[#allocation7 + $0x17d8] sm:$0xff] }
 0x1d9   :  { %2738 = vmatpush.msrb.mxu3 %v2234_v30  ;;  %v2284_v30 = vld [vmem:[#allocation7 + $0xcb8] sm:$0xff]  ;;  %2788 = vmatpush.msrb.mxu1 %v2640_v29  ;;  %v2515_v29 = vld [vmem:[#allocation7 + $0x13f0] sm:$0xff] }
 0x1da   :  { %2754 = vmatpush.msrb.mxu0 %v2374_v61  ;;  %2771 = vmatpush.msrb.mxu2 %v2507_v41  ;;  %v2633_v61 = vld [vmem:[#allocation7 + $0x17a0] sm:$0xff]  ;;  %v2032_v41 = vld [vmem:[#allocation7 + $0x4d8] sm:$0xff] }
 0x1db   :  { %2739 = vmatpush.msrb.mxu3 %v2227_v19  ;;  %2789 = vmatpush.msrb.mxu1 %v2633_v61  ;;  %v2563_v61 = vld [vmem:[#allocation7 + $0x1570] sm:$0xff] }
 0x1dc   :  { %2755 = vmatpush.msrb.mxu0 %v2367_v35  ;;  %2772 = vmatpush.msrb.mxu2 %v2500_v37  ;;  %v1885_v37 = vld [vmem:[#allocation7 + $0x40] sm:$0xff] }
 0x1dd   :  { %2740 = vmatpush.msrb.mxu3 %v2220_v54  ;;  %v2626_v54 = vld [vmem:[#allocation7 + $0x1768] sm:$0xff] }
 0x1de   :  { %2756 = vmatpush.msrb.mxu0 %v2360_v40  ;;  %2773 = vmatpush.msrb.mxu2 %v2493_v42 }
 0x1df   :  { %2741 = vmatpush.msrb.mxu3 %v2213_v44  ;;  %v1878_v44 = vld [vmem:[#allocation7 + $0x8] sm:$0xff]  ;;  %2790 = vmatpush.msrb.mxu1 %v2626_v54 }
 0x1e0   :  { %2757 = vmatpush.msrb.mxu0 %v2353_v45  ;;  %2742 = vmatmul.f32.vlgmr.msrb.gmra.mxu3 %v4126_v33  ;;  %v2270_v45 = vld [vmem:[#allocation7 + $0xc48] sm:$0xff] }
 0x1e1   :  { %2806 = vmatpush.msra.mxu3 %v1983_v53  ;;  %2774 = vmatpush.msrb.mxu2 %v2486_v39  ;;  %v2018_v53 = vld [vmem:[#allocation7 + $0x468] sm:$0xff] }
 0x1e2   :  { %2758 = vmatpush.msrb.mxu0 %v2346_v47  ;;  %v2431_v47 = vld [vmem:[#allocation7 + $0x1150] sm:$0xff]  ;;  %2791 = vmatpush.msrb.mxu1 %v2619_v46  ;;  %v2494_v54 = vld [vmem:[#allocation7 + $0x1348] sm:$0xff]  ;;  %v2340_v46 = vld [vmem:[#allocation7 + $0xe78] sm:$0xff] }
 0x1e3   :  { %2807 = vmatpush.msra.mxu3 %v1976_v60  ;;  %2775 = vmatpush.msrb.mxu2 %v2479_v48  ;;  %v2263_v60 = vld [vmem:[#allocation7 + $0xc10] sm:$0xff] }
 0x1e4   :  { %2759 = vmatpush.msrb.mxu0 %v2339_v49  ;;  %v2011_v48 = vld [vmem:[#allocation7 + $0x430] sm:$0xff] }
 0x1e5   :  { %2808 = vmatpush.msra.mxu3 %v1969_v1  ;;  %2776 = vmatpush.msrb.mxu2 %v2472_v56  ;;  %v2612_v1 = vld [vmem:[#allocation7 + $0x16f8] sm:$0xff] }
 0x1e6   :  { %2760 = vmatpush.msrb.mxu0 %v2332_v26  ;;  %v2424_v56 = vld [vmem:[#allocation7 + $0x1118] sm:$0xff]  ;;  %2792 = vmatpush.msrb.mxu1 %v2612_v1 }
 0x1e7   :  { %2809 = vmatpush.msra.mxu3 %v1962_v55  ;;  %2777 = vmatpush.msrb.mxu2 %v2465_v57  ;;  %v1607_v23 = vpop.f32.mrf.mxu1  ;;  %v2256_v55 = vld [vmem:[#allocation7 + $0xbd8] sm:$0xff] }
 0x1e8   :  { %2761 = vmatpush.msrb.mxu0 %v2325_v58  ;;  %v1608_v43 = vadd.f32 %v1607_v23, %v877_v17  ;;  %v2004_v57 = vld [vmem:[#allocation7 + $0x3f8] sm:$0xff]  ;;  %v2221_v23 = vld [vmem:[#allocation7 + $0xac0] sm:$0xff] }
 0x1e9   :  { %2762 = vmatmul.f32.vlgmr.msrb.gmra.mxu0 %v4129_v21  ;;  %2810 = vmatpush.msra.mxu3 %v1955_v3  ;;  %v2605_v3 = vld [vmem:[#allocation7 + $0x16c0] sm:$0xff]  ;;  %v2228_v17 = vld [vmem:[#allocation7 + $0xaf8] sm:$0xff] }
 0x1ea   :  { %2826 = vmatpush.msra.mxu0 %v2095_v59  ;;  %2778 = vmatpush.msrb.mxu2 %v2458_v34  ;;  %v2417_v59 = vld [vmem:[#allocation7 + $0x10e0] sm:$0xff]  ;;  %v2200_v1 = vld [vmem:[#allocation7 + $0xa18] sm:$0xff] }
 0x1eb   :  { %2811 = vmatpush.msra.mxu3 %v1948_v62  ;;  %v2249_v62 = vld [vmem:[#allocation7 + $0xba0] sm:$0xff]  ;;  %2793 = vmatpush.msrb.mxu1 %v2605_v3  ;;  %v2459_v3 = vld [vmem:[#allocation7 + $0x1230] sm:$0xff] }
 0x1ec   :  { %2827 = vmatpush.msra.mxu0 %v2088_v11  ;;  %2779 = vmatpush.msrb.mxu2 %v2451_v63  ;;  %v1997_v63 = vld [vmem:[#allocation7 + $0x3c0] sm:$0xff] }
 0x1ed   :  { %2812 = vmatpush.msra.mxu3 %v1941_v0  ;;  %v2598_v0 = vld [vmem:[#allocation7 + $0x1688] sm:$0xff] }
 0x1ee   :  { %2828 = vmatpush.msra.mxu0 %v2081_v5  ;;  %2780 = vmatpush.msrb.mxu2 %v2444_v14  ;;  %v2410_v5 = vld [vmem:[#allocation7 + $0x10a8] sm:$0xff] }
 0x1ef   :  { %2813 = vmatpush.msra.mxu3 %v1934_v51  ;;  %v2242_v51 = vld [vmem:[#allocation7 + $0xb68] sm:$0xff]  ;;  %2794 = vmatpush.msrb.mxu1 %v2598_v0 }
 0x1f0   :  { %2829 = vmatpush.msra.mxu0 %v2074_v7  ;;  %2781 = vmatpush.msrb.mxu2 %v2437_v52  ;;  %v1990_v7 = vld [vmem:[#allocation7 + $0x388] sm:$0xff]  ;;  %v2591_v52 = vld [vmem:[#allocation7 + $0x1650] sm:$0xff] }
 0x1f1   :  { %2814 = vmatpush.msra.mxu3 %v1927_v8  ;;  %v2403_v8 = vld [vmem:[#allocation7 + $0x1070] sm:$0xff]  ;;  %2795 = vmatpush.msrb.mxu1 %v2591_v52  ;;  %v2082_v0 = vld [vmem:[#allocation7 + $0x668] sm:$0xff] }
 0x1f2   :  { %2866 = vmatpush.msra.mxu2 %v2319_v9  ;;  %2830 = vmatpush.msra.mxu0 %v2067_v10  ;;  %v2543_v9 = vld [vmem:[#allocation7 + $0x14d0] sm:$0xff] }
 0x1f3   :  { %2815 = vmatpush.msra.mxu3 %v1920_v12  ;;  %v2235_v10 = vld [vmem:[#allocation7 + $0xb30] sm:$0xff]  ;;  %v2396_v12 = vld [vmem:[#allocation7 + $0x1038] sm:$0xff] }
 0x1f4   :  { %2867 = vmatpush.msra.mxu2 %v2312_v32  ;;  %2831 = vmatpush.msra.mxu0 %v2060_v15  ;;  %v2584_v32 = vld [vmem:[#allocation7 + $0x1618] sm:$0xff]  ;;  %v1907_v52 = vld [vmem:[#allocation7 + $0xf0] sm:$0xff] }
 0x1f5   :  { %2816 = vmatpush.msra.mxu3 %v1913_v20  ;;  %v2536_v15 = vld [vmem:[#allocation7 + $0x1498] sm:$0xff]  ;;  %v2389_v20 = vld [vmem:[#allocation7 + $0x1000] sm:$0xff]  ;;  %2796 = vmatpush.msrb.mxu1 %v2584_v32 }
 0x1f6   :  { %2868 = vmatpush.msra.mxu2 %v2305_v22  ;;  %2832 = vmatpush.msra.mxu0 %v2053_v24  ;;  %v2529_v22 = vld [vmem:[#allocation7 + $0x1460] sm:$0xff]  ;;  %v1900_v32 = vld [vmem:[#allocation7 + $0xb8] sm:$0xff] }
 0x1f7   :  { %2817 = vmatpush.msra.mxu3 %v1906_v6  ;;  %v2382_v6 = vld [vmem:[#allocation7 + $0xfc8] sm:$0xff] }
 0x1f8   :  { %2869 = vmatpush.msra.mxu2 %v2298_v25  ;;  %2833 = vmatpush.msra.mxu0 %v2046_v16  ;;  %v1627_v31 = vpop.f32.mrf.mxu0  ;;  %v2577_v25 = vld [vmem:[#allocation7 + $0x15e0] sm:$0xff]  ;;  %v2522_v16 = vld [vmem:[#allocation7 + $0x1428] sm:$0xff] }
 0x1f9   :  { %2818 = vmatpush.msra.mxu3 %v1899_v28  ;;  %v1628_v19 = vadd.f32 %v1627_v31, %v1608_v43  ;;  %v1647_v35 = vpop.f32.mrf.mxu3  ;;  %v2214_v43 = vld [vmem:[#allocation7 + $0xa88] sm:$0xff]  ;;  %v2375_v28 = vld [vmem:[#allocation7 + $0xf90] sm:$0xff]  ;;  %2797 = vmatpush.msrb.mxu1 %v2577_v25  ;;  %v2508_v31 = vld [vmem:[#allocation7 + $0x13b8] sm:$0xff] }
 0x1fa   :  { %2870 = vmatpush.msra.mxu2 %v2291_v18  ;;  %2834 = vmatpush.msra.mxu0 %v2039_v2  ;;  %v1984_v18 = vld [vmem:[#allocation7 + $0x358] sm:$0xff]  ;;  %v2570_v2 = vld [vmem:[#allocation7 + $0x15a8] sm:$0xff] }
 0x1fb   :  { %2819 = vmatpush.msra.mxu3 %v1892_v27  ;;  %v1648_v40 = vadd.f32 %v1647_v35, %v1628_v19  ;;  %v1667_v42 = vpop.f32.mrf.mxu2  ;;  %v2368_v27 = vld [vmem:[#allocation7 + $0xf58] sm:$0xff]  ;;  %v1970_v19 = vld [vmem:[#allocation7 + $0x2e8] sm:$0xff]  ;;  %2798 = vmatpush.msrb.mxu1 %v2570_v2  ;;  %v2501_v35 = vld [vmem:[#allocation7 + $0x1380] sm:$0xff] }
 0x1fc   :  { %2871 = vmatpush.msra.mxu2 %v2284_v30  ;;  %2835 = vmatpush.msra.mxu0 %v2032_v41  ;;  %v1977_v30 = vld [vmem:[#allocation7 + $0x320] sm:$0xff]  ;;  %v2194_v25 = vld [vmem:[#allocation7 + $0x9e8] sm:$0xff]  ;;  %v2040_v2 = vld [vmem:[#allocation7 + $0x518] sm:$0xff] }
 0x1fd   :  { %2820 = vmatpush.msra.mxu3 %v1885_v37  ;;  %v1668_v39 = vadd.f32 %v1667_v42, %v1648_v40  ;;  %v2361_v41 = vld [vmem:[#allocation7 + $0xf20] sm:$0xff]  ;;  %v2354_v37 = vld [vmem:[#allocation7 + $0xee8] sm:$0xff]  ;;  %2799 = vmatpush.msrb.mxu1 %v2563_v61  ;;  %v2347_v40 = vld [vmem:[#allocation7 + $0xeb0] sm:$0xff] }
 0x1fe   :  { %2872 = vmatpush.msra.mxu2 %v2277_v36  ;;  %2836 = vmatpush.msra.mxu0 %v2025_v38  ;;  %v1963_v36 = vld [vmem:[#allocation7 + $0x2b0] sm:$0xff]  ;;  %v2556_v38 = vld [vmem:[#allocation7 + $0x1538] sm:$0xff] }
 0x1ff   :  { %2821 = vmatpush.msra.mxu3 %v1878_v44  ;;  %v1687_v49 = vpop.f32.mrf.mxu1  ;;  %v1956_v42 = vld [vmem:[#allocation7 + $0x278] sm:$0xff]  ;;  %v2487_v44 = vld [vmem:[#allocation7 + $0x1310] sm:$0xff]  ;;  %2800 = vmatpush.msrb.mxu1 %v2556_v38 }
 0x200   :  { %2873 = vmatpush.msra.mxu2 %v2270_v45  ;;  %2837 = vmatpush.msra.mxu0 %v2018_v53  ;;  %v1688_v26 = vadd.f32 %v1687_v49, %v1668_v39  ;;  %v2549_v45 = vld [vmem:[#allocation7 + $0x1500] sm:$0xff]  ;;  %v2480_v39 = vld [vmem:[#allocation7 + $0x12d8] sm:$0xff] }
 0x201   :  { %2822 = vmatmul.f32.vlgmr.msra.gmra.mxu3 %v4114_v50  ;;  %v1707_v58 = vpop.f32.mrf.mxu0  ;;  %v1949_v53 = vld [vmem:[#allocation7 + $0x240] sm:$0xff]  ;;  %2801 = vmatpush.msrb.mxu1 %v2549_v45  ;;  %v2432_v61 = vld [vmem:[#allocation7 + $0x1158] sm:$0xff] }
 0x202   :  { %2886 = vmatpush.msrb.mxu3 %v2431_v47  ;;  %2874 = vmatpush.msra.mxu2 %v2263_v60  ;;  %v1708_v34 = vadd.f32 %v1707_v58, %v1688_v26  ;;  %v1727_v11 = vpop.f32.mrf.mxu3  ;;  %v2207_v47 = vld [vmem:[#allocation7 + $0xa50] sm:$0xff]  ;;  %v2333_v60 = vld [vmem:[#allocation7 + $0xe40] sm:$0xff]  ;;  %v1928_v58 = vld [vmem:[#allocation7 + $0x198] sm:$0xff] }
 0x203   :  { %2838 = vmatpush.msra.mxu0 %v2011_v48  ;;  %v1942_v48 = vld [vmem:[#allocation7 + $0x208] sm:$0xff]  ;;  %v2473_v49 = vld [vmem:[#allocation7 + $0x12a0] sm:$0xff]  ;;  %v1935_v26 = vld [vmem:[#allocation7 + $0x1d0] sm:$0xff]  ;;  %2846 = vmatpush.msra.mxu1 %v2207_v47 }
 0x204   :  { %2887 = vmatpush.msrb.mxu3 %v2424_v56  ;;  %2875 = vmatpush.msra.mxu2 %v2256_v55  ;;  %v1728_v14 = vadd.f32 %v1727_v11, %v1708_v34  ;;  %v2326_v56 = vld [vmem:[#allocation7 + $0xe08] sm:$0xff]  ;;  %v2089_v34 = vld [vmem:[#allocation7 + $0x6a0] sm:$0xff]  ;;  %v2452_v11 = vld [vmem:[#allocation7 + $0x11f8] sm:$0xff] }
 0x205   :  { %2839 = vmatpush.msra.mxu0 %v2004_v57  ;;  %v2466_v55 = vld [vmem:[#allocation7 + $0x1268] sm:$0xff]  ;;  %v2096_v57 = vld [vmem:[#allocation7 + $0x6d8] sm:$0xff]  ;;  %2847 = vmatpush.msra.mxu1 %v2200_v1  ;;  %v2411_v47 = vld [vmem:[#allocation7 + $0x10b0] sm:$0xff] }
 0x206   :  { %2888 = vmatpush.msrb.mxu3 %v2417_v59  ;;  %2876 = vmatpush.msra.mxu2 %v2249_v62  ;;  %3718 = vtanh.f32 %v1728_v14  ;;  %v2193_v59 = vld [vmem:[#allocation7 + $0x9e0] sm:$0xff]  ;;  %v2152_v1 = vld [vmem:[#allocation7 + $0x898] sm:$0xff] }
 0x207   :  { %2840 = vmatpush.msra.mxu0 %v1997_v63  ;;  %v1921_v62 = vld [vmem:[#allocation7 + $0x160] sm:$0xff]  ;;  %v2186_v63 = vld [vmem:[#allocation7 + $0x9a8] sm:$0xff]  ;;  %2848 = vmatpush.msra.mxu1 %v2193_v59 }
 0x208   :  { %2889 = vmatpush.msrb.mxu3 %v2410_v5  ;;  %2877 = vmatpush.msra.mxu2 %v2242_v51  ;;  %v1914_v5 = vld [vmem:[#allocation7 + $0x128] sm:$0xff]  ;;  %v2445_v14 = vld [vmem:[#allocation7 + $0x11c0] sm:$0xff]  ;;  %v2179_v51 = vld [vmem:[#allocation7 + $0x970] sm:$0xff] }
 0x209   :  { %2841 = vmatpush.msra.mxu0 %v1990_v7  ;;  %v2075_v7 = vld [vmem:[#allocation7 + $0x630] sm:$0xff]  ;;  %2849 = vmatpush.msra.mxu1 %v2186_v63  ;;  %v1998_v59 = vld [vmem:[#allocation7 + $0x3c8] sm:$0xff] }
 0x20a   :  { %2842 = vmatmul.f32.vlgmr.msra.gmra.mxu0 %v4118_v4  ;;  %2890 = vmatpush.msrb.mxu3 %v2403_v8  ;;  %v2438_v8 = vld [vmem:[#allocation7 + $0x1188] sm:$0xff] }
 0x20b   :  { %2906 = vmatpush.msrb.mxu0 %v2543_v9  ;;  %2878 = vmatpush.msra.mxu2 %v2235_v10  ;;  %v2172_v9 = vld [vmem:[#allocation7 + $0x938] sm:$0xff]  ;;  %v2390_v63 = vld [vmem:[#allocation7 + $0x1008] sm:$0xff] }
 0x20c   :  { %2891 = vmatpush.msrb.mxu3 %v2396_v12  ;;  %v4135_v24 = vpop.eup %3718  ;;  %v2068_v10 = vld [vmem:[#allocation7 + $0x5f8] sm:$0xff]  ;;  %2850 = vmatpush.msra.mxu1 %v2179_v51  ;;  %v2131_v51 = vld [vmem:[#allocation7 + $0x7f0] sm:$0xff] }
 0x20d   :  { %2907 = vmatpush.msrb.mxu0 %v2536_v15  ;;  %2879 = vmatpush.msra.mxu2 %v2228_v17  ;;  %v2208_v12 = vld [vmem:[#allocation7 + $0xa58] sm:$0xff]  ;;  %v2061_v15 = vld [vmem:[#allocation7 + $0x5c0] sm:$0xff] }
 0x20e   :  { %2892 = vmatpush.msrb.mxu3 %v2389_v20  ;;  %2782 = vmatmul.f32.vlgmr.msrb.gmra.mxu2 %v4135_v24  ;;  %v2165_v17 = vld [vmem:[#allocation7 + $0x900] sm:$0xff] }
 0x20f   :  { %2908 = vmatpush.msrb.mxu0 %v2529_v22  ;;  %2880 = vmatpush.msra.mxu2 %v2221_v23  ;;  %v2201_v20 = vld [vmem:[#allocation7 + $0xa20] sm:$0xff]  ;;  %v2054_v23 = vld [vmem:[#allocation7 + $0x588] sm:$0xff] }
 0x210   :  { %2893 = vmatpush.msrb.mxu3 %v2382_v6  ;;  %2851 = vmatpush.msra.mxu1 %v2172_v9  ;;  %v1893_v22 = vld [vmem:[#allocation7 + $0x80] sm:$0xff]  ;;  %v2158_v6 = vld [vmem:[#allocation7 + $0x8c8] sm:$0xff]  ;;  %v2383_v9 = vld [vmem:[#allocation7 + $0xfd0] sm:$0xff] }
 0x211   :  { %2909 = vmatpush.msrb.mxu0 %v2522_v16  ;;  %2881 = vmatpush.msra.mxu2 %v2214_v43  ;;  %v1886_v16 = vld [vmem:[#allocation7 + $0x48] sm:$0xff]  ;;  %v2047_v43 = vld [vmem:[#allocation7 + $0x550] sm:$0xff] }
 0x212   :  { %2894 = vmatpush.msrb.mxu3 %v2375_v28  ;;  %2852 = vmatpush.msra.mxu1 %v2165_v17  ;;  %v2151_v28 = vld [vmem:[#allocation7 + $0x890] sm:$0xff]  ;;  %v2117_v17 = vld [vmem:[#allocation7 + $0x780] sm:$0xff] }
 0x213   :  { %2946 = vmatpush.msrb.mxu2 %v1984_v18  ;;  %2910 = vmatpush.msrb.mxu0 %v2515_v29  ;;  %v2187_v18 = vld [vmem:[#allocation7 + $0x9b0] sm:$0xff] }
 0x214   :  { %2895 = vmatpush.msrb.mxu3 %v2368_v27  ;;  %v1879_v29 = vld [vmem:[#allocation7 + $0x10] sm:$0xff]  ;;  %2853 = vmatpush.msra.mxu1 %v2158_v6 }
 0x215   :  { %2947 = vmatpush.msrb.mxu2 %v1977_v30  ;;  %2911 = vmatpush.msrb.mxu0 %v2508_v31  ;;  %v3750_v27 = vld [vmem:[#allocation8] sm:$0x7f]  ;;  %v2180_v31 = vld [vmem:[#allocation7 + $0x978] sm:$0xff] }
 0x216   :  { %2896 = vmatpush.msrb.mxu3 %v2361_v41  ;;  %2882 = vmatmul.f32.vlgmr.msra.gmra.mxu2 %v4126_v33  ;;  %v878_v30 = vperm.slane %v3750_v27, 6  ;;  %v2642_v27 = vld [vmem:[#allocation7 + $0x17e8] sm:$0xff] }
 0x217   :  { %2948 = vmatpush.msrb.mxu2 %v1970_v19  ;;  %2912 = vmatpush.msrb.mxu0 %v2501_v35  ;;  %v2033_v19 = vld [vmem:[#allocation7 + $0x4e0] sm:$0xff]  ;;  %v2144_v35 = vld [vmem:[#allocation7 + $0x858] sm:$0xff] }
 0x218   :  { %2897 = vmatpush.msrb.mxu3 %v2354_v37  ;;  %2854 = vmatpush.msra.mxu1 %v2151_v28  ;;  %v2173_v37 = vld [vmem:[#allocation7 + $0x940] sm:$0xff] }
 0x219   :  { %2949 = vmatpush.msrb.mxu2 %v1963_v36  ;;  %2913 = vmatpush.msrb.mxu0 %v2494_v54  ;;  %v2425_v36 = vld [vmem:[#allocation7 + $0x1120] sm:$0xff]  ;;  %v2026_v54 = vld [vmem:[#allocation7 + $0x4a8] sm:$0xff] }
 0x21a   :  { %2898 = vmatpush.msrb.mxu3 %v2347_v40  ;;  %v2137_v40 = vld [vmem:[#allocation7 + $0x820] sm:$0xff]  ;;  %2855 = vmatpush.msra.mxu1 %v2144_v35  ;;  %v2628_v35 = vld [vmem:[#allocation7 + $0x1778] sm:$0xff] }
 0x21b   :  { %2950 = vmatpush.msrb.mxu2 %v1956_v42  ;;  %2914 = vmatpush.msrb.mxu0 %v2487_v44  ;;  %v2166_v42 = vld [vmem:[#allocation7 + $0x908] sm:$0xff] }
 0x21c   :  { %2899 = vmatpush.msrb.mxu3 %v2340_v46  ;;  %v2418_v44 = vld [vmem:[#allocation7 + $0x10e8] sm:$0xff]  ;;  %v2019_v46 = vld [vmem:[#allocation7 + $0x470] sm:$0xff]  ;;  %2856 = vmatpush.msra.mxu1 %v2137_v40  ;;  %v2621_v40 = vld [vmem:[#allocation7 + $0x1740] sm:$0xff] }
 0x21d   :  { %2951 = vmatpush.msrb.mxu2 %v1949_v53  ;;  %2915 = vmatpush.msrb.mxu0 %v2480_v39  ;;  %v2130_v53 = vld [vmem:[#allocation7 + $0x7e8] sm:$0xff]  ;;  %v2159_v39 = vld [vmem:[#allocation7 + $0x8d0] sm:$0xff] }
 0x21e   :  { %2900 = vmatpush.msrb.mxu3 %v2333_v60  ;;  %v2012_v60 = vld [vmem:[#allocation7 + $0x438] sm:$0xff]  ;;  %2857 = vmatpush.msra.mxu1 %v2130_v53  ;;  %v2327_v53 = vld [vmem:[#allocation7 + $0xe10] sm:$0xff] }
 0x21f   :  { %2952 = vmatpush.msrb.mxu2 %v1942_v48  ;;  %2916 = vmatpush.msrb.mxu0 %v2473_v49  ;;  %v2123_v49 = vld [vmem:[#allocation7 + $0x7b0] sm:$0xff] }
 0x220   :  { %2901 = vmatpush.msrb.mxu3 %v2326_v56  ;;  %v2404_v56 = vld [vmem:[#allocation7 + $0x1078] sm:$0xff]  ;;  %2858 = vmatpush.msra.mxu1 %v2123_v49  ;;  %v2097_v49 = vld [vmem:[#allocation7 + $0x6e0] sm:$0xff] }
 0x221   :  { %2953 = vmatpush.msrb.mxu2 %v1935_v26  ;;  %2917 = vmatpush.msrb.mxu0 %v2466_v55  ;;  %v2005_v26 = vld [vmem:[#allocation7 + $0x400] sm:$0xff]  ;;  %v2116_v55 = vld [vmem:[#allocation7 + $0x778] sm:$0xff] }
 0x222   :  { %2902 = vmatmul.f32.vlgmr.msrb.gmra.mxu3 %v4129_v21  ;;  %2859 = vmatpush.msra.mxu1 %v2116_v55  ;;  %v2090_v55 = vld [vmem:[#allocation7 + $0x6a8] sm:$0xff] }
 0x223   :  { %2966 = vmatpush.msra.mxu3 %v2096_v57  ;;  %2954 = vmatpush.msrb.mxu2 %v1928_v58  ;;  %v2145_v57 = vld [vmem:[#allocation7 + $0x860] sm:$0xff] }
 0x224   :  { %2918 = vmatpush.msrb.mxu0 %v2459_v3  ;;  %v2397_v3 = vld [vmem:[#allocation7 + $0x1040] sm:$0xff] }
 0x225   :  { %2967 = vmatpush.msra.mxu3 %v2089_v34  ;;  %2955 = vmatpush.msrb.mxu2 %v1921_v62  ;;  %v2109_v62 = vld [vmem:[#allocation7 + $0x740] sm:$0xff] }
 0x226   :  { %2919 = vmatpush.msrb.mxu0 %v2452_v11  ;;  %v2138_v11 = vld [vmem:[#allocation7 + $0x828] sm:$0xff]  ;;  %2860 = vmatpush.msra.mxu1 %v2109_v62  ;;  %v2453_v62 = vld [vmem:[#allocation7 + $0x1200] sm:$0xff] }
 0x227   :  { %2968 = vmatpush.msra.mxu3 %v2082_v0  ;;  %2956 = vmatpush.msrb.mxu2 %v1914_v5  ;;  %v1991_v0 = vld [vmem:[#allocation7 + $0x390] sm:$0xff] }
 0x228   :  { %2920 = vmatpush.msrb.mxu0 %v2445_v14  ;;  %v2102_v14 = vld [vmem:[#allocation7 + $0x708] sm:$0xff] }
 0x229   :  { %2969 = vmatpush.msra.mxu3 %v2075_v7  ;;  %2957 = vmatpush.msrb.mxu2 %v1907_v52 }
 0x22a   :  { %2921 = vmatpush.msrb.mxu0 %v2438_v8  ;;  %v2544_v8 = vld [vmem:[#allocation7 + $0x14d8] sm:$0xff]  ;;  %2861 = vmatpush.msra.mxu1 %v2102_v14  ;;  %v2599_v14 = vld [vmem:[#allocation7 + $0x1690] sm:$0xff] }
 0x22b   :  { %2922 = vmatmul.f32.vlgmr.msrb.gmra.mxu0 %v4135_v24  ;;  %2970 = vmatpush.msra.mxu3 %v2068_v10  ;;  %v1767_v45 = vpop.f32.mrf.mxu1  ;;  %v2124_v10 = vld [vmem:[#allocation7 + $0x7b8] sm:$0xff] }
 0x22c   :  { %2986 = vmatpush.msra.mxu0 %v2208_v12  ;;  %2958 = vmatpush.msrb.mxu2 %v1900_v32  ;;  %v1747_v41 = vpop.f32.mrf.mxu2  ;;  %v2537_v32 = vld [vmem:[#allocation7 + $0x14a0] sm:$0xff] }
 0x22d   :  { %2971 = vmatpush.msra.mxu3 %v2061_v15  ;;  %v1748_v38 = vadd.f32 %v1747_v41, %v878_v30  ;;  %v2376_v15 = vld [vmem:[#allocation7 + $0xf98] sm:$0xff]  ;;  %v2355_v30 = vld [vmem:[#allocation7 + $0xef0] sm:$0xff] }
 0x22e   :  { %2987 = vmatpush.msra.mxu0 %v2201_v20  ;;  %2959 = vmatpush.msrb.mxu2 %v1893_v22  ;;  %v2530_v22 = vld [vmem:[#allocation7 + $0x1468] sm:$0xff]  ;;  %v2348_v41 = vld [vmem:[#allocation7 + $0xeb8] sm:$0xff] }
 0x22f   :  { %2972 = vmatpush.msra.mxu3 %v2054_v23  ;;  %v1768_v48 = vadd.f32 %v1767_v45, %v1748_v38  ;;  %v2641_v38 = vld [vmem:[#allocation7 + $0x17e0] sm:$0xff]  ;;  %v2634_v45 = vld [vmem:[#allocation7 + $0x17a8] sm:$0xff] }
 0x230   :  { %2988 = vmatpush.msra.mxu0 %v2194_v25  ;;  %2960 = vmatpush.msrb.mxu2 %v1886_v16  ;;  %v2369_v25 = vld [vmem:[#allocation7 + $0xf60] sm:$0xff]  ;;  %v2110_v16 = vld [vmem:[#allocation7 + $0x748] sm:$0xff] }
 0x231   :  { %2973 = vmatpush.msra.mxu3 %v2047_v43  ;;  %v2523_v43 = vld [vmem:[#allocation7 + $0x1430] sm:$0xff] }
 0x232   :  { %2989 = vmatpush.msra.mxu0 %v2187_v18  ;;  %2961 = vmatpush.msrb.mxu2 %v1879_v29  ;;  %v2362_v18 = vld [vmem:[#allocation7 + $0xf28] sm:$0xff]  ;;  %v2103_v29 = vld [vmem:[#allocation7 + $0x710] sm:$0xff] }
 0x233   :  { %2974 = vmatpush.msra.mxu3 %v2040_v2  ;;  %2962 = vmatmul.f32.vlgmr.msrb.gmra.mxu2 %v4114_v50  ;;  %v2516_v2 = vld [vmem:[#allocation7 + $0x13f8] sm:$0xff] }
 0x234   :  { %2990 = vmatpush.msra.mxu0 %v2180_v31  ;;  %3026 = vmatpush.msra.mxu2 %v2432_v61  ;;  %v2509_v31 = vld [vmem:[#allocation7 + $0x13c0] sm:$0xff]  ;;  %v2635_v61 = vld [vmem:[#allocation7 + $0x17b0] sm:$0xff] }
 0x235   :  { %2975 = vmatpush.msra.mxu3 %v2033_v19  ;;  %v2502_v19 = vld [vmem:[#allocation7 + $0x1388] sm:$0xff] }
 0x236   :  { %2991 = vmatpush.msra.mxu0 %v2173_v37  ;;  %3027 = vmatpush.msra.mxu2 %v2425_v36  ;;  %v2341_v37 = vld [vmem:[#allocation7 + $0xe80] sm:$0xff] }
 0x237   :  { %2976 = vmatpush.msra.mxu3 %v2026_v54  ;;  %v2495_v54 = vld [vmem:[#allocation7 + $0x1350] sm:$0xff] }
 0x238   :  { %2992 = vmatpush.msra.mxu0 %v2166_v42  ;;  %3028 = vmatpush.msra.mxu2 %v2418_v44  ;;  %v2334_v42 = vld [vmem:[#allocation7 + $0xe48] sm:$0xff]  ;;  %v2488_v44 = vld [vmem:[#allocation7 + $0x1318] sm:$0xff] }
 0x239   :  { %2977 = vmatpush.msra.mxu3 %v2019_v46  ;;  %v1787_v58 = vpop.f32.mrf.mxu3  ;;  %v2614_v46 = vld [vmem:[#allocation7 + $0x1708] sm:$0xff] }
 0x23a   :  { %2993 = vmatpush.msra.mxu0 %v2159_v39  ;;  %3029 = vmatpush.msra.mxu2 %v2411_v47  ;;  %v1788_v34 = vadd.f32 %v1787_v58, %v1768_v48  ;;  %v2481_v39 = vld [vmem:[#allocation7 + $0x12e0] sm:$0xff]  ;;  %v2627_v47 = vld [vmem:[#allocation7 + $0x1770] sm:$0xff]  ;;  %v2474_v48 = vld [vmem:[#allocation7 + $0x12a8] sm:$0xff] }
 0x23b   :  { %2978 = vmatpush.msra.mxu3 %v2012_v60  ;;  %v2607_v60 = vld [vmem:[#allocation7 + $0x16d0] sm:$0xff]  ;;  %v2460_v58 = vld [vmem:[#allocation7 + $0x1238] sm:$0xff] }
 0x23c   :  { %2994 = vmatpush.msra.mxu0 %v2152_v1  ;;  %3030 = vmatpush.msra.mxu2 %v2404_v56  ;;  %v1807_v5 = vpop.f32.mrf.mxu0  ;;  %v2600_v1 = vld [vmem:[#allocation7 + $0x1698] sm:$0xff] }
 0x23d   :  { %2979 = vmatpush.msra.mxu3 %v2005_v26  ;;  %v1808_v7 = vadd.f32 %v1807_v5, %v1788_v34  ;;  %v1827_v52 = vpop.f32.mrf.mxu2  ;;  %v2620_v56 = vld [vmem:[#allocation7 + $0x1738] sm:$0xff]  ;;  %v2467_v26 = vld [vmem:[#allocation7 + $0x1270] sm:$0xff]  ;;  %v2446_v5 = vld [vmem:[#allocation7 + $0x11c8] sm:$0xff] }
 0x23e   :  { %2995 = vmatpush.msra.mxu0 %v2145_v57  ;;  %3031 = vmatpush.msra.mxu2 %v2397_v3  ;;  %v2593_v57 = vld [vmem:[#allocation7 + $0x1660] sm:$0xff]  ;;  %v2083_v34 = vld [vmem:[#allocation7 + $0x670] sm:$0xff] }
 0x23f   :  { %2980 = vmatpush.msra.mxu3 %v1998_v59  ;;  %v1828_v12 = vadd.f32 %v1827_v52, %v1808_v7  ;;  %v2613_v3 = vld [vmem:[#allocation7 + $0x1700] sm:$0xff]  ;;  %v2586_v59 = vld [vmem:[#allocation7 + $0x1628] sm:$0xff]  ;;  %v2439_v52 = vld [vmem:[#allocation7 + $0x1190] sm:$0xff] }
 0x240   :  { %2996 = vmatpush.msra.mxu0 %v2138_v11  ;;  %3032 = vmatpush.msra.mxu2 %v2390_v63  ;;  %v2606_v11 = vld [vmem:[#allocation7 + $0x16c8] sm:$0xff]  ;;  %v2579_v63 = vld [vmem:[#allocation7 + $0x15f0] sm:$0xff]  ;;  %v2069_v7 = vld [vmem:[#allocation7 + $0x600] sm:$0xff] }
 0x241   :  { %2981 = vmatpush.msra.mxu3 %v1991_v0  ;;  %v1847_v20 = vpop.f32.mrf.mxu1  ;;  %v2076_v0 = vld [vmem:[#allocation7 + $0x638] sm:$0xff] }
 0x242   :  { %2997 = vmatpush.msra.mxu0 %v2131_v51  ;;  %2982 = vmatmul.f32.vlgmr.msra.gmra.mxu3 %v4118_v4  ;;  %v1848_v23 = vadd.f32 %v1847_v20, %v1828_v12  ;;  %v1867_v6 = vpop.f32.mrf.mxu3  ;;  %v2572_v51 = vld [vmem:[#allocation7 + $0x15b8] sm:$0xff]  ;;  %v2209_v12 = vld [vmem:[#allocation7 + $0xa60] sm:$0xff]  ;;  %v2202_v20 = vld [vmem:[#allocation7 + $0xa28] sm:$0xff] }
 0x243   :  { %3046 = vmatpush.msrb.mxu3 %v2544_v8  ;;  %3033 = vmatpush.msra.mxu2 %v2383_v9  ;;  %v2592_v8 = vld [vmem:[#allocation7 + $0x1658] sm:$0xff]  ;;  %v2565_v9 = vld [vmem:[#allocation7 + $0x1580] sm:$0xff] }
 0x244   :  { %2998 = vmatpush.msra.mxu0 %v2124_v10  ;;  %v1868_v28 = vadd.f32 %v1867_v6, %v1848_v23  ;;  %v2062_v10 = vld [vmem:[#allocation7 + $0x5c8] sm:$0xff]  ;;  %v2048_v6 = vld [vmem:[#allocation7 + $0x558] sm:$0xff] }
 0x245   :  { %3047 = vmatpush.msrb.mxu3 %v2537_v32  ;;  %3034 = vmatpush.msra.mxu2 %v2376_v15  ;;  %v2558_v32 = vld [vmem:[#allocation7 + $0x1548] sm:$0xff]  ;;  %v2585_v15 = vld [vmem:[#allocation7 + $0x1620] sm:$0xff] }
 0x246   :  { %2999 = vmatpush.msra.mxu0 %v2117_v17  ;;  %3720 = vtanh.f32 %v1868_v28  ;;  %v2055_v17 = vld [vmem:[#allocation7 + $0x590] sm:$0xff]  ;;  %v2578_v23 = vld [vmem:[#allocation7 + $0x15e8] sm:$0xff]  ;;  %v2041_v28 = vld [vmem:[#allocation7 + $0x520] sm:$0xff] }
 0x247   :  { %3048 = vmatpush.msrb.mxu3 %v2530_v22  ;;  %3035 = vmatpush.msra.mxu2 %v2369_v25  ;;  %v2551_v22 = vld [vmem:[#allocation7 + $0x1510] sm:$0xff] }
 0x248   :  { %3000 = vmatpush.msra.mxu0 %v2110_v16  ;;  %v2195_v25 = vld [vmem:[#allocation7 + $0x9f0] sm:$0xff]  ;;  %v2321_v16 = vld [vmem:[#allocation7 + $0xde0] sm:$0xff] }
 0x249   :  { %3049 = vmatpush.msrb.mxu3 %v2523_v43  ;;  %3036 = vmatpush.msra.mxu2 %v2362_v18  ;;  %v2571_v43 = vld [vmem:[#allocation7 + $0x15b0] sm:$0xff]  ;;  %v2188_v18 = vld [vmem:[#allocation7 + $0x9b8] sm:$0xff] }
 0x24a   :  { %3001 = vmatpush.msra.mxu0 %v2103_v29  ;;  %v2314_v29 = vld [vmem:[#allocation7 + $0xda8] sm:$0xff] }
 0x24b   :  { %3002 = vmatmul.f32.vlgmr.msra.gmra.mxu0 %v4122_v13  ;;  %3050 = vmatpush.msrb.mxu3 %v2516_v2  ;;  %v2564_v2 = vld [vmem:[#allocation7 + $0x1578] sm:$0xff] }
 0x24c   :  { %3068 = vmatpush.msrb.mxu0 %v2642_v27  ;;  %3037 = vmatpush.msra.mxu2 %v2355_v30  ;;  %v4144_v36 = vpop.eup %3720  ;;  %v2034_v27 = vld [vmem:[#allocation7 + $0x4e8] sm:$0xff]  ;;  %v2181_v30 = vld [vmem:[#allocation7 + $0x980] sm:$0xff] }
 0x24d   :  { %3051 = vmatpush.msrb.mxu3 %v2509_v31  ;;  %3693 = vmatmul.msk.f32.vlgmr.msrb.gmra.mxu1 %vm886_vm0, %v4144_v36  ;;  %v2307_v31 = vld [vmem:[#allocation7 + $0xd70] sm:$0xff] }
 0x24e   :  { %3069 = vmatpush.msrb.mxu0 %v2635_v61  ;;  %3038 = vmatpush.msra.mxu2 %v2348_v41  ;;  %v2557_v61 = vld [vmem:[#allocation7 + $0x1540] sm:$0xff]  ;;  %v2027_v41 = vld [vmem:[#allocation7 + $0x4b0] sm:$0xff] }
 0x24f   :  { %3052 = vmatpush.msrb.mxu3 %v2502_v19  ;;  %2928 = vmatpush.msrb.mxu1 %v2641_v38  ;;  %v2174_v19 = vld [vmem:[#allocation7 + $0x948] sm:$0xff]  ;;  %v2167_v38 = vld [vmem:[#allocation7 + $0x910] sm:$0xff] }
 0x250   :  { %3070 = vmatpush.msrb.mxu0 %v2628_v35  ;;  %3039 = vmatpush.msra.mxu2 %v2341_v37  ;;  %v2300_v35 = vld [vmem:[#allocation7 + $0xd38] sm:$0xff]  ;;  %v2550_v37 = vld [vmem:[#allocation7 + $0x1508] sm:$0xff] }
 0x251   :  { %3053 = vmatpush.msrb.mxu3 %v2495_v54  ;;  %2929 = vmatpush.msrb.mxu1 %v2634_v45  ;;  %v2020_v54 = vld [vmem:[#allocation7 + $0x478] sm:$0xff] }
 0x252   :  { %3071 = vmatpush.msrb.mxu0 %v2621_v40  ;;  %3040 = vmatpush.msra.mxu2 %v2334_v42  ;;  %v2293_v40 = vld [vmem:[#allocation7 + $0xd00] sm:$0xff]  ;;  %v2160_v45 = vld [vmem:[#allocation7 + $0x8d8] sm:$0xff] }
 0x253   :  { %3054 = vmatpush.msrb.mxu3 %v2488_v44  ;;  %2930 = vmatpush.msrb.mxu1 %v2627_v47  ;;  %v2013_v42 = vld [vmem:[#allocation7 + $0x440] sm:$0xff]  ;;  %v2320_v44 = vld [vmem:[#allocation7 + $0xdd8] sm:$0xff] }
 0x254   :  { %3072 = vmatpush.msrb.mxu0 %v2614_v46  ;;  %3041 = vmatpush.msra.mxu2 %v2327_v53  ;;  %v2286_v46 = vld [vmem:[#allocation7 + $0xcc8] sm:$0xff]  ;;  %v2153_v47 = vld [vmem:[#allocation7 + $0x8a0] sm:$0xff] }
 0x255   :  { %3055 = vmatpush.msrb.mxu3 %v2481_v39  ;;  %3042 = vmatmul.f32.vlgmr.msra.gmra.mxu2 %v4129_v21  ;;  %v2006_v53 = vld [vmem:[#allocation7 + $0x408] sm:$0xff]  ;;  %v2313_v39 = vld [vmem:[#allocation7 + $0xda0] sm:$0xff] }
 0x256   :  { %3073 = vmatpush.msrb.mxu0 %v2607_v60  ;;  %3106 = vmatpush.msrb.mxu2 %v2097_v49  ;;  %v2279_v60 = vld [vmem:[#allocation7 + $0xc90] sm:$0xff]  ;;  %v2306_v49 = vld [vmem:[#allocation7 + $0xd68] sm:$0xff] }
 0x257   :  { %3056 = vmatpush.msrb.mxu3 %v2474_v48  ;;  %2931 = vmatpush.msrb.mxu1 %v2620_v56  ;;  %v1999_v48 = vld [vmem:[#allocation7 + $0x3d0] sm:$0xff]  ;;  %v2272_v56 = vld [vmem:[#allocation7 + $0xc58] sm:$0xff] }
 0x258   :  { %3074 = vmatpush.msrb.mxu0 %v2600_v1  ;;  %3107 = vmatpush.msrb.mxu2 %v2090_v55  ;;  %v2146_v1 = vld [vmem:[#allocation7 + $0x868] sm:$0xff]  ;;  %v2299_v55 = vld [vmem:[#allocation7 + $0xd30] sm:$0xff] }
 0x259   :  { %3057 = vmatpush.msrb.mxu3 %v2467_v26  ;;  %2862 = vmatmul.f32.vlgmr.msra.gmra.mxu1 %v4122_v13  ;;  %v1992_v26 = vld [vmem:[#allocation7 + $0x398] sm:$0xff] }
 0x25a   :  { %3075 = vmatpush.msrb.mxu0 %v2593_v57  ;;  %2932 = vmatpush.msrb.mxu1 %v2613_v3  ;;  %v2139_v57 = vld [vmem:[#allocation7 + $0x830] sm:$0xff]  ;;  %v2292_v3 = vld [vmem:[#allocation7 + $0xcf8] sm:$0xff] }
 0x25b   :  { %3058 = vmatpush.msrb.mxu3 %v2460_v58  ;;  %3108 = vmatpush.msrb.mxu2 %v2083_v34  ;;  %v2265_v58 = vld [vmem:[#allocation7 + $0xc20] sm:$0xff]  ;;  %v2132_v34 = vld [vmem:[#allocation7 + $0x7f8] sm:$0xff] }
 0x25c   :  { %3076 = vmatpush.msrb.mxu0 %v2586_v59  ;;  %2933 = vmatpush.msrb.mxu1 %v2606_v11  ;;  %v2545_v59 = vld [vmem:[#allocation7 + $0x14e0] sm:$0xff] }
 0x25d   :  { %3059 = vmatpush.msrb.mxu3 %v2453_v62  ;;  %3109 = vmatpush.msrb.mxu2 %v2076_v0  ;;  %v2258_v62 = vld [vmem:[#allocation7 + $0xbe8] sm:$0xff]  ;;  %v2285_v11 = vld [vmem:[#allocation7 + $0xcc0] sm:$0xff] }
 0x25e   :  { %3077 = vmatpush.msrb.mxu0 %v2579_v63  ;;  %2934 = vmatpush.msrb.mxu1 %v2599_v14  ;;  %v2538_v63 = vld [vmem:[#allocation7 + $0x14a8] sm:$0xff]  ;;  %v2125_v0 = vld [vmem:[#allocation7 + $0x7c0] sm:$0xff] }
 0x25f   :  { %3060 = vmatpush.msrb.mxu3 %v2446_v5  ;;  %3110 = vmatpush.msrb.mxu2 %v2069_v7  ;;  %v2251_v5 = vld [vmem:[#allocation7 + $0xbb0] sm:$0xff]  ;;  %v2278_v14 = vld [vmem:[#allocation7 + $0xc88] sm:$0xff] }
 0x260   :  { %3078 = vmatpush.msrb.mxu0 %v2572_v51  ;;  %2935 = vmatpush.msrb.mxu1 %v2592_v8  ;;  %v2531_v51 = vld [vmem:[#allocation7 + $0x1470] sm:$0xff]  ;;  %v2118_v7 = vld [vmem:[#allocation7 + $0x788] sm:$0xff] }
 0x261   :  { %3061 = vmatpush.msrb.mxu3 %v2439_v52  ;;  %3111 = vmatpush.msrb.mxu2 %v2062_v10  ;;  %v2244_v52 = vld [vmem:[#allocation7 + $0xb78] sm:$0xff]  ;;  %v2271_v8 = vld [vmem:[#allocation7 + $0xc50] sm:$0xff] }
 0x262   :  { %3079 = vmatpush.msrb.mxu0 %v2565_v9  ;;  %3062 = vmatmul.f32.vlgmr.msrb.gmra.mxu3 %v4135_v24  ;;  %v2524_v9 = vld [vmem:[#allocation7 + $0x1438] sm:$0xff]  ;;  %v2111_v10 = vld [vmem:[#allocation7 + $0x750] sm:$0xff] }
 0x263   :  { %3126 = vmatpush.msra.mxu3 %v2209_v12  ;;  %2936 = vmatpush.msrb.mxu1 %v2585_v15  ;;  %v2237_v12 = vld [vmem:[#allocation7 + $0xb40] sm:$0xff] }
 0x264   :  { %3080 = vmatpush.msrb.mxu0 %v2558_v32  ;;  %3112 = vmatpush.msrb.mxu2 %v2055_v17  ;;  %v2264_v32 = vld [vmem:[#allocation7 + $0xc18] sm:$0xff]  ;;  %v2517_v15 = vld [vmem:[#allocation7 + $0x1400] sm:$0xff] }
 0x265   :  { %3127 = vmatpush.msra.mxu3 %v2202_v20  ;;  %2937 = vmatpush.msrb.mxu1 %v2578_v23  ;;  %v2104_v17 = vld [vmem:[#allocation7 + $0x718] sm:$0xff]  ;;  %v2230_v20 = vld [vmem:[#allocation7 + $0xb08] sm:$0xff] }
 0x266   :  { %3081 = vmatpush.msrb.mxu0 %v2551_v22  ;;  %3113 = vmatpush.msrb.mxu2 %v2048_v6  ;;  %v2257_v22 = vld [vmem:[#allocation7 + $0xbe0] sm:$0xff]  ;;  %v2510_v23 = vld [vmem:[#allocation7 + $0x13c8] sm:$0xff]  ;;  %v2643_v6 = vld [vmem:[#allocation7 + $0x17f0] sm:$0xff] }
 0x267   :  { %3695 = vmatmul.msk.f32.vlgmr.msrb.gmra.mxu0 %vm886_vm0, %v4144_v36  ;;  %3128 = vmatpush.msra.mxu3 %v2195_v25  ;;  %v2223_v25 = vld [vmem:[#allocation7 + $0xad0] sm:$0xff] }
 0x268   :  { %3146 = vmatpush.msra.mxu0 %v2321_v16  ;;  %2938 = vmatpush.msrb.mxu1 %v2571_v43  ;;  %v2250_v16 = vld [vmem:[#allocation7 + $0xba8] sm:$0xff]  ;;  %v2503_v43 = vld [vmem:[#allocation7 + $0x1390] sm:$0xff] }
 0x269   :  { %3114 = vmatpush.msrb.mxu2 %v2041_v28  ;;  %3129 = vmatpush.msra.mxu3 %v2188_v18  ;;  %v2636_v28 = vld [vmem:[#allocation7 + $0x17b8] sm:$0xff] }
 0x26a   :  { %3147 = vmatpush.msra.mxu0 %v2314_v29  ;;  %2939 = vmatpush.msrb.mxu1 %v2564_v2  ;;  %v2216_v18 = vld [vmem:[#allocation7 + $0xa98] sm:$0xff]  ;;  %v2243_v29 = vld [vmem:[#allocation7 + $0xb70] sm:$0xff] }
 0x26b   :  { %3115 = vmatpush.msrb.mxu2 %v2034_v27  ;;  %3130 = vmatpush.msra.mxu3 %v2181_v30  ;;  %v2496_v2 = vld [vmem:[#allocation7 + $0x1358] sm:$0xff]  ;;  %v2629_v27 = vld [vmem:[#allocation7 + $0x1780] sm:$0xff]  ;;  %v1986_v30 = vld [vmem:[#allocation7 + $0x368] sm:$0xff] }
 0x26c   :  { %3148 = vmatpush.msra.mxu0 %v2307_v31  ;;  %2940 = vmatpush.msrb.mxu1 %v2557_v61  ;;  %v2236_v31 = vld [vmem:[#allocation7 + $0xb38] sm:$0xff]  ;;  %v2489_v61 = vld [vmem:[#allocation7 + $0x1320] sm:$0xff] }
 0x26d   :  { %3116 = vmatpush.msrb.mxu2 %v2027_v41  ;;  %3131 = vmatpush.msra.mxu3 %v2174_v19  ;;  %v2622_v41 = vld [vmem:[#allocation7 + $0x1748] sm:$0xff]  ;;  %v1979_v19 = vld [vmem:[#allocation7 + $0x330] sm:$0xff] }
 0x26e   :  { %3149 = vmatpush.msra.mxu0 %v2300_v35  ;;  %2941 = vmatpush.msrb.mxu1 %v2550_v37  ;;  %v2229_v35 = vld [vmem:[#allocation7 + $0xb00] sm:$0xff]  ;;  %v2482_v37 = vld [vmem:[#allocation7 + $0x12e8] sm:$0xff] }
 0x26f   :  { %3117 = vmatpush.msrb.mxu2 %v2020_v54  ;;  %3132 = vmatpush.msra.mxu3 %v2167_v38  ;;  %v2615_v54 = vld [vmem:[#allocation7 + $0x1710] sm:$0xff]  ;;  %v1972_v38 = vld [vmem:[#allocation7 + $0x2f8] sm:$0xff] }
 0x270   :  { %3150 = vmatpush.msra.mxu0 %v2293_v40  ;;  %3694 = vmatmul.msk.f32.vlgmr.msrb.gmra.mxu1 %vm886_vm0, %v4144_v36  ;;  %v2222_v40 = vld [vmem:[#allocation7 + $0xac8] sm:$0xff] }
 0x271   :  { %3118 = vmatpush.msrb.mxu2 %v2013_v42  ;;  %3006 = vmatpush.msra.mxu1 %v2320_v44  ;;  %v2475_v42 = vld [vmem:[#allocation7 + $0x12b0] sm:$0xff]  ;;  %v2608_v44 = vld [vmem:[#allocation7 + $0x16d8] sm:$0xff] }
 0x272   :  { %3133 = vmatpush.msra.mxu3 %v2160_v45  ;;  %3151 = vmatpush.msra.mxu0 %v2286_v46  ;;  %v1965_v45 = vld [vmem:[#allocation7 + $0x2c0] sm:$0xff]  ;;  %v2215_v46 = vld [vmem:[#allocation7 + $0xa90] sm:$0xff] }
 0x273   :  { %3119 = vmatpush.msrb.mxu2 %v2006_v53  ;;  %3007 = vmatpush.msra.mxu1 %v2313_v39  ;;  %v2468_v53 = vld [vmem:[#allocation7 + $0x1278] sm:$0xff]  ;;  %v2601_v39 = vld [vmem:[#allocation7 + $0x16a0] sm:$0xff] }
 0x274   :  { %3134 = vmatpush.msra.mxu3 %v2153_v47  ;;  %3152 = vmatpush.msra.mxu0 %v2279_v60  ;;  %v1958_v47 = vld [vmem:[#allocation7 + $0x288] sm:$0xff]  ;;  %v2461_v60 = vld [vmem:[#allocation7 + $0x1240] sm:$0xff] }
 0x275   :  { %3120 = vmatpush.msrb.mxu2 %v1999_v48  ;;  %3008 = vmatpush.msra.mxu1 %v2306_v49  ;;  %v1985_v48 = vld [vmem:[#allocation7 + $0x360] sm:$0xff]  ;;  %v2594_v49 = vld [vmem:[#allocation7 + $0x1668] sm:$0xff] }
 0x276   :  { %3135 = vmatpush.msra.mxu3 %v2146_v1  ;;  %3153 = vmatpush.msra.mxu0 %v2272_v56  ;;  %v1951_v1 = vld [vmem:[#allocation7 + $0x250] sm:$0xff]  ;;  %v2454_v56 = vld [vmem:[#allocation7 + $0x1208] sm:$0xff] }
 0x277   :  { %3121 = vmatpush.msrb.mxu2 %v1992_v26  ;;  %3009 = vmatpush.msra.mxu1 %v2299_v55  ;;  %v1978_v26 = vld [vmem:[#allocation7 + $0x328] sm:$0xff]  ;;  %v2587_v55 = vld [vmem:[#allocation7 + $0x1630] sm:$0xff] }
 0x278   :  { %3136 = vmatpush.msra.mxu3 %v2139_v57  ;;  %3154 = vmatpush.msra.mxu0 %v2265_v58  ;;  %v1944_v57 = vld [vmem:[#allocation7 + $0x218] sm:$0xff]  ;;  %v2447_v58 = vld [vmem:[#allocation7 + $0x11d0] sm:$0xff] }
 0x279   :  { %3122 = vmatmul.f32.vlgmr.msrb.gmra.mxu2 %v4118_v4  ;;  %3010 = vmatpush.msra.mxu1 %v2292_v3  ;;  %v1971_v3 = vld [vmem:[#allocation7 + $0x2f0] sm:$0xff] }
 0x27a   :  { %3186 = vmatpush.msra.mxu2 %v2545_v59  ;;  %3137 = vmatpush.msra.mxu3 %v2132_v34  ;;  %v2580_v59 = vld [vmem:[#allocation7 + $0x15f8] sm:$0xff]  ;;  %v1937_v34 = vld [vmem:[#allocation7 + $0x1e0] sm:$0xff] }
 0x27b   :  { %3155 = vmatpush.msra.mxu0 %v2258_v62  ;;  %3011 = vmatpush.msra.mxu1 %v2285_v11  ;;  %v2440_v62 = vld [vmem:[#allocation7 + $0x1198] sm:$0xff] }
 0x27c   :  { %3187 = vmatpush.msra.mxu2 %v2538_v63  ;;  %3138 = vmatpush.msra.mxu3 %v2125_v0  ;;  %v1964_v11 = vld [vmem:[#allocation7 + $0x2b8] sm:$0xff]  ;;  %v2573_v63 = vld [vmem:[#allocation7 + $0x15c0] sm:$0xff]  ;;  %v1930_v0 = vld [vmem:[#allocation7 + $0x1a8] sm:$0xff] }
 0x27d   :  { %3156 = vmatpush.msra.mxu0 %v2251_v5  ;;  %3012 = vmatpush.msra.mxu1 %v2278_v14  ;;  %v1957_v5 = vld [vmem:[#allocation7 + $0x280] sm:$0xff]  ;;  %v2210_v14 = vld [vmem:[#allocation7 + $0xa68] sm:$0xff] }
 0x27e   :  { %3188 = vmatpush.msra.mxu2 %v2531_v51  ;;  %3139 = vmatpush.msra.mxu3 %v2118_v7  ;;  %v2566_v51 = vld [vmem:[#allocation7 + $0x1588] sm:$0xff]  ;;  %v1923_v7 = vld [vmem:[#allocation7 + $0x170] sm:$0xff] }
 0x27f   :  { %3157 = vmatpush.msra.mxu0 %v2244_v52  ;;  %3013 = vmatpush.msra.mxu1 %v2271_v8  ;;  %v1950_v52 = vld [vmem:[#allocation7 + $0x248] sm:$0xff]  ;;  %v2203_v8 = vld [vmem:[#allocation7 + $0xa30] sm:$0xff] }
 0x280   :  { %3189 = vmatpush.msra.mxu2 %v2524_v9  ;;  %3140 = vmatpush.msra.mxu3 %v2111_v10  ;;  %v2559_v9 = vld [vmem:[#allocation7 + $0x1550] sm:$0xff]  ;;  %v1916_v10 = vld [vmem:[#allocation7 + $0x138] sm:$0xff] }
 0x281   :  { %3158 = vmatpush.msra.mxu0 %v2237_v12  ;;  %3014 = vmatpush.msra.mxu1 %v2264_v32  ;;  %v1943_v12 = vld [vmem:[#allocation7 + $0x210] sm:$0xff]  ;;  %v2196_v32 = vld [vmem:[#allocation7 + $0x9f8] sm:$0xff] }
 0x282   :  { %3190 = vmatpush.msra.mxu2 %v2517_v15  ;;  %3141 = vmatpush.msra.mxu3 %v2104_v17  ;;  %v2552_v15 = vld [vmem:[#allocation7 + $0x1518] sm:$0xff]  ;;  %v1909_v17 = vld [vmem:[#allocation7 + $0x100] sm:$0xff] }
 0x283   :  { %3159 = vmatpush.msra.mxu0 %v2230_v20  ;;  %3015 = vmatpush.msra.mxu1 %v2257_v22  ;;  %v1936_v20 = vld [vmem:[#allocation7 + $0x1d8] sm:$0xff]  ;;  %v2189_v22 = vld [vmem:[#allocation7 + $0x9c0] sm:$0xff] }
 0x284   :  { %3142 = vmatmul.f32.vlgmr.msra.gmra.mxu3 %v4122_v13  ;;  %3191 = vmatpush.msra.mxu2 %v2510_v23  ;;  %v2322_v23 = vld [vmem:[#allocation7 + $0xde8] sm:$0xff] }
 0x285   :  { %3208 = vmatpush.msrb.mxu3 %v2643_v6  ;;  %3160 = vmatpush.msra.mxu0 %v2223_v25  ;;  %v1902_v6 = vld [vmem:[#allocation7 + $0xc8] sm:$0xff]  ;;  %v1929_v25 = vld [vmem:[#allocation7 + $0x1a0] sm:$0xff] }
 0x286   :  { %3016 = vmatpush.msra.mxu1 %v2250_v16  ;;  %3192 = vmatpush.msra.mxu2 %v2503_v43  ;;  %v2182_v16 = vld [vmem:[#allocation7 + $0x988] sm:$0xff]  ;;  %v2315_v43 = vld [vmem:[#allocation7 + $0xdb0] sm:$0xff] }
 0x287   :  { %3209 = vmatpush.msrb.mxu3 %v2636_v28  ;;  %3161 = vmatpush.msra.mxu0 %v2216_v18  ;;  %v1895_v28 = vld [vmem:[#allocation7 + $0x90] sm:$0xff]  ;;  %v1922_v18 = vld [vmem:[#allocation7 + $0x168] sm:$0xff] }
 0x288   :  { %3017 = vmatpush.msra.mxu1 %v2243_v29  ;;  %3162 = vmatmul.f32.vlgmr.msra.gmra.mxu0 %v4126_v33  ;;  %v2175_v29 = vld [vmem:[#allocation7 + $0x950] sm:$0xff] }
 0x289   :  { %3193 = vmatpush.msra.mxu2 %v2496_v2  ;;  %3210 = vmatpush.msrb.mxu3 %v2629_v27  ;;  %v2308_v2 = vld [vmem:[#allocation7 + $0xd78] sm:$0xff] }
 0x28a   :  { %3226 = vmatpush.msrb.mxu0 %v1986_v30  ;;  %3018 = vmatpush.msra.mxu1 %v2236_v31  ;;  %v1888_v27 = vld [vmem:[#allocation7 + $0x58] sm:$0xff]  ;;  %v1915_v30 = vld [vmem:[#allocation7 + $0x130] sm:$0xff] }
 0x28b   :  { %3194 = vmatpush.msra.mxu2 %v2489_v61  ;;  %3211 = vmatpush.msrb.mxu3 %v2622_v41  ;;  %v2168_v31 = vld [vmem:[#allocation7 + $0x918] sm:$0xff]  ;;  %v2301_v61 = vld [vmem:[#allocation7 + $0xd40] sm:$0xff] }
 0x28c   :  { %3227 = vmatpush.msrb.mxu0 %v1979_v19  ;;  %3019 = vmatpush.msra.mxu1 %v2229_v35  ;;  %v1881_v41 = vld [vmem:[#allocation7 + $0x20] sm:$0xff]  ;;  %v1908_v19 = vld [vmem:[#allocation7 + $0xf8] sm:$0xff] }
 0x28d   :  { %3195 = vmatpush.msra.mxu2 %v2482_v37  ;;  %3212 = vmatpush.msrb.mxu3 %v2615_v54  ;;  %v2161_v35 = vld [vmem:[#allocation7 + $0x8e0] sm:$0xff]  ;;  %v2294_v37 = vld [vmem:[#allocation7 + $0xd08] sm:$0xff] }
 0x28e   :  { %3228 = vmatpush.msrb.mxu0 %v1972_v38  ;;  %3020 = vmatpush.msra.mxu1 %v2222_v40  ;;  %v2434_v54 = vld [vmem:[#allocation7 + $0x1168] sm:$0xff]  ;;  %v1901_v38 = vld [vmem:[#allocation7 + $0xc0] sm:$0xff] }
 0x28f   :  { %3196 = vmatpush.msra.mxu2 %v2475_v42  ;;  %3213 = vmatpush.msrb.mxu3 %v2608_v44  ;;  %v2154_v40 = vld [vmem:[#allocation7 + $0x8a8] sm:$0xff]  ;;  %v2287_v42 = vld [vmem:[#allocation7 + $0xcd0] sm:$0xff] }
 0x290   :  { %3229 = vmatpush.msrb.mxu0 %v1965_v45  ;;  %3021 = vmatpush.msra.mxu1 %v2215_v46  ;;  %v2427_v44 = vld [vmem:[#allocation7 + $0x1130] sm:$0xff]  ;;  %v1894_v45 = vld [vmem:[#allocation7 + $0x88] sm:$0xff] }
 0x291   :  { %3197 = vmatpush.msra.mxu2 %v2468_v53  ;;  %3214 = vmatpush.msrb.mxu3 %v2601_v39  ;;  %v2147_v46 = vld [vmem:[#allocation7 + $0x870] sm:$0xff]  ;;  %v2280_v53 = vld [vmem:[#allocation7 + $0xc98] sm:$0xff] }
 0x292   :  { %3230 = vmatpush.msrb.mxu0 %v1958_v47  ;;  %3022 = vmatmul.f32.vlgmr.msra.gmra.mxu1 %v4126_v33  ;;  %v2420_v39 = vld [vmem:[#allocation7 + $0x10f8] sm:$0xff]  ;;  %v1887_v47 = vld [vmem:[#allocation7 + $0x50] sm:$0xff] }
 0x293   :  { %3198 = vmatpush.msra.mxu2 %v2461_v60  ;;  %3086 = vmatpush.msrb.mxu1 %v1985_v48  ;;  %v2140_v60 = vld [vmem:[#allocation7 + $0x838] sm:$0xff]  ;;  %v2273_v48 = vld [vmem:[#allocation7 + $0xc60] sm:$0xff] }
 0x294   :  { %3215 = vmatpush.msrb.mxu3 %v2594_v49  ;;  %3231 = vmatpush.msrb.mxu0 %v1951_v1  ;;  %v2413_v49 = vld [vmem:[#allocation7 + $0x10c0] sm:$0xff]  ;;  %v1880_v1 = vld [vmem:[#allocation7 + $0x18] sm:$0xff] }
 0x295   :  { %3199 = vmatpush.msra.mxu2 %v2454_v56  ;;  %3087 = vmatpush.msrb.mxu1 %v1978_v26  ;;  %v2133_v56 = vld [vmem:[#allocation7 + $0x800] sm:$0xff]  ;;  %v2266_v26 = vld [vmem:[#allocation7 + $0xc28] sm:$0xff] }
 0x296   :  { %3216 = vmatpush.msrb.mxu3 %v2587_v55  ;;  %3232 = vmatpush.msrb.mxu0 %v1944_v57  ;;  %v2406_v55 = vld [vmem:[#allocation7 + $0x1088] sm:$0xff] }
 0x297   :  { %3200 = vmatpush.msra.mxu2 %v2447_v58  ;;  %3088 = vmatpush.msrb.mxu1 %v1971_v3  ;;  %v2126_v57 = vld [vmem:[#allocation7 + $0x7c8] sm:$0xff]  ;;  %v2433_v58 = vld [vmem:[#allocation7 + $0x1160] sm:$0xff]  ;;  %v2259_v3 = vld [vmem:[#allocation7 + $0xbf0] sm:$0xff] }
 0x298   :  { %3217 = vmatpush.msrb.mxu3 %v2580_v59  ;;  %3233 = vmatpush.msrb.mxu0 %v1937_v34  ;;  %v2399_v59 = vld [vmem:[#allocation7 + $0x1050] sm:$0xff] }
 0x299   :  { %3201 = vmatpush.msra.mxu2 %v2440_v62  ;;  %3089 = vmatpush.msrb.mxu1 %v1964_v11  ;;  %v2119_v34 = vld [vmem:[#allocation7 + $0x790] sm:$0xff]  ;;  %v2426_v62 = vld [vmem:[#allocation7 + $0x1128] sm:$0xff]  ;;  %v2252_v11 = vld [vmem:[#allocation7 + $0xbb8] sm:$0xff] }
 0x29a   :  { %3218 = vmatpush.msrb.mxu3 %v2573_v63  ;;  %3234 = vmatpush.msrb.mxu0 %v1930_v0  ;;  %v4164_v63 = vld [vmem:[#allocation10] sm:$0x7f] }
 0x29b   :  { %3202 = vmatmul.f32.vlgmr.msra.gmra.mxu2 %v4135_v24  ;;  %3090 = vmatpush.msrb.mxu1 %v1957_v5  ;;  %v2392_v0 = vld [vmem:[#allocation7 + $0x1018] sm:$0xff] }
 0x29c   :  { %3266 = vmatpush.msrb.mxu2 %v2210_v14  ;;  %3219 = vmatpush.msrb.mxu3 %v2566_v51  ;;  %v2112_v5 = vld [vmem:[#allocation7 + $0x758] sm:$0xff]  ;;  %v2419_v14 = vld [vmem:[#allocation7 + $0x10f0] sm:$0xff]  ;;  %v2245_v51 = vld [vmem:[#allocation7 + $0xb80] sm:$0xff] }
 0x29d   :  { %3235 = vmatpush.msrb.mxu0 %v1923_v7  ;;  %3091 = vmatpush.msrb.mxu1 %v1950_v52  ;;  %v2385_v7 = vld [vmem:[#allocation7 + $0xfe0] sm:$0xff] }
 0x29e   :  { %3267 = vmatpush.msrb.mxu2 %v2203_v8  ;;  %3220 = vmatpush.msrb.mxu3 %v2559_v9  ;;  %v2105_v52 = vld [vmem:[#allocation7 + $0x720] sm:$0xff]  ;;  %v2649_v8 = vperm.slane %v4164_v63, 0  ;;  %v2412_v9 = vld [vmem:[#allocation7 + $0x10b8] sm:$0xff] }
 0x29f   :  { %3236 = vmatpush.msrb.mxu0 %v1916_v10  ;;  %3092 = vmatpush.msrb.mxu1 %v1943_v12  ;;  %v2238_v10 = vld [vmem:[#allocation7 + $0xb48] sm:$0xff]  ;;  %v2683_v12 = vpop.f32.mrf.mxu0 }
 0x2a0   :  { %3268 = vmatpush.msrb.mxu2 %v2196_v32  ;;  %3221 = vmatpush.msrb.mxu3 %v2552_v15  ;;  %v2378_v32 = vld [vmem:[#allocation7 + $0xfa8] sm:$0xff]  ;;  %v2405_v15 = vld [vmem:[#allocation7 + $0x1080] sm:$0xff] }
 0x2a1   :  { %3237 = vmatpush.msrb.mxu0 %v1909_v17  ;;  %3093 = vmatpush.msrb.mxu1 %v1936_v20  ;;  %v2644_v17 = vld [vmem:[#allocation7 + $0x17f8] sm:$0xff]  ;;  %v2703_v20 = vpop.f32.mrf.mxu2 }
 0x2a2   :  { %3696 = vmatmul.msk.f32.vlgmr.msrb.gmra.mxu3 %vm886_vm0, %v4144_v36  ;;  %3269 = vmatpush.msrb.mxu2 %v2189_v22  ;;  %v2231_v22 = vld [vmem:[#allocation7 + $0xb10] sm:$0xff] }
 0x2a3   :  { %3286 = vmatpush.msra.mxu3 %v2322_v23  ;;  %3238 = vmatpush.msrb.mxu0 %v1902_v6  ;;  %v2371_v23 = vld [vmem:[#allocation7 + $0xf70] sm:$0xff]  ;;  %v2684_v6 = vadd.f32 %v2683_v12, %v2649_v8  ;;  %v1945_v8 = vld [vmem:[#allocation7 + $0x220] sm:$0xff]  ;;  %v2574_v12 = vld [vmem:[#allocation7 + $0x15c8] sm:$0xff] }
 0x2a4   :  { %3094 = vmatpush.msrb.mxu1 %v1929_v25  ;;  %3270 = vmatpush.msrb.mxu2 %v2182_v16  ;;  %v2398_v25 = vld [vmem:[#allocation7 + $0x1048] sm:$0xff]  ;;  %v2637_v16 = vld [vmem:[#allocation7 + $0x17c0] sm:$0xff] }
 0x2a5   :  { %3287 = vmatpush.msra.mxu3 %v2315_v43  ;;  %3239 = vmatpush.msrb.mxu0 %v1895_v28  ;;  %v2224_v43 = vld [vmem:[#allocation7 + $0xad8] sm:$0xff] }
 0x2a6   :  { %3095 = vmatpush.msrb.mxu1 %v1922_v18  ;;  %3271 = vmatpush.msrb.mxu2 %v2175_v29  ;;  %v2364_v28 = vld [vmem:[#allocation7 + $0xf38] sm:$0xff]  ;;  %v2704_v18 = vadd.f32 %v2703_v20, %v2684_v6  ;;  %v2391_v29 = vld [vmem:[#allocation7 + $0x1010] sm:$0xff] }
 0x2a7   :  { %3288 = vmatpush.msra.mxu3 %v2308_v2  ;;  %3240 = vmatpush.msrb.mxu0 %v1888_v27  ;;  %v2630_v2 = vld [vmem:[#allocation7 + $0x1788] sm:$0xff]  ;;  %v2217_v27 = vld [vmem:[#allocation7 + $0xaa0] sm:$0xff]  ;;  %v2567_v20 = vld [vmem:[#allocation7 + $0x1590] sm:$0xff] }
 0x2a8   :  { %3096 = vmatpush.msrb.mxu1 %v1915_v30  ;;  %3272 = vmatpush.msrb.mxu2 %v2168_v31  ;;  %v2357_v30 = vld [vmem:[#allocation7 + $0xf00] sm:$0xff]  ;;  %v2384_v31 = vld [vmem:[#allocation7 + $0xfd8] sm:$0xff] }
 0x2a9   :  { %3289 = vmatpush.msra.mxu3 %v2301_v61  ;;  %3241 = vmatpush.msrb.mxu0 %v1881_v41  ;;  %v2723_v61 = vpop.f32.mrf.mxu1  ;;  %v2743_v41 = vpop.f32.mrf.mxu3  ;;  %v2560_v6 = vld [vmem:[#allocation7 + $0x1558] sm:$0xff] }
 0x2aa   :  { %3097 = vmatpush.msrb.mxu1 %v1908_v19  ;;  %3242 = vmatmul.f32.vlgmr.msrb.gmra.mxu0 %v4114_v50  ;;  %v2623_v19 = vld [vmem:[#allocation7 + $0x1750] sm:$0xff] }
 0x2ab   :  { %3273 = vmatpush.msrb.mxu2 %v2161_v35  ;;  %3290 = vmatpush.msra.mxu3 %v2294_v37  ;;  %v1987_v35 = vld [vmem:[#allocation7 + $0x370] sm:$0xff]  ;;  %v2724_v37 = vadd.f32 %v2723_v61, %v2704_v18  ;;  %v2553_v18 = vld [vmem:[#allocation7 + $0x1520] sm:$0xff] }
 0x2ac   :  { %3306 = vmatpush.msra.mxu0 %v2434_v54  ;;  %3098 = vmatpush.msrb.mxu1 %v1901_v38  ;;  %v2350_v54 = vld [vmem:[#allocation7 + $0xec8] sm:$0xff]  ;;  %v2377_v38 = vld [vmem:[#allocation7 + $0xfa0] sm:$0xff] }
 0x2ad   :  { %3274 = vmatpush.msrb.mxu2 %v2154_v40  ;;  %3291 = vmatpush.msra.mxu3 %v2287_v42  ;;  %v2616_v40 = vld [vmem:[#allocation7 + $0x1718] sm:$0xff] }
 0x2ae   :  { %3307 = vmatpush.msra.mxu0 %v2427_v44  ;;  %3099 = vmatpush.msrb.mxu1 %v1894_v45  ;;  %v1980_v42 = vld [vmem:[#allocation7 + $0x338] sm:$0xff]  ;;  %v2744_v44 = vadd.f32 %v2743_v41, %v2724_v37  ;;  %v2343_v45 = vld [vmem:[#allocation7 + $0xe90] sm:$0xff]  ;;  %v2057_v41 = vld [vmem:[#allocation7 + $0x5a0] sm:$0xff] }
 0x2af   :  { %3275 = vmatpush.msrb.mxu2 %v2147_v46  ;;  %3292 = vmatpush.msra.mxu3 %v2280_v53  ;;  %v2370_v46 = vld [vmem:[#allocation7 + $0xf68] sm:$0xff]  ;;  %v2763_v53 = vpop.f32.mrf.mxu0 }
 0x2b0   :  { %3308 = vmatpush.msra.mxu0 %v2420_v39  ;;  %3100 = vmatpush.msrb.mxu1 %v1887_v47  ;;  %v2609_v39 = vld [vmem:[#allocation7 + $0x16e0] sm:$0xff]  ;;  %v1910_v37 = vld [vmem:[#allocation7 + $0x108] sm:$0xff] }
 0x2b1   :  { %3276 = vmatpush.msrb.mxu2 %v2140_v60  ;;  %3293 = vmatpush.msra.mxu3 %v2273_v48  ;;  %v1973_v47 = vld [vmem:[#allocation7 + $0x300] sm:$0xff]  ;;  %v2336_v60 = vld [vmem:[#allocation7 + $0xe58] sm:$0xff]  ;;  %v2363_v48 = vld [vmem:[#allocation7 + $0xf30] sm:$0xff]  ;;  %v2823_v61 = vpop.f32.mrf.mxu3 }
 0x2b2   :  { %3309 = vmatpush.msra.mxu0 %v2413_v49  ;;  %3101 = vmatpush.msrb.mxu1 %v1880_v1  ;;  %v2783_v49 = vpop.f32.mrf.mxu2  ;;  %v2602_v1 = vld [vmem:[#allocation7 + $0x16a8] sm:$0xff] }
 0x2b3   :  { %3277 = vmatpush.msrb.mxu2 %v2133_v56  ;;  %3294 = vmatpush.msra.mxu3 %v2266_v26  ;;  %v1966_v56 = vld [vmem:[#allocation7 + $0x2c8] sm:$0xff]  ;;  %v2764_v26 = vadd.f32 %v2763_v53, %v2744_v44 }
 0x2b4   :  { %3310 = vmatpush.msra.mxu0 %v2406_v55  ;;  %3102 = vmatmul.f32.vlgmr.msrb.gmra.mxu1 %v4114_v50  ;;  %v2329_v55 = vld [vmem:[#allocation7 + $0xe20] sm:$0xff]  ;;  %v2070_v53 = vld [vmem:[#allocation7 + $0x608] sm:$0xff] }
 0x2b5   :  { %3278 = vmatpush.msrb.mxu2 %v2126_v57  ;;  %3166 = vmatpush.msra.mxu1 %v2433_v58  ;;  %v2356_v57 = vld [vmem:[#allocation7 + $0xef8] sm:$0xff]  ;;  %v2595_v58 = vld [vmem:[#allocation7 + $0x1670] sm:$0xff] }
 0x2b6   :  { %3295 = vmatpush.msra.mxu3 %v2259_v3  ;;  %3311 = vmatpush.msra.mxu0 %v2399_v59  ;;  %v2784_v3 = vadd.f32 %v2783_v49, %v2764_v26  ;;  %v1959_v59 = vld [vmem:[#allocation7 + $0x290] sm:$0xff]  ;;  %v1889_v26 = vld [vmem:[#allocation7 + $0x60] sm:$0xff] }
 0x2b7   :  { %3279 = vmatpush.msrb.mxu2 %v2119_v34  ;;  %3167 = vmatpush.msra.mxu1 %v2426_v62  ;;  %v2099_v34 = vld [vmem:[#allocation7 + $0x6f0] sm:$0xff]  ;;  %v2349_v62 = vld [vmem:[#allocation7 + $0xec0] sm:$0xff]  ;;  %v2843_v44 = vpop.f32.mrf.mxu0 }
 0x2b8   :  { %3296 = vmatpush.msra.mxu3 %v2252_v11  ;;  %3312 = vmatpush.msra.mxu0 %v2392_v0  ;;  %v2588_v11 = vld [vmem:[#allocation7 + $0x1638] sm:$0xff] }
 0x2b9   :  { %3280 = vmatpush.msrb.mxu2 %v2112_v5  ;;  %3168 = vmatpush.msra.mxu1 %v2419_v14  ;;  %v1952_v5 = vld [vmem:[#allocation7 + $0x258] sm:$0xff] }
 0x2ba   :  { %3297 = vmatpush.msra.mxu3 %v2245_v51  ;;  %3313 = vmatpush.msra.mxu0 %v2385_v7  ;;  %v2092_v14 = vld [vmem:[#allocation7 + $0x6b8] sm:$0xff]  ;;  %v2342_v7 = vld [vmem:[#allocation7 + $0xe88] sm:$0xff] }
 0x2bb   :  { %3281 = vmatpush.msrb.mxu2 %v2105_v52  ;;  %3169 = vmatpush.msra.mxu1 %v2412_v9  ;;  %v2581_v52 = vld [vmem:[#allocation7 + $0x1600] sm:$0xff] }
 0x2bc   :  { %3298 = vmatpush.msra.mxu3 %v2238_v10  ;;  %3314 = vmatpush.msra.mxu0 %v2378_v32  ;;  %v2085_v9 = vld [vmem:[#allocation7 + $0x680] sm:$0xff]  ;;  %v2335_v10 = vld [vmem:[#allocation7 + $0xe50] sm:$0xff]  ;;  %v1938_v32 = vld [vmem:[#allocation7 + $0x1e8] sm:$0xff] }
 0x2bd   :  { %3282 = vmatmul.f32.vlgmr.msrb.gmra.mxu2 %v4122_v13  ;;  %3170 = vmatpush.msra.mxu1 %v2405_v15  ;;  %v2078_v15 = vld [vmem:[#allocation7 + $0x648] sm:$0xff] }
 0x2be   :  { %3348 = vmatpush.msra.mxu2 %v2644_v17  ;;  %3299 = vmatpush.msra.mxu3 %v2231_v22  ;;  %v2328_v17 = vld [vmem:[#allocation7 + $0xe18] sm:$0xff]  ;;  %v1931_v22 = vld [vmem:[#allocation7 + $0x1b0] sm:$0xff] }
 0x2bf   :  { %3315 = vmatpush.msra.mxu0 %v2371_v23  ;;  %3171 = vmatpush.msra.mxu1 %v2398_v25  ;;  %v2071_v23 = vld [vmem:[#allocation7 + $0x610] sm:$0xff] }
 0x2c0   :  { %3349 = vmatpush.msra.mxu2 %v2637_v16  ;;  %3300 = vmatpush.msra.mxu3 %v2224_v43  ;;  %v2098_v16 = vld [vmem:[#allocation7 + $0x6e8] sm:$0xff]  ;;  %v1924_v43 = vld [vmem:[#allocation7 + $0x178] sm:$0xff] }
 0x2c1   :  { %3316 = vmatpush.msra.mxu0 %v2364_v28  ;;  %3172 = vmatpush.msra.mxu1 %v2391_v29  ;;  %v2064_v28 = vld [vmem:[#allocation7 + $0x5d8] sm:$0xff] }
 0x2c2   :  { %3350 = vmatpush.msra.mxu2 %v2630_v2  ;;  %3301 = vmatpush.msra.mxu3 %v2217_v27  ;;  %v3751_v29 = vld [vmem:[#allocation2] sm:$0xff]  ;;  %v2650_v27 = vperm.slane %v4164_v63, 1 }
 0x2c3   :  { %3317 = vmatpush.msra.mxu0 %v2357_v30  ;;  %3173 = vmatpush.msra.mxu1 %v2384_v31  ;;  %v2091_v30 = vld [vmem:[#allocation7 + $0x6b0] sm:$0xff]  ;;  %v1917_v31 = vld [vmem:[#allocation7 + $0x140] sm:$0xff] }
 0x2c4   :  { %3302 = vmatmul.f32.vlgmr.msra.gmra.mxu3 %v4126_v33  ;;  %3351 = vmatpush.msra.mxu2 %v2623_v19  ;;  %v2084_v19 = vld [vmem:[#allocation7 + $0x678] sm:$0xff] }
 0x2c5   :  { %3366 = vmatpush.msrb.mxu3 %v1987_v35  ;;  %3318 = vmatpush.msra.mxu0 %v2350_v54  ;;  %v2323_v35 = vld [vmem:[#allocation7 + $0xdf0] sm:$0xff]  ;;  %v2050_v54 = vld [vmem:[#allocation7 + $0x568] sm:$0xff] }
 0x2c6   :  { %3174 = vmatpush.msra.mxu1 %v2377_v38  ;;  %3352 = vmatpush.msra.mxu2 %v2616_v40  ;;  %v2824_v38 = vadd.f32 %v2823_v61, %v2650_v27  ;;  %v2077_v40 = vld [vmem:[#allocation7 + $0x640] sm:$0xff]  ;;  %v2014_v27 = vld [vmem:[#allocation7 + $0x448] sm:$0xff]  ;;  %v2400_v61 = vld [vmem:[#allocation7 + $0x1058] sm:$0xff] }
 0x2c7   :  { %3367 = vmatpush.msrb.mxu3 %v1980_v42  ;;  %3319 = vmatpush.msra.mxu0 %v2343_v45  ;;  %v2316_v42 = vld [vmem:[#allocation7 + $0xdb8] sm:$0xff]  ;;  %v1903_v45 = vld [vmem:[#allocation7 + $0xd0] sm:$0xff] }
 0x2c8   :  { %3175 = vmatpush.msra.mxu1 %v2370_v46  ;;  %3353 = vmatpush.msra.mxu2 %v2609_v39  ;;  %v2043_v46 = vld [vmem:[#allocation7 + $0x530] sm:$0xff]  ;;  %v2309_v39 = vld [vmem:[#allocation7 + $0xd80] sm:$0xff]  ;;  %v2844_v49 = vadd.f32 %v2843_v44, %v2824_v38  ;;  %v2386_v44 = vld [vmem:[#allocation7 + $0xfe8] sm:$0xff] }
 0x2c9   :  { %3368 = vmatpush.msrb.mxu3 %v1973_v47  ;;  %3320 = vmatpush.msra.mxu0 %v2336_v60  ;;  %v1896_v47 = vld [vmem:[#allocation7 + $0x98] sm:$0xff]  ;;  %v2533_v38 = vld [vmem:[#allocation7 + $0x1480] sm:$0xff] }
 0x2ca   :  { %3176 = vmatpush.msra.mxu1 %v2363_v48  ;;  %3354 = vmatpush.msra.mxu2 %v2602_v1  ;;  %v2803_v0 = vpop.f32.mrf.mxu1  ;;  %v2036_v60 = vld [vmem:[#allocation7 + $0x4f8] sm:$0xff]  ;;  %v2063_v1 = vld [vmem:[#allocation7 + $0x5d0] sm:$0xff] }
 0x2cb   :  { %3369 = vmatpush.msrb.mxu3 %v1966_v56  ;;  %3321 = vmatpush.msra.mxu0 %v2329_v55  ;;  %v2804_v51 = vadd.f32 %v2803_v0, %v2784_v3  ;;  %v2302_v56 = vld [vmem:[#allocation7 + $0xd48] sm:$0xff]  ;;  %v2029_v55 = vld [vmem:[#allocation7 + $0x4c0] sm:$0xff]  ;;  %v2288_v0 = vld [vmem:[#allocation7 + $0xcd8] sm:$0xff] }
 0x2cc   :  { %3177 = vmatpush.msra.mxu1 %v2356_v57  ;;  %3322 = vmatmul.f32.vlgmr.msra.gmra.mxu0 %v4129_v21  ;;  %v2056_v57 = vld [vmem:[#allocation7 + $0x598] sm:$0xff] }
 0x2cd   :  { %3355 = vmatpush.msra.mxu2 %v2595_v58  ;;  %3370 = vmatpush.msrb.mxu3 %v1959_v59  ;;  %3722 = vtanh.f32 %v2804_v51  ;;  %v2295_v58 = vld [vmem:[#allocation7 + $0xd10] sm:$0xff]  ;;  %v1882_v59 = vld [vmem:[#allocation7 + $0x28] sm:$0xff] }
 0x2ce   :  { %3386 = vmatpush.msrb.mxu0 %v2099_v34  ;;  %3178 = vmatpush.msra.mxu1 %v2349_v62  ;;  %v2022_v34 = vld [vmem:[#allocation7 + $0x488] sm:$0xff]  ;;  %v2049_v62 = vld [vmem:[#allocation7 + $0x560] sm:$0xff]  ;;  %v2015_v51 = vld [vmem:[#allocation7 + $0x450] sm:$0xff] }
 0x2cf   :  { %3356 = vmatpush.msra.mxu2 %v2588_v11  ;;  %3371 = vmatpush.msrb.mxu3 %v1952_v5  ;;  %v2883_v11 = vpop.f32.mrf.mxu2  ;;  %v2435_v5 = vld [vmem:[#allocation7 + $0x1170] sm:$0xff] }
 0x2d0   :  { %3387 = vmatpush.msrb.mxu0 %v2092_v14  ;;  %3179 = vmatpush.msra.mxu1 %v2342_v7  ;;  %v2042_v7 = vld [vmem:[#allocation7 + $0x528] sm:$0xff] }
 0x2d1   :  { %3357 = vmatpush.msra.mxu2 %v2581_v52  ;;  %3372 = vmatpush.msrb.mxu3 %v1945_v8  ;;  %v2281_v52 = vld [vmem:[#allocation7 + $0xca0] sm:$0xff]  ;;  %v2428_v8 = vld [vmem:[#allocation7 + $0x1138] sm:$0xff] }
 0x2d2   :  { %3388 = vmatpush.msrb.mxu0 %v2085_v9  ;;  %3180 = vmatpush.msra.mxu1 %v2335_v10  ;;  %v2008_v9 = vld [vmem:[#allocation7 + $0x418] sm:$0xff]  ;;  %v2035_v10 = vld [vmem:[#allocation7 + $0x4f0] sm:$0xff] }
 0x2d3   :  { %3358 = vmatpush.msra.mxu2 %v2574_v12  ;;  %3373 = vmatpush.msrb.mxu3 %v1938_v32  ;;  %v3723_v25 = vpop.eup %3722  ;;  %v2903_v12 = vpop.f32.mrf.mxu3  ;;  %v2274_v32 = vld [vmem:[#allocation7 + $0xc68] sm:$0xff] }
 0x2d4   :  { %3389 = vmatpush.msrb.mxu0 %v2078_v15  ;;  %3181 = vmatpush.msra.mxu1 %v2328_v17  ;;  %v3653_v2 = vadd.f32 %v3751_v29, %v3723_v25  ;;  %v2421_v15 = vld [vmem:[#allocation7 + $0x1100] sm:$0xff]  ;;  %v1994_v25 = vld [vmem:[#allocation7 + $0x3a8] sm:$0xff]  ;;  %v2547_v29 = vld [vmem:[#allocation7 + $0x14f0] sm:$0xff] }
 0x2d5   :  { %3359 = vmatpush.msra.mxu2 %v2567_v20  ;;  %3374 = vmatpush.msrb.mxu3 %v1931_v22  ;;  %v2001_v17 = vld [vmem:[#allocation7 + $0x3e0] sm:$0xff]  ;;  %v2028_v20 = vld [vmem:[#allocation7 + $0x4b8] sm:$0xff] }
 0x2d6   :  { %3390 = vmatpush.msrb.mxu0 %v2071_v23  ;;  %3182 = vmatmul.f32.vlgmr.msra.gmra.mxu1 %v4129_v21  ;;  %3660 = vst [vmem:[#allocation11] sm:$0xff] %v3653_v2  ;;  %v2863_v48 = vpop.f32.mrf.mxu1  ;;  %v2267_v23 = vld [vmem:[#allocation7 + $0xc30] sm:$0xff] }
 0x2d7   :  { %3360 = vmatpush.msra.mxu2 %v2560_v6  ;;  %3246 = vmatpush.msrb.mxu1 %v2098_v16  ;;  %v2864_v3 = vadd.f32 %v2863_v48, %v2844_v49  ;;  %v2414_v6 = vld [vmem:[#allocation7 + $0x10c8] sm:$0xff]  ;;  %v2021_v16 = vld [vmem:[#allocation7 + $0x480] sm:$0xff] }
 0x2d8   :  { %3375 = vmatpush.msrb.mxu3 %v1924_v43  ;;  %3391 = vmatpush.msrb.mxu0 %v2064_v28  ;;  %v2923_v43 = vpop.f32.mrf.mxu0  ;;  %v2260_v28 = vld [vmem:[#allocation7 + $0xbf8] sm:$0xff]  ;;  %v2546_v49 = vld [vmem:[#allocation7 + $0x14e8] sm:$0xff] }
 0x2d9   :  { %3361 = vmatpush.msra.mxu2 %v2553_v18  ;;  %3247 = vmatpush.msrb.mxu1 %v2091_v30  ;;  %v2884_v14 = vadd.f32 %v2883_v11, %v2864_v3  ;;  %v2407_v18 = vld [vmem:[#allocation7 + $0x1090] sm:$0xff]  ;;  %v2253_v30 = vld [vmem:[#allocation7 + $0xbc0] sm:$0xff]  ;;  %v2358_v11 = vld [vmem:[#allocation7 + $0xf08] sm:$0xff] }
 0x2da   :  { %3376 = vmatpush.msrb.mxu3 %v1917_v31  ;;  %3392 = vmatpush.msrb.mxu0 %v2057_v41  ;;  %v2540_v41 = vld [vmem:[#allocation7 + $0x14b8] sm:$0xff]  ;;  %v2365_v3 = vld [vmem:[#allocation7 + $0xf40] sm:$0xff] }
 0x2db   :  { %3697 = vmatmul.msk.f32.vlgmr.msra.gmra.mxu2 %vm886_vm0, %v4144_v36  ;;  %3248 = vmatpush.msrb.mxu1 %v2084_v19  ;;  %v2904_v22 = vadd.f32 %v2903_v12, %v2884_v14  ;;  %v1981_v14 = vld [vmem:[#allocation7 + $0x340] sm:$0xff]  ;;  %v2511_v12 = vld [vmem:[#allocation7 + $0x13d0] sm:$0xff] }
 0x2dc   :  { %3426 = vmatpush.msrb.mxu2 %v2323_v35  ;;  %3377 = vmatpush.msrb.mxu3 %v1910_v37  ;;  %v2007_v35 = vld [vmem:[#allocation7 + $0x410] sm:$0xff]  ;;  %v2246_v37 = vld [vmem:[#allocation7 + $0xb88] sm:$0xff] }
 0x2dd   :  { %3393 = vmatpush.msrb.mxu0 %v2050_v54  ;;  %3249 = vmatpush.msrb.mxu1 %v2077_v40  ;;  %v2924_v2 = vadd.f32 %v2923_v43, %v2904_v22  ;;  %v2393_v54 = vld [vmem:[#allocation7 + $0x1020] sm:$0xff]  ;;  %v2000_v40 = vld [vmem:[#allocation7 + $0x3d8] sm:$0xff]  ;;  %v2963_v43 = vpop.f32.mrf.mxu2 }
 0x2de   :  { %3427 = vmatpush.msrb.mxu2 %v2316_v42  ;;  %3378 = vmatpush.msrb.mxu3 %v1903_v45  ;;  %v2239_v42 = vld [vmem:[#allocation7 + $0xb50] sm:$0xff]  ;;  %v2526_v45 = vld [vmem:[#allocation7 + $0x1448] sm:$0xff]  ;;  %v1960_v22 = vld [vmem:[#allocation7 + $0x298] sm:$0xff] }
 0x2df   :  { %3394 = vmatpush.msrb.mxu0 %v2043_v46  ;;  %3250 = vmatpush.msrb.mxu1 %v2070_v53  ;;  %v1993_v46 = vld [vmem:[#allocation7 + $0x3a0] sm:$0xff]  ;;  %v2232_v53 = vld [vmem:[#allocation7 + $0xb18] sm:$0xff] }
 0x2e0   :  { %3428 = vmatpush.msrb.mxu2 %v2309_v39  ;;  %3379 = vmatpush.msrb.mxu3 %v1896_v47  ;;  %v2379_v39 = vld [vmem:[#allocation7 + $0xfb0] sm:$0xff] }
 0x2e1   :  { %3395 = vmatpush.msrb.mxu0 %v2036_v60  ;;  %3251 = vmatpush.msrb.mxu1 %v2063_v1  ;;  %v2519_v47 = vld [vmem:[#allocation7 + $0x1410] sm:$0xff]  ;;  %v2225_v60 = vld [vmem:[#allocation7 + $0xae0] sm:$0xff]  ;;  %v2372_v1 = vld [vmem:[#allocation7 + $0xf78] sm:$0xff] }
 0x2e2   :  { %3429 = vmatpush.msrb.mxu2 %v2302_v56  ;;  %3380 = vmatpush.msrb.mxu3 %v1889_v26  ;;  %v3752_v56 = vld [vmem:[#allocation2 + $0x8] sm:$0xff] }
 0x2e3   :  { %3396 = vmatpush.msrb.mxu0 %v2029_v55  ;;  %3252 = vmatpush.msrb.mxu1 %v2056_v57  ;;  %v2512_v55 = vld [vmem:[#allocation7 + $0x13d8] sm:$0xff]  ;;  %v2218_v57 = vld [vmem:[#allocation7 + $0xaa8] sm:$0xff] }
 0x2e4   :  { %3430 = vmatpush.msrb.mxu2 %v2295_v58  ;;  %3381 = vmatpush.msrb.mxu3 %v1882_v59  ;;  %v2539_v58 = vld [vmem:[#allocation7 + $0x14b0] sm:$0xff]  ;;  %v2505_v59 = vld [vmem:[#allocation7 + $0x13a0] sm:$0xff] }
 0x2e5   :  { %3397 = vmatpush.msrb.mxu0 %v2022_v34  ;;  %3253 = vmatpush.msrb.mxu1 %v2049_v62  ;;  %v2532_v34 = vld [vmem:[#allocation7 + $0x1478] sm:$0xff] }
 0x2e6   :  { %3382 = vmatmul.f32.vlgmr.msrb.gmra.mxu3 %v4114_v50  ;;  %3431 = vmatpush.msrb.mxu2 %v2288_v0  ;;  %v1988_v62 = vld [vmem:[#allocation7 + $0x378] sm:$0xff]  ;;  %v2498_v0 = vld [vmem:[#allocation7 + $0x1368] sm:$0xff] }
 0x2e7   :  { %3446 = vmatpush.msra.mxu3 %v2435_v5  ;;  %3398 = vmatpush.msrb.mxu0 %v2015_v51  ;;  %v2525_v5 = vld [vmem:[#allocation7 + $0x1440] sm:$0xff]  ;;  %v2351_v51 = vld [vmem:[#allocation7 + $0xed0] sm:$0xff] }
 0x2e8   :  { %3254 = vmatpush.msrb.mxu1 %v2042_v7  ;;  %3432 = vmatpush.msrb.mxu2 %v2281_v52  ;;  %v2491_v7 = vld [vmem:[#allocation7 + $0x1330] sm:$0xff]  ;;  %v2518_v52 = vld [vmem:[#allocation7 + $0x1408] sm:$0xff] }
 0x2e9   :  { %3447 = vmatpush.msra.mxu3 %v2428_v8  ;;  %3399 = vmatpush.msrb.mxu0 %v2008_v9  ;;  %v1974_v8 = vld [vmem:[#allocation7 + $0x308] sm:$0xff]  ;;  %v2344_v9 = vld [vmem:[#allocation7 + $0xe98] sm:$0xff] }
 0x2ea   :  { %3255 = vmatpush.msrb.mxu1 %v2035_v10  ;;  %3433 = vmatpush.msrb.mxu2 %v2274_v32  ;;  %v2484_v10 = vld [vmem:[#allocation7 + $0x12f8] sm:$0xff]  ;;  %v1967_v32 = vld [vmem:[#allocation7 + $0x2d0] sm:$0xff] }
 0x2eb   :  { %3448 = vmatpush.msra.mxu3 %v2421_v15  ;;  %3400 = vmatpush.msrb.mxu0 %v2001_v17  ;;  %v2337_v15 = vld [vmem:[#allocation7 + $0xe60] sm:$0xff] }
 0x2ec   :  { %3256 = vmatpush.msrb.mxu1 %v2028_v20  ;;  %3434 = vmatpush.msrb.mxu2 %v2267_v23  ;;  %v2477_v17 = vld [vmem:[#allocation7 + $0x12c0] sm:$0xff]  ;;  %v2504_v20 = vld [vmem:[#allocation7 + $0x1398] sm:$0xff]  ;;  %v2330_v23 = vld [vmem:[#allocation7 + $0xe28] sm:$0xff] }
 0x2ed   :  { %3449 = vmatpush.msra.mxu3 %v2414_v6  ;;  %3401 = vmatpush.msrb.mxu0 %v1994_v25  ;;  %v2943_v31 = vpop.f32.mrf.mxu1  ;;  %v2470_v6 = vld [vmem:[#allocation7 + $0x1288] sm:$0xff]  ;;  %v2651_v25 = vperm.slane %v4164_v63, 2  ;;  %v2456_v63 = vld [vmem:[#allocation7 + $0x1218] sm:$0xff] }
 0x2ee   :  { %3257 = vmatpush.msrb.mxu1 %v2021_v16  ;;  %3402 = vmatmul.f32.vlgmr.msrb.gmra.mxu0 %v4118_v4  ;;  %v2944_v19 = vadd.f32 %v2943_v31, %v2924_v2  ;;  %v2497_v16 = vld [vmem:[#allocation7 + $0x1360] sm:$0xff]  ;;  %v2490_v2 = vld [vmem:[#allocation7 + $0x1328] sm:$0xff] }
 0x2ef   :  { %3435 = vmatpush.msrb.mxu2 %v2260_v28  ;;  %3450 = vmatpush.msra.mxu3 %v2407_v18  ;;  %v1953_v28 = vld [vmem:[#allocation7 + $0x260] sm:$0xff]  ;;  %v2100_v18 = vld [vmem:[#allocation7 + $0x6f8] sm:$0xff] }
 0x2f0   :  { %3466 = vmatpush.msra.mxu0 %v2547_v29  ;;  %3258 = vmatpush.msrb.mxu1 %v2014_v27  ;;  %3724 = vtanh.f32 %v2944_v19  ;;  %v2463_v29 = vld [vmem:[#allocation7 + $0x1250] sm:$0xff]  ;;  %v2983_v27 = vpop.f32.mrf.mxu3  ;;  %v2093_v31 = vld [vmem:[#allocation7 + $0x6c0] sm:$0xff] }
 0x2f1   :  { %3436 = vmatpush.msrb.mxu2 %v2253_v30  ;;  %3451 = vmatpush.msra.mxu3 %v2400_v61  ;;  %v1946_v30 = vld [vmem:[#allocation7 + $0x228] sm:$0xff]  ;;  %v2964_v61 = vadd.f32 %v2963_v43, %v2651_v25  ;;  %v1939_v19 = vld [vmem:[#allocation7 + $0x1f0] sm:$0xff]  ;;  %v2197_v43 = vld [vmem:[#allocation7 + $0xa00] sm:$0xff] }
 0x2f2   :  { %3467 = vmatpush.msra.mxu0 %v2540_v41  ;;  %3259 = vmatpush.msrb.mxu1 %v2007_v35  ;;  %v2483_v41 = vld [vmem:[#allocation7 + $0x12f0] sm:$0xff]  ;;  %v2086_v35 = vld [vmem:[#allocation7 + $0x688] sm:$0xff] }
 0x2f3   :  { %3437 = vmatpush.msrb.mxu2 %v2246_v37  ;;  %3452 = vmatpush.msra.mxu3 %v2393_v54  ;;  %v2984_v37 = vadd.f32 %v2983_v27, %v2964_v61  ;;  %v2449_v54 = vld [vmem:[#allocation7 + $0x11e0] sm:$0xff]  ;;  %v2030_v25 = vld [vmem:[#allocation7 + $0x4c8] sm:$0xff] }
 0x2f4   :  { %3468 = vmatpush.msra.mxu0 %v2533_v38  ;;  %3260 = vmatpush.msrb.mxu1 %v2000_v40  ;;  %v2476_v38 = vld [vmem:[#allocation7 + $0x12b8] sm:$0xff]  ;;  %v3003_v40 = vpop.f32.mrf.mxu0  ;;  %v2190_v27 = vld [vmem:[#allocation7 + $0x9c8] sm:$0xff] }
 0x2f5   :  { %3438 = vmatpush.msrb.mxu2 %v2239_v42  ;;  %3453 = vmatpush.msra.mxu3 %v2386_v44  ;;  %v1932_v42 = vld [vmem:[#allocation7 + $0x1b8] sm:$0xff]  ;;  %v2079_v44 = vld [vmem:[#allocation7 + $0x650] sm:$0xff] }
 0x2f6   :  { %3469 = vmatpush.msra.mxu0 %v2526_v45  ;;  %v3725_v48 = vpop.eup %3724  ;;  %3261 = vmatpush.msrb.mxu1 %v1993_v46  ;;  %v2442_v45 = vld [vmem:[#allocation7 + $0x11a8] sm:$0xff]  ;;  %v2469_v46 = vld [vmem:[#allocation7 + $0x1280] sm:$0xff] }
 0x2f7   :  { %3439 = vmatpush.msrb.mxu2 %v2232_v53  ;;  %3454 = vmatpush.msra.mxu3 %v2379_v39  ;;  %v3654_v26 = vadd.f32 %v3752_v56, %v3725_v48  ;;  %v1925_v53 = vld [vmem:[#allocation7 + $0x180] sm:$0xff]  ;;  %v3004_v39 = vadd.f32 %v3003_v40, %v2984_v37  ;;  %v2462_v48 = vld [vmem:[#allocation7 + $0x1248] sm:$0xff] }
 0x2f8   :  { %3470 = vmatpush.msra.mxu0 %v2519_v47  ;;  %3262 = vmatmul.f32.vlgmr.msrb.gmra.mxu1 %v4118_v4  ;;  %v2072_v47 = vld [vmem:[#allocation7 + $0x618] sm:$0xff]  ;;  %v2065_v56 = vld [vmem:[#allocation7 + $0x5e0] sm:$0xff]  ;;  %v2002_v40 = vld [vmem:[#allocation7 + $0x3e8] sm:$0xff] }
 0x2f9   :  { %3440 = vmatpush.msrb.mxu2 %v2225_v60  ;;  %3326 = vmatpush.msra.mxu1 %v2546_v49  ;;  %3661 = vst [vmem:[#allocation11 + $0x8] sm:$0xff] %v3654_v26  ;;  %v2212_v60 = vld [vmem:[#allocation7 + $0xa78] sm:$0xff]  ;;  %v1918_v49 = vld [vmem:[#allocation7 + $0x148] sm:$0xff]  ;;  %v2205_v26 = vld [vmem:[#allocation7 + $0xa40] sm:$0xff] }
 0x2fa   :  { %3455 = vmatpush.msra.mxu3 %v2372_v1  ;;  %3471 = vmatpush.msra.mxu0 %v2512_v55  ;;  %v2009_v37 = vld [vmem:[#allocation7 + $0x420] sm:$0xff] }
 0x2fb   :  { %3441 = vmatpush.msrb.mxu2 %v2218_v57  ;;  %3327 = vmatpush.msra.mxu1 %v2539_v58  ;;  %v3043_v57 = vpop.f32.mrf.mxu2  ;;  %v2455_v58 = vld [vmem:[#allocation7 + $0x1210] sm:$0xff] }
 0x2fc   :  { %3456 = vmatpush.msra.mxu3 %v2365_v3  ;;  %3472 = vmatpush.msra.mxu0 %v2505_v59  ;;  %v1911_v3 = vld [vmem:[#allocation7 + $0x110] sm:$0xff]  ;;  %v2058_v59 = vld [vmem:[#allocation7 + $0x5a8] sm:$0xff] }
 0x2fd   :  { %3442 = vmatmul.f32.vlgmr.msrb.gmra.mxu2 %v4126_v33  ;;  %3328 = vmatpush.msra.mxu1 %v2532_v34  ;;  %v2198_v34 = vld [vmem:[#allocation7 + $0xa08] sm:$0xff] }
 0x2fe   :  { %3506 = vmatpush.msra.mxu2 %v1988_v62  ;;  %3457 = vmatpush.msra.mxu3 %v2358_v11  ;;  %v3063_v11 = vpop.f32.mrf.mxu3 }
 0x2ff   :  { %3473 = vmatpush.msra.mxu0 %v2498_v0  ;;  %3329 = vmatpush.msra.mxu1 %v2525_v5  ;;  %v2448_v0 = vld [vmem:[#allocation7 + $0x11d8] sm:$0xff] }
 0x300   :  { %3507 = vmatpush.msra.mxu2 %v1981_v14  ;;  %3458 = vmatpush.msra.mxu3 %v2351_v51  ;;  %v1904_v5 = vld [vmem:[#allocation7 + $0xd8] sm:$0xff]  ;;  %v2051_v14 = vld [vmem:[#allocation7 + $0x570] sm:$0xff] }
 0x301   :  { %3474 = vmatpush.msra.mxu0 %v2491_v7  ;;  %3330 = vmatpush.msra.mxu1 %v2518_v52  ;;  %v2191_v51 = vld [vmem:[#allocation7 + $0x9d0] sm:$0xff]  ;;  %v3083_v52 = vpop.f32.mrf.mxu0 }
 0x302   :  { %3508 = vmatpush.msra.mxu2 %v1974_v8  ;;  %3459 = vmatpush.msra.mxu3 %v2344_v9  ;;  %v2441_v8 = vld [vmem:[#allocation7 + $0x11a0] sm:$0xff] }
 0x303   :  { %3475 = vmatpush.msra.mxu0 %v2484_v10  ;;  %3331 = vmatpush.msra.mxu1 %v2511_v12  ;;  %v1897_v9 = vld [vmem:[#allocation7 + $0xa0] sm:$0xff]  ;;  %v2044_v10 = vld [vmem:[#allocation7 + $0x538] sm:$0xff] }
 0x304   :  { %3509 = vmatpush.msra.mxu2 %v1967_v32  ;;  %3460 = vmatpush.msra.mxu3 %v2337_v15  ;;  %v2184_v12 = vld [vmem:[#allocation7 + $0x998] sm:$0xff]  ;;  %v1890_v15 = vld [vmem:[#allocation7 + $0x68] sm:$0xff] }
 0x305   :  { %3476 = vmatpush.msra.mxu0 %v2477_v17  ;;  %3332 = vmatpush.msra.mxu1 %v2504_v20  ;;  %v2211_v17 = vld [vmem:[#allocation7 + $0xa70] sm:$0xff]  ;;  %v2037_v20 = vld [vmem:[#allocation7 + $0x500] sm:$0xff] }
 0x306   :  { %3510 = vmatpush.msra.mxu2 %v1960_v22  ;;  %3461 = vmatpush.msra.mxu3 %v2330_v23  ;;  %v2177_v22 = vld [vmem:[#allocation7 + $0x960] sm:$0xff]  ;;  %v1883_v23 = vld [vmem:[#allocation7 + $0x30] sm:$0xff] }
 0x307   :  { %3477 = vmatpush.msra.mxu0 %v2470_v6  ;;  %3333 = vmatpush.msra.mxu1 %v2497_v16  ;;  %v2204_v6 = vld [vmem:[#allocation7 + $0xa38] sm:$0xff]  ;;  %v2170_v16 = vld [vmem:[#allocation7 + $0x928] sm:$0xff] }
 0x308   :  { %3462 = vmatmul.f32.vlgmr.msra.gmra.mxu3 %v4129_v21  ;;  %3511 = vmatpush.msra.mxu2 %v1953_v28  ;;  %v2436_v28 = vld [vmem:[#allocation7 + $0x1178] sm:$0xff] }
 0x309   :  { %3526 = vmatpush.msrb.mxu3 %v2100_v18  ;;  %3478 = vmatpush.msra.mxu0 %v2463_v29  ;;  %v2023_v18 = vld [vmem:[#allocation7 + $0x490] sm:$0xff] }
 0x30a   :  { %3334 = vmatpush.msra.mxu1 %v2490_v2  ;;  %3512 = vmatpush.msra.mxu2 %v1946_v30  ;;  %v2163_v29 = vld [vmem:[#allocation7 + $0x8f0] sm:$0xff]  ;;  %v2429_v30 = vld [vmem:[#allocation7 + $0x1140] sm:$0xff] }
 0x30b   :  { %3527 = vmatpush.msrb.mxu3 %v2093_v31  ;;  %3479 = vmatpush.msra.mxu0 %v2456_v63  ;;  %v3753_v31 = vld [vmem:[#allocation2 + $0x10] sm:$0xff]  ;;  %v2016_v63 = vld [vmem:[#allocation7 + $0x458] sm:$0xff] }
 0x30c   :  { %3335 = vmatpush.msra.mxu1 %v2483_v41  ;;  %3513 = vmatpush.msra.mxu2 %v1939_v19  ;;  %v2156_v41 = vld [vmem:[#allocation7 + $0x8b8] sm:$0xff]  ;;  %v2183_v19 = vld [vmem:[#allocation7 + $0x990] sm:$0xff] }
 0x30d   :  { %3528 = vmatpush.msrb.mxu3 %v2086_v35  ;;  %3480 = vmatpush.msra.mxu0 %v2449_v54  ;;  %v2422_v35 = vld [vmem:[#allocation7 + $0x1108] sm:$0xff]  ;;  %v2149_v54 = vld [vmem:[#allocation7 + $0x880] sm:$0xff] }
 0x30e   :  { %3336 = vmatpush.msra.mxu1 %v2476_v38  ;;  %3514 = vmatpush.msra.mxu2 %v1932_v42  ;;  %v2415_v38 = vld [vmem:[#allocation7 + $0x10d0] sm:$0xff]  ;;  %v2142_v42 = vld [vmem:[#allocation7 + $0x848] sm:$0xff] }
 0x30f   :  { %3529 = vmatpush.msrb.mxu3 %v2079_v44  ;;  %3481 = vmatpush.msra.mxu0 %v2442_v45  ;;  %v3023_v1 = vpop.f32.mrf.mxu1  ;;  %v2169_v44 = vld [vmem:[#allocation7 + $0x920] sm:$0xff]  ;;  %v2408_v45 = vld [vmem:[#allocation7 + $0x1098] sm:$0xff] }
 0x310   :  { %3337 = vmatpush.msra.mxu1 %v2469_v46  ;;  %3482 = vmatmul.f32.vlgmr.msra.gmra.mxu0 %v4135_v24  ;;  %v3024_v55 = vadd.f32 %v3023_v1, %v3004_v39  ;;  %v1995_v46 = vld [vmem:[#allocation7 + $0x3b0] sm:$0xff]  ;;  %v2162_v39 = vld [vmem:[#allocation7 + $0x8e8] sm:$0xff] }
 0x311   :  { %3515 = vmatpush.msra.mxu2 %v1925_v53  ;;  %3530 = vmatpush.msrb.mxu3 %v2072_v47  ;;  %v2135_v53 = vld [vmem:[#allocation7 + $0x810] sm:$0xff]  ;;  %v2401_v47 = vld [vmem:[#allocation7 + $0x1060] sm:$0xff]  ;;  %v2394_v1 = vld [vmem:[#allocation7 + $0x1028] sm:$0xff] }
 0x312   :  { %3546 = vmatpush.msrb.mxu0 %v2212_v60  ;;  %3338 = vmatpush.msra.mxu1 %v2462_v48  ;;  %v3044_v62 = vadd.f32 %v3043_v57, %v3024_v55  ;;  %v2548_v60 = vld [vmem:[#allocation7 + $0x14f8] sm:$0xff]  ;;  %v2387_v57 = vld [vmem:[#allocation7 + $0xff0] sm:$0xff] }
 0x313   :  { %3516 = vmatpush.msra.mxu2 %v1918_v49  ;;  %3531 = vmatpush.msrb.mxu3 %v2065_v56  ;;  %v2128_v48 = vld [vmem:[#allocation7 + $0x7d8] sm:$0xff]  ;;  %v2155_v49 = vld [vmem:[#allocation7 + $0x8b0] sm:$0xff]  ;;  %v2541_v56 = vld [vmem:[#allocation7 + $0x14c0] sm:$0xff] }
 0x314   :  { %3547 = vmatpush.msrb.mxu0 %v2205_v26  ;;  %3339 = vmatpush.msra.mxu1 %v2455_v58  ;;  %v3064_v7 = vadd.f32 %v3063_v11, %v3044_v62  ;;  %v2121_v26 = vld [vmem:[#allocation7 + $0x7a0] sm:$0xff]  ;;  %v2148_v55 = vld [vmem:[#allocation7 + $0x878] sm:$0xff]  ;;  %v2534_v58 = vld [vmem:[#allocation7 + $0x1488] sm:$0xff] }
 0x315   :  { %3517 = vmatpush.msra.mxu2 %v1911_v3  ;;  %3532 = vmatpush.msrb.mxu3 %v2058_v59  ;;  %v2114_v3 = vld [vmem:[#allocation7 + $0x768] sm:$0xff]  ;;  %v2141_v59 = vld [vmem:[#allocation7 + $0x840] sm:$0xff]  ;;  %v2527_v62 = vld [vmem:[#allocation7 + $0x1450] sm:$0xff] }
 0x316   :  { %3548 = vmatpush.msrb.mxu0 %v2198_v34  ;;  %3340 = vmatpush.msra.mxu1 %v2448_v0  ;;  %v3084_v32 = vadd.f32 %v3083_v52, %v3064_v7  ;;  %v2380_v34 = vld [vmem:[#allocation7 + $0xfb8] sm:$0xff]  ;;  %v2134_v11 = vld [vmem:[#allocation7 + $0x808] sm:$0xff]  ;;  %v2373_v0 = vld [vmem:[#allocation7 + $0xf80] sm:$0xff] }
 0x317   :  { %3518 = vmatpush.msra.mxu2 %v1904_v5  ;;  %3533 = vmatpush.msrb.mxu3 %v2051_v14  ;;  %v2520_v5 = vld [vmem:[#allocation7 + $0x1418] sm:$0xff]  ;;  %v2646_v14 = vld [vmem:[#allocation7 + $0x1808] sm:$0xff]  ;;  %v2513_v52 = vld [vmem:[#allocation7 + $0x13e0] sm:$0xff] }
 0x318   :  { %3549 = vmatpush.msrb.mxu0 %v2191_v51  ;;  %3341 = vmatpush.msra.mxu1 %v2441_v8  ;;  %3726 = vtanh.f32 %v3084_v32  ;;  %v2127_v51 = vld [vmem:[#allocation7 + $0x7d0] sm:$0xff]  ;;  %v2366_v7 = vld [vmem:[#allocation7 + $0xf48] sm:$0xff]  ;;  %v2632_v32 = vld [vmem:[#allocation7 + $0x1798] sm:$0xff] }
 0x319   :  { %3519 = vmatpush.msra.mxu2 %v1897_v9  ;;  %3534 = vmatpush.msrb.mxu3 %v2044_v10  ;;  %v2639_v8 = vld [vmem:[#allocation7 + $0x17d0] sm:$0xff]  ;;  %v2120_v9 = vld [vmem:[#allocation7 + $0x798] sm:$0xff] }
 0x31a   :  { %3550 = vmatpush.msrb.mxu0 %v2184_v12  ;;  %3342 = vmatmul.f32.vlgmr.msra.gmra.mxu1 %v4135_v24  ;;  %v2359_v10 = vld [vmem:[#allocation7 + $0xf10] sm:$0xff]  ;;  %v2506_v12 = vld [vmem:[#allocation7 + $0x13a8] sm:$0xff] }
 0x31b   :  { %3520 = vmatpush.msra.mxu2 %v1890_v15  ;;  %3406 = vmatpush.msrb.mxu1 %v2211_v17  ;;  %v2113_v15 = vld [vmem:[#allocation7 + $0x760] sm:$0xff]  ;;  %v2352_v17 = vld [vmem:[#allocation7 + $0xed8] sm:$0xff] }
 0x31c   :  { %3535 = vmatpush.msrb.mxu3 %v2037_v20  ;;  %3551 = vmatpush.msrb.mxu0 %v2177_v22  ;;  %v2499_v20 = vld [vmem:[#allocation7 + $0x1370] sm:$0xff]  ;;  %v2625_v22 = vld [vmem:[#allocation7 + $0x1760] sm:$0xff] }
 0x31d   :  { %3521 = vmatpush.msra.mxu2 %v1883_v23  ;;  %3407 = vmatpush.msrb.mxu1 %v2204_v6  ;;  %v2106_v23 = vld [vmem:[#allocation7 + $0x728] sm:$0xff]  ;;  %v2345_v6 = vld [vmem:[#allocation7 + $0xea0] sm:$0xff] }
 0x31e   :  { %3536 = vmatpush.msrb.mxu3 %v2030_v25  ;;  %v3727_v2 = vpop.eup %3726  ;;  %3552 = vmatpush.msrb.mxu0 %v2170_v16  ;;  %v2492_v25 = vld [vmem:[#allocation7 + $0x1338] sm:$0xff]  ;;  %v2618_v16 = vld [vmem:[#allocation7 + $0x1728] sm:$0xff] }
 0x31f   :  { %3522 = vmatmul.f32.vlgmr.msra.gmra.mxu2 %v4114_v50  ;;  %v3655_v61 = vadd.f32 %v3753_v31, %v3727_v2  ;;  %3408 = vmatpush.msrb.mxu1 %v2197_v43  ;;  %v2176_v50 = vld [vmem:[#allocation7 + $0x958] sm:$0xff]  ;;  %v2338_v43 = vld [vmem:[#allocation7 + $0xe68] sm:$0xff]  ;;  %v2331_v2 = vld [vmem:[#allocation7 + $0xe30] sm:$0xff] }
 0x320   :  { %3586 = vmatpush.msrb.mxu2 %v2436_v28  ;;  %3537 = vmatpush.msrb.mxu3 %v2023_v18  ;;  %v2645_v28 = vld [vmem:[#allocation7 + $0x1800] sm:$0xff]  ;;  %v2604_v31 = vld [vmem:[#allocation7 + $0x16b8] sm:$0xff] }
 0x321   :  { %3553 = vmatpush.msrb.mxu0 %v2163_v29  ;;  %3662 = vst [vmem:[#allocation11 + $0x10] sm:$0xff] %v3655_v61  ;;  %3409 = vmatpush.msrb.mxu1 %v2190_v27  ;;  %v2485_v18 = vld [vmem:[#allocation7 + $0x1300] sm:$0xff]  ;;  %v2611_v29 = vld [vmem:[#allocation7 + $0x16f0] sm:$0xff]  ;;  %v2638_v27 = vld [vmem:[#allocation7 + $0x17c8] sm:$0xff] }
 0x322   :  { %3587 = vmatpush.msrb.mxu2 %v2429_v30  ;;  %3538 = vmatpush.msrb.mxu3 %v2016_v63  ;;  %v2478_v30 = vld [vmem:[#allocation7 + $0x12c8] sm:$0xff]  ;;  %v2631_v61 = vld [vmem:[#allocation7 + $0x1790] sm:$0xff] }
 0x323   :  { %3554 = vmatpush.msrb.mxu0 %v2156_v41  ;;  %3410 = vmatpush.msrb.mxu1 %v2183_v19  ;;  %v2471_v63 = vld [vmem:[#allocation7 + $0x1290] sm:$0xff]  ;;  %v2597_v41 = vld [vmem:[#allocation7 + $0x1680] sm:$0xff]  ;;  %v2624_v19 = vld [vmem:[#allocation7 + $0x1758] sm:$0xff] }
 0x324   :  { %3588 = vmatpush.msrb.mxu2 %v2422_v35  ;;  %3539 = vmatpush.msrb.mxu3 %v2009_v37  ;;  %v2464_v35 = vld [vmem:[#allocation7 + $0x1258] sm:$0xff] }
 0x325   :  { %3555 = vmatpush.msrb.mxu0 %v2149_v54  ;;  %3411 = vmatpush.msrb.mxu1 %v2176_v50  ;;  %v4187_v37 = vld [vmem:[#allocation10] sm:$0x7f]  ;;  %v2617_v50 = vld [vmem:[#allocation7 + $0x1720] sm:$0xff] }
 0x326   :  { %3589 = vmatpush.msrb.mxu2 %v2415_v38  ;;  %3540 = vmatpush.msrb.mxu3 %v2002_v40  ;;  %v2652_v54 = vperm.slane %v4187_v37, 3  ;;  %v2457_v38 = vld [vmem:[#allocation7 + $0x1220] sm:$0xff] }
 0x327   :  { %3556 = vmatpush.msrb.mxu0 %v2142_v42  ;;  %3412 = vmatpush.msrb.mxu1 %v2169_v44  ;;  %v2583_v42 = vld [vmem:[#allocation7 + $0x1610] sm:$0xff]  ;;  %v2610_v44 = vld [vmem:[#allocation7 + $0x16e8] sm:$0xff] }
 0x328   :  { %3590 = vmatpush.msrb.mxu2 %v2408_v45  ;;  %3541 = vmatpush.msrb.mxu3 %v1995_v46  ;;  %v2450_v45 = vld [vmem:[#allocation7 + $0x11e8] sm:$0xff] }
 0x329   :  { %3557 = vmatpush.msrb.mxu0 %v2135_v53  ;;  %3413 = vmatpush.msrb.mxu1 %v2162_v39  ;;  %v2603_v53 = vld [vmem:[#allocation7 + $0x16b0] sm:$0xff] }
 0x32a   :  { %3542 = vmatmul.f32.vlgmr.msrb.gmra.mxu3 %v4118_v4  ;;  %3591 = vmatpush.msrb.mxu2 %v2401_v47  ;;  %v2107_v4 = vld [vmem:[#allocation7 + $0x730] sm:$0xff]  ;;  %v2569_v47 = vld [vmem:[#allocation7 + $0x15a0] sm:$0xff] }
 0x32b   :  { %3606 = vmatpush.msra.mxu3 %v2548_v60  ;;  %3558 = vmatpush.msrb.mxu0 %v2128_v48  ;;  %v2443_v39 = vld [vmem:[#allocation7 + $0x11b0] sm:$0xff]  ;;  %v2596_v60 = vld [vmem:[#allocation7 + $0x1678] sm:$0xff]  ;;  %v3123_v48 = vpop.f32.mrf.mxu2 }
 0x32c   :  { %3414 = vmatpush.msrb.mxu1 %v2155_v49  ;;  %3592 = vmatpush.msrb.mxu2 %v2394_v1  ;;  %v2562_v49 = vld [vmem:[#allocation7 + $0x1568] sm:$0xff] }
 0x32d   :  { %3607 = vmatpush.msra.mxu3 %v2541_v56  ;;  %3559 = vmatpush.msrb.mxu0 %v2121_v26  ;;  %v2589_v56 = vld [vmem:[#allocation7 + $0x1640] sm:$0xff]  ;;  %v2555_v26 = vld [vmem:[#allocation7 + $0x1530] sm:$0xff] }
 0x32e   :  { %3415 = vmatpush.msrb.mxu1 %v2148_v55  ;;  %3593 = vmatpush.msrb.mxu2 %v2387_v57  ;;  %v2582_v55 = vld [vmem:[#allocation7 + $0x1608] sm:$0xff]  ;;  %v3143_v57 = vpop.f32.mrf.mxu3 }
 0x32f   :  { %3608 = vmatpush.msra.mxu3 %v2534_v58  ;;  %3560 = vmatpush.msrb.mxu0 %v2114_v3  ;;  %v2575_v58 = vld [vmem:[#allocation7 + $0x15d0] sm:$0xff] }
 0x330   :  { %3416 = vmatpush.msrb.mxu1 %v2141_v59  ;;  %3594 = vmatpush.msrb.mxu2 %v2380_v34  ;;  %v2568_v59 = vld [vmem:[#allocation7 + $0x1598] sm:$0xff]  ;;  %v3163_v34 = vpop.f32.mrf.mxu0 }
 0x331   :  { %3609 = vmatpush.msra.mxu3 %v2527_v62  ;;  %3561 = vmatpush.msrb.mxu0 %v2107_v4  ;;  %v3103_v40 = vpop.f32.mrf.mxu1  ;;  %v2561_v62 = vld [vmem:[#allocation7 + $0x1560] sm:$0xff] }
 0x332   :  { %3417 = vmatpush.msrb.mxu1 %v2134_v11  ;;  %3562 = vmatmul.f32.vlgmr.msrb.gmra.mxu0 %v4122_v13  ;;  %v3104_v46 = vadd.f32 %v3103_v40, %v2652_v54  ;;  %v2554_v11 = vld [vmem:[#allocation7 + $0x1528] sm:$0xff] }
 0x333   :  { %3595 = vmatpush.msrb.mxu2 %v2373_v0  ;;  %3610 = vmatpush.msra.mxu3 %v2520_v5  ;;  %v3203_v5 = vpop.f32.mrf.mxu2 }
 0x334   :  { %3628 = vmatpush.msra.mxu0 %v2646_v14  ;;  %3418 = vmatpush.msrb.mxu1 %v2127_v51  ;;  %v3124_v1 = vadd.f32 %v3123_v48, %v3104_v46  ;;  %v2324_v14 = vld [vmem:[#allocation7 + $0xdf8] sm:$0xff] }
 0x335   :  { %3596 = vmatpush.msrb.mxu2 %v2366_v7  ;;  %3611 = vmatpush.msra.mxu3 %v2513_v52  ;;  %v2317_v52 = vld [vmem:[#allocation7 + $0xdc0] sm:$0xff] }
 0x336   :  { %3629 = vmatpush.msra.mxu0 %v2639_v8  ;;  %3419 = vmatpush.msrb.mxu1 %v2120_v9  ;;  %v3144_v3 = vadd.f32 %v3143_v57, %v3124_v1  ;;  %v3223_v7 = vpop.f32.mrf.mxu3  ;;  %v2310_v9 = vld [vmem:[#allocation7 + $0xd88] sm:$0xff] }
 0x337   :  { %3597 = vmatpush.msrb.mxu2 %v2359_v10  ;;  %3612 = vmatpush.msra.mxu3 %v2506_v12  ;;  %v2303_v10 = vld [vmem:[#allocation7 + $0xd50] sm:$0xff]  ;;  %v2296_v12 = vld [vmem:[#allocation7 + $0xd18] sm:$0xff] }
 0x338   :  { %3630 = vmatpush.msra.mxu0 %v2632_v32  ;;  %3420 = vmatpush.msrb.mxu1 %v2113_v15  ;;  %v3164_v4 = vadd.f32 %v3163_v34, %v3144_v3  ;;  %v2289_v15 = vld [vmem:[#allocation7 + $0xce0] sm:$0xff] }
 0x339   :  { %3598 = vmatpush.msrb.mxu2 %v2352_v17  ;;  %3613 = vmatpush.msra.mxu3 %v2499_v20  ;;  %v3755_v17 = vld [vmem:[#allocation2 + $0x18] sm:$0xff]  ;;  %v3757_v34 = vld [vmem:[#allocation2 + $0x28] sm:$0xff] }
 0x33a   :  { %3631 = vmatpush.msra.mxu0 %v2625_v22  ;;  %3421 = vmatpush.msrb.mxu1 %v2106_v23  ;;  %v2282_v22 = vld [vmem:[#allocation7 + $0xca8] sm:$0xff]  ;;  %v2275_v23 = vld [vmem:[#allocation7 + $0xc70] sm:$0xff] }
 0x33b   :  { %3599 = vmatpush.msrb.mxu2 %v2345_v6  ;;  %3614 = vmatpush.msra.mxu3 %v2492_v25  ;;  %v2261_v6 = vld [vmem:[#allocation7 + $0xc00] sm:$0xff]  ;;  %v2254_v25 = vld [vmem:[#allocation7 + $0xbc8] sm:$0xff] }
 0x33c   :  { %3632 = vmatpush.msra.mxu0 %v2618_v16  ;;  %3422 = vmatmul.f32.vlgmr.msrb.gmra.mxu1 %v4122_v13  ;;  %v2590_v13 = vld [vmem:[#allocation7 + $0x1648] sm:$0xff]  ;;  %v2247_v16 = vld [vmem:[#allocation7 + $0xb90] sm:$0xff] }
 0x33d   :  { %3600 = vmatpush.msrb.mxu2 %v2338_v43  ;;  %3488 = vmatpush.msra.mxu1 %v2645_v28  ;;  %v2240_v43 = vld [vmem:[#allocation7 + $0xb58] sm:$0xff]  ;;  %v2233_v28 = vld [vmem:[#allocation7 + $0xb20] sm:$0xff] }
 0x33e   :  { %3615 = vmatpush.msra.mxu3 %v2485_v18  ;;  %3633 = vmatpush.msra.mxu0 %v2611_v29  ;;  %v2226_v18 = vld [vmem:[#allocation7 + $0xae8] sm:$0xff]  ;;  %v2219_v29 = vld [vmem:[#allocation7 + $0xab0] sm:$0xff] }
 0x33f   :  { %3601 = vmatpush.msrb.mxu2 %v2331_v2  ;;  %3489 = vmatpush.msra.mxu1 %v2638_v27  ;;  %v2653_v2 = vperm.slane %v4187_v37, 4  ;;  %v3243_v27 = vpop.f32.mrf.mxu0 }
 0x340   :  { %3616 = vmatpush.msra.mxu3 %v2478_v30  ;;  %3634 = vmatpush.msra.mxu0 %v2604_v31 }
 0x341   :  { %3602 = vmatmul.f32.vlgmr.msrb.gmra.mxu2 %v4129_v21  ;;  %3490 = vmatpush.msra.mxu1 %v2631_v61  ;;  %v2576_v21 = vld [vmem:[#allocation7 + $0x15d8] sm:$0xff]  ;;  %v3244_v31 = vadd.f32 %v3243_v27, %v2653_v2 }
 0x342   :  { %3617 = vmatpush.msra.mxu3 %v2471_v63  ;;  %3635 = vmatpush.msra.mxu0 %v2597_v41  ;;  %v3283_v63 = vpop.f32.mrf.mxu2 }
 0x343   :  { %3491 = vmatpush.msra.mxu1 %v2624_v19 }
 0x344   :  { %3618 = vmatpush.msra.mxu3 %v2464_v35  ;;  %3636 = vmatpush.msra.mxu0 %v2590_v13 }
 0x345   :  { %3492 = vmatpush.msra.mxu1 %v2617_v50 }
 0x346   :  { %3619 = vmatpush.msra.mxu3 %v2457_v38  ;;  %3637 = vmatpush.msra.mxu0 %v2583_v42 }
 0x347   :  { %3493 = vmatpush.msra.mxu1 %v2610_v44  ;;  %v3303_v19 = vpop.f32.mrf.mxu3 }
 0x348   :  { %3620 = vmatpush.msra.mxu3 %v2450_v45  ;;  %3638 = vmatpush.msra.mxu0 %v2576_v21  ;;  %v3756_v45 = vld [vmem:[#allocation2 + $0x20] sm:$0xff]  ;;  %v2654_v21 = vperm.slane %v4187_v37, 5 }
 0x349   :  { %3494 = vmatpush.msra.mxu1 %v2603_v53  ;;  %v3323_v13 = vpop.f32.mrf.mxu0 }
 0x34a   :  { %3621 = vmatpush.msra.mxu3 %v2443_v39  ;;  %3639 = vmatpush.msra.mxu0 %v2569_v47 }
 0x34b   :  { %3622 = vmatmul.f32.vlgmr.msra.gmra.mxu3 %v4135_v24  ;;  %3495 = vmatpush.msra.mxu1 %v2596_v60 }
 0x34c   :  { %3640 = vmatpush.msra.mxu0 %v2562_v49 }
 0x34d   :  { %3496 = vmatpush.msra.mxu1 %v2589_v56 }
 0x34e   :  { %3641 = vmatpush.msra.mxu0 %v2555_v26 }
 0x34f   :  { %3497 = vmatpush.msra.mxu1 %v2582_v55  ;;  %3699 = vmatmul.msk.f32.vlgmr.msra.gmra.mxu0 %vm886_vm0, %v4144_v36 }
 0x351   :  { %3498 = vmatpush.msra.mxu1 %v2575_v58 }
 0x353   :  { %3499 = vmatpush.msra.mxu1 %v2568_v59  ;;  %v3183_v24 = vpop.f32.mrf.mxu1 }
 0x354   :  { %v3184_v0 = vadd.f32 %v3183_v24, %v3164_v4  ;;  %v2655_v4 = vperm.slane %v4187_v37, 6 }
 0x355   :  { %3500 = vmatpush.msra.mxu1 %v2561_v62 }
 0x356   :  { %v3204_v51 = vadd.f32 %v3203_v5, %v3184_v0 }
 0x357   :  { %3501 = vmatpush.msra.mxu1 %v2554_v11 }
 0x358   :  { %3698 = vmatmul.msk.f32.vlgmr.msra.gmra.mxu1 %vm886_vm0, %v4144_v36  ;;  %v3224_v8 = vadd.f32 %v3223_v7, %v3204_v51  ;;  %v2268_v36 = vld [vmem:[#allocation7 + $0xc38] sm:$0xff] }
 0x359   :  { %3566 = vmatpush.msrb.mxu1 %v2324_v14 }
 0x35a   :  { %3728 = vtanh.f32 %v3224_v8 }
 0x35b   :  { %3567 = vmatpush.msrb.mxu1 %v2317_v52 }
 0x35d   :  { %3568 = vmatpush.msrb.mxu1 %v2310_v9 }
 0x35e   :  { %v3363_v40 = vpop.f32.mrf.mxu2 }
 0x35f   :  { %3569 = vmatpush.msrb.mxu1 %v2303_v10 }
 0x360   :  { %v3729_v32 = vpop.eup %3728 }
 0x361   :  { %v3656_v20 = vadd.f32 %v3755_v17, %v3729_v32  ;;  %3570 = vmatpush.msrb.mxu1 %v2296_v12  ;;  %v3758_v17 = vld [vmem:[#allocation2 + $0x30] sm:$0xff] }
 0x363   :  { %3663 = vst [vmem:[#allocation11 + $0x18] sm:$0xff] %v3656_v20  ;;  %3571 = vmatpush.msrb.mxu1 %v2289_v15 }
 0x365   :  { %3572 = vmatpush.msrb.mxu1 %v2282_v22 }
 0x367   :  { %3573 = vmatpush.msrb.mxu1 %v2275_v23 }
 0x369   :  { %3574 = vmatpush.msrb.mxu1 %v2268_v36  ;;  %v3383_v46 = vpop.f32.mrf.mxu3 }
 0x36a   :  { %v3384_v53 = vadd.f32 %v3383_v46, %v2654_v21 }
 0x36b   :  { %3575 = vmatpush.msrb.mxu1 %v2261_v6  ;;  %v3403_v39 = vpop.f32.mrf.mxu0 }
 0x36c   :  { %v3404_v60 = vadd.f32 %v3403_v39, %v3384_v53 }
 0x36d   :  { %3576 = vmatpush.msrb.mxu1 %v2254_v25 }
 0x36f   :  { %3577 = vmatpush.msrb.mxu1 %v2247_v16 }
 0x371   :  { %3578 = vmatpush.msrb.mxu1 %v2240_v43 }
 0x373   :  { %3579 = vmatpush.msrb.mxu1 %v2233_v28 }
 0x375   :  { %3580 = vmatpush.msrb.mxu1 %v2226_v18  ;;  %v3263_v30 = vpop.f32.mrf.mxu1 }
 0x376   :  { %v3264_v61 = vadd.f32 %v3263_v30, %v3244_v31 }
 0x377   :  { %3581 = vmatpush.msrb.mxu1 %v2219_v29 }
 0x378   :  { %3582 = vmatmul.f32.vlgmr.msrb.gmra.mxu1 %v4126_v33  ;;  %v3284_v41 = vadd.f32 %v3283_v63, %v3264_v61 }
 0x37a   :  { %v3304_v35 = vadd.f32 %v3303_v19, %v3284_v41 }
 0x37c   :  { %v3324_v54 = vadd.f32 %v3323_v13, %v3304_v35 }
 0x380   :  { %v3443_v49 = vpop.f32.mrf.mxu2 }
 0x38b   :  { %v3463_v56 = vpop.f32.mrf.mxu3 }
 0x38d   :  { %v3483_v55 = vpop.f32.mrf.mxu0 }
 0x397   :  { %v3343_v50 = vpop.f32.mrf.mxu1 }
 0x398   :  { %v3344_v38 = vadd.f32 %v3343_v50, %v3324_v54 }
 0x39a   :  { %v3364_v42 = vadd.f32 %v3363_v40, %v3344_v38 }
 0x39c   :  { %3730 = vtanh.f32 %v3364_v42 }
 0x3a2   :  { %v3731_v44 = vpop.eup %3730  ;;  %v3523_v24 = vpop.f32.mrf.mxu2 }
 0x3a3   :  { %v3657_v33 = vadd.f32 %v3756_v45, %v3731_v44  ;;  %v3524_v0 = vadd.f32 %v3523_v24, %v2655_v4 }
 0x3a5   :  { %3664 = vst [vmem:[#allocation11 + $0x20] sm:$0xff] %v3657_v33 }
 0x3ad   :  { %v3543_v11 = vpop.f32.mrf.mxu3 }
 0x3ae   :  { %v3544_v5 = vadd.f32 %v3543_v11, %v3524_v0 }
 0x3af   :  { %v3563_v14 = vpop.f32.mrf.mxu0 }
 0x3b0   :  { %v3564_v51 = vadd.f32 %v3563_v14, %v3544_v5 }
 0x3b9   :  { %v3423_v47 = vpop.f32.mrf.mxu1 }
 0x3ba   :  { %v3424_v48 = vadd.f32 %v3423_v47, %v3404_v60 }
 0x3bc   :  { %v3444_v1 = vadd.f32 %v3443_v49, %v3424_v48 }
 0x3be   :  { %v3464_v26 = vadd.f32 %v3463_v56, %v3444_v1 }
 0x3c0   :  { %v3484_v57 = vadd.f32 %v3483_v55, %v3464_v26 }
 0x3c4   :  { %v3603_v8 = vpop.f32.mrf.mxu2 }
 0x3cc   :  { %v3643_v32 = vpop.f32.mrf.mxu0 }
 0x3ce   :  { %v3623_v10 = vpop.f32.mrf.mxu3 }
 0x3d5   :  { %v3503_v58 = vpop.f32.mrf.mxu1 }
 0x3d6   :  { %v3504_v3 = vadd.f32 %v3503_v58, %v3484_v57 }
 0x3d8   :  { %3732 = vtanh.f32 %v3504_v3 }
 0x3de   :  { %v3733_v59 = vpop.eup %3732 }
 0x3df   :  { %v3658_v62 = vadd.f32 %v3757_v34, %v3733_v59 }
 0x3e1   :  { %3665 = vst [vmem:[#allocation11 + $0x28] sm:$0xff] %v3658_v62 }
 0x3f5   :  { %v3583_v7 = vpop.f32.mrf.mxu1 }
 0x3f6   :  { %v3584_v52 = vadd.f32 %v3583_v7, %v3564_v51 }
 0x3f8   :  { %v3604_v9 = vadd.f32 %v3603_v8, %v3584_v52 }
 0x3fa   :  { %v3624_v12 = vadd.f32 %v3623_v10, %v3604_v9 }
 0x3fc   :  { %v3644_v15 = vadd.f32 %v3643_v32, %v3624_v12 }
 0x3fe   :  { %3734 = vtanh.f32 %v3644_v15 }
 0x404   :  { %v3735_v37 = vpop.eup %3734 }
 0x405   :  { %v3659_v20 = vadd.f32 %v3758_v17, %v3735_v37 }
 0x407   :  { %3666 = vst.msk [vmem:[#allocation11 + $0x30] sm:$0xff] %vm886_vm0, %v3659_v20 }
 0x408   :  { %3677 = dma.vmem_to_hbm [thread:$0]  %s3673_s4, 896, %s3675_s19, [#allocation4]  }
 0x409   :  { %3909 = dma.done.wait [#allocation4], 896  }
 0x40a   :  { %3910 = vsyncadd [#allocation4], 4294966400 }
 0x40b   :  { %3682 = vsyncpa [#allocation3], 1 }
 0x40c   :  { %3683 = vsyncpa [#allocation6], 1 }
 0x40d   :  { %3684 = vsyncpa [#allocation9], 1 }
 0x40e   :  { %3685 = vsyncpa [#allocation4], 1 }

</bundles_post_ra>
